<compile_context>
chip_gen: v6e
topology: v6e:2x2x1
jax: 0.10.0
libtpu: 0.0.40
codegen_flags: <defaults>
</compile_context>

<pallas_src>
import jax
import jax.numpy as jnp
from jax.experimental import pallas as pl
from jax.experimental.pallas import tpu as pltpu

D_IN = 28 * 28            # 784
HIDDEN = (1024, 512, 256)
D_OUT = 1
D_OUT_PAD = 128           # MXU-native N for the final matmul (zero-padded columns)
MAX_TILE_B = 512          # batch tile (multiple of 256 once B is large)
LEAKY_SLOPE = 0.2


def _round_up(x, m):
    return ((x + m - 1) // m) * m


def _has_bf16_vpu():
    """bf16 epilogue only where the VPU supports bf16 (v6e / v7x)."""
    try:
        kind = jax.devices()[0].device_kind.lower()
    except Exception:
        return False
    return any(tag in kind for tag in ("v6", "v7", "7x"))


BF16_EPILOGUE = _has_bf16_vpu()


def _leaky_relu(x, slope=LEAKY_SLOPE):
    # max-form LeakyReLU: valid for 0 < slope < 1, 2 VALU ops per vreg.
    return jnp.maximum(x, slope * x)


def make_discriminator_kernel(bf16_epilogue):
    def discriminator_kernel(x_ref,
                             w1_ref, b1_ref,
                             w2_ref, b2_ref,
                             w3_ref, b3_ref,
                             w4_ref, b4_ref,
                             o_ref):
        def layer(h_bf16, w_ref, b_ref):
            acc = jnp.dot(h_bf16, w_ref[...], preferred_element_type=jnp.float32)
            if bf16_epilogue:
                # packed bf16 vregs halve the VPU-bound epilogue work (v6e/v7x).
                h = acc.astype(jnp.bfloat16) + b_ref[...]
                return _leaky_relu(h)
            # f32 epilogue for chips without a bf16 VPU (v5e and older).
            h = acc + b_ref[...]
            return _leaky_relu(h).astype(jnp.bfloat16)

        h = x_ref[...].astype(jnp.bfloat16)          # f32 input tile -> bf16 MXU operand
        h = layer(h, w1_ref, b1_ref)
        h = layer(h, w2_ref, b2_ref)
        h = layer(h, w3_ref, b3_ref)
        out = jnp.dot(h, w4_ref[...], preferred_element_type=jnp.float32)
        # Only column 0 of the padded final layer is real -> store a single f32 column.
        o_ref[...] = out[:, :D_OUT] + b4_ref[...]

    return discriminator_kernel


def init_params(key):
    """Raw params mirroring weights_init: Linear weights ~ N(0, 0.02), zero bias.
    Stored as [in_features, out_features] (transpose of torch Linear.weight)."""
    dims = [(D_IN, HIDDEN[0]), (HIDDEN[0], HIDDEN[1]),
            (HIDDEN[1], HIDDEN[2]), (HIDDEN[2], D_OUT)]
    params = []
    for d_in, d_out in dims:
        key, wk = jax.random.split(key)
        w = 0.02 * jax.random.normal(wk, (d_in, d_out), dtype=jnp.float32)
        b = jnp.zeros((d_out,), dtype=jnp.float32)
        params += [w, b]
    return tuple(params)


def prepare_params(params, bf16_epilogue=BF16_EPILOGUE):
    """One-time conversion to kernel layout: bf16 weights for the MXU, biases in the
    epilogue dtype, final layer columns zero-padded 1 -> 128."""
    w1, b1, w2, b2, w3, b3, w4, b4 = params
    bias_dt = jnp.bfloat16 if bf16_epilogue else jnp.float32
    w4p = jnp.zeros((HIDDEN[2], D_OUT_PAD), jnp.float32).at[:, :D_OUT].set(w4)
    return (w1.astype(jnp.bfloat16), b1.reshape(1, -1).astype(bias_dt),
            w2.astype(jnp.bfloat16), b2.reshape(1, -1).astype(bias_dt),
            w3.astype(jnp.bfloat16), b3.reshape(1, -1).astype(bias_dt),
            w4p.astype(jnp.bfloat16), b4.reshape(1, D_OUT).astype(jnp.float32))


def discriminator_forward(x_nchw, kparams):
    """x_nchw: [B, 1, 28, 28] -> logits [B, 1] (float32)."""
    B = x_nchw.shape[0]
    x_flat = x_nchw.reshape(B, -1).astype(jnp.float32)   # matches torch x.view(B, -1)

    tile_b = min(MAX_TILE_B, _round_up(B, 8))
    num_tiles = (B + tile_b - 1) // tile_b
    B_pad = num_tiles * tile_b
    if B_pad != B:
        x_flat = jnp.pad(x_flat, ((0, B_pad - B), (0, 0)))

    w1, b1, w2, b2, w3, b3, w4, b4 = kparams

    def resident(arr):
        # Full-array block with a constant index_map -> VMEM-resident across grid steps.
        return pl.BlockSpec(arr.shape, lambda i: (0, 0))

    flops = 2 * B_pad * (D_IN * HIDDEN[0] + HIDDEN[0] * HIDDEN[1]
                         + HIDDEN[1] * HIDDEN[2] + HIDDEN[2] * D_OUT_PAD)
    bytes_accessed = (x_flat.size * x_flat.dtype.itemsize
                      + sum(int(p.size) * p.dtype.itemsize for p in kparams)
                      + B_pad * D_OUT * 4)

    out = pl.pallas_call(
        make_discriminator_kernel(BF16_EPILOGUE),
        out_shape=jax.ShapeDtypeStruct((B_pad, D_OUT), jnp.float32),
        grid_spec=pltpu.PrefetchScalarGridSpec(
            num_scalar_prefetch=0,
            grid=(num_tiles,),
            in_specs=[
                pl.BlockSpec((tile_b, D_IN), lambda i: (i, 0)),   # streamed batch tile
                resident(w1), resident(b1),
                resident(w2), resident(b2),
                resident(w3), resident(b3),
                resident(w4), resident(b4),
            ],
            out_specs=pl.BlockSpec((tile_b, D_OUT), lambda i: (i, 0)),
        ),
        compiler_params=pltpu.CompilerParams(
            dimension_semantics=("parallel",),       # v7x: shard batch tiles over 2 TCs
            vmem_limit_bytes=32 * 1024 * 1024,       # ~15 MiB actual use @ TILE_B=512
        ),
        cost_estimate=pl.CostEstimate(flops=flops, transcendentals=0,
                                      bytes_accessed=bytes_accessed),
    )(x_flat, *kparams)

    return out[:B]


def reference_forward(x_nchw, params, bf16_epilogue=BF16_EPILOGUE):
    """Pure-JAX reference with matched numerics (bf16 MXU operands, f32 accumulation,
    same epilogue dtype as the kernel)."""
    B = x_nchw.shape[0]
    w1, b1, w2, b2, w3, b3, w4, b4 = params

    def dot_bf16(a, w):
        return jnp.dot(a.astype(jnp.bfloat16), w.astype(jnp.bfloat16),
                       preferred_element_type=jnp.float32)

    h = x_nchw.reshape(B, -1)
    for w, b in ((w1, b1), (w2, b2), (w3, b3)):
        acc = dot_bf16(h, w)
        if bf16_epilogue:
            hb = acc.astype(jnp.bfloat16) + b.reshape(1, -1).astype(jnp.bfloat16)
            h = _leaky_relu(hb)
        else:
            h = _leaky_relu(acc + b.reshape(1, -1)).astype(jnp.bfloat16)
    return dot_bf16(h, w4) + b4.reshape(1, D_OUT)


if __name__ == "__main__":
    key = jax.random.PRNGKey(0)
    key, xk = jax.random.split(key)

    # Small batch of MNIST-shaped inputs (NCHW), sublane-friendly B.
    B = 8
    x = jax.random.normal(xk, (B, 1, 28, 28), dtype=jnp.float32)

    raw_params = init_params(key)
    kparams = prepare_params(raw_params)

    fwd = jax.jit(discriminator_forward)
    logits = jax.block_until_ready(fwd(x, kparams))

    assert logits.shape == (B, 1), logits.shape
    ref = reference_forward(x, raw_params)
    max_err = jnp.max(jnp.abs(logits - ref))
    assert jnp.allclose(logits, ref, atol=2e-3, rtol=2e-3), f"mismatch: max abs err {max_err}"

    print("KERNEL_OK")
</pallas_src>

<mosaic_0001>
module attributes {stable_mosaic.version = 11 : i64} {
  func.func @discriminator_kernel(%arg0: i32, %arg1: memref<8x784xf32, #tpu.memory_space<vmem>>, %arg2: memref<784x1024xbf16, #tpu.memory_space<vmem>>, %arg3: memref<1x1024xf32, #tpu.memory_space<vmem>>, %arg4: memref<1024x512xbf16, #tpu.memory_space<vmem>>, %arg5: memref<1x512xf32, #tpu.memory_space<vmem>>, %arg6: memref<512x256xbf16, #tpu.memory_space<vmem>>, %arg7: memref<1x256xf32, #tpu.memory_space<vmem>>, %arg8: memref<256x128xbf16, #tpu.memory_space<vmem>>, %arg9: memref<1x1xf32, #tpu.memory_space<vmem>>, %arg10: memref<8x1xf32, #tpu.memory_space<vmem>>) attributes {dimension_semantics = [#tpu.dimension_semantics<parallel>], iteration_bounds = array<i64: 1>, scalar_prefetch = 0 : i64, scratch_operands = 0 : i64, tpu.core_type = #tpu.core_type<tc>, window_params = [{transform_indices = @transform_0, window_bounds = array<i64: 8, 784>}, {pipeline_mode = #tpu.pipeline_mode<synchronous>, transform_indices = @transform_1, window_bounds = array<i64: 784, 1024>}, {pipeline_mode = #tpu.pipeline_mode<synchronous>, transform_indices = @transform_2, window_bounds = array<i64: 1, 1024>}, {pipeline_mode = #tpu.pipeline_mode<synchronous>, transform_indices = @transform_3, window_bounds = array<i64: 1024, 512>}, {pipeline_mode = #tpu.pipeline_mode<synchronous>, transform_indices = @transform_4, window_bounds = array<i64: 1, 512>}, {pipeline_mode = #tpu.pipeline_mode<synchronous>, transform_indices = @transform_5, window_bounds = array<i64: 512, 256>}, {pipeline_mode = #tpu.pipeline_mode<synchronous>, transform_indices = @transform_6, window_bounds = array<i64: 1, 256>}, {pipeline_mode = #tpu.pipeline_mode<synchronous>, transform_indices = @transform_7, window_bounds = array<i64: 256, 128>}, {pipeline_mode = #tpu.pipeline_mode<synchronous>, transform_indices = @transform_8, window_bounds = array<i64: 1, 1>}, {transform_indices = @transform_9, window_bounds = array<i64: 8, 1>}]} {
    %c0 = arith.constant 0 : index
    %c0_0 = arith.constant 0 : index
    %0 = vector.load %arg1[%c0, %c0_0] : memref<8x784xf32, #tpu.memory_space<vmem>>, vector<8x784xf32>
    %1 = arith.truncf %0 : vector<8x784xf32> to vector<8x784xbf16>
    %c0_1 = arith.constant 0 : index
    %c0_2 = arith.constant 0 : index
    %2 = vector.load %arg2[%c0_1, %c0_2] : memref<784x1024xbf16, #tpu.memory_space<vmem>>, vector<784x1024xbf16>
    %cst = arith.constant dense<0.000000e+00> : vector<8x1024xf32>
    %3 = tpu.matmul %1, %2, %cst {dimension_numbers = #tpu.dot_dimension_numbers<[1], [0], [0], [1], [0, 0, 1, 1], [], []>} : vector<8x784xbf16>, vector<784x1024xbf16>, vector<8x1024xf32> -> vector<8x1024xf32>
    %c0_3 = arith.constant 0 : index
    %c0_4 = arith.constant 0 : index
    %4 = vector.load %arg3[%c0_3, %c0_4] : memref<1x1024xf32, #tpu.memory_space<vmem>>, vector<1x1024xf32>
    %5 = vector.broadcast %4 : vector<1x1024xf32> to vector<8x1024xf32>
    %6 = arith.addf %3, %5 : vector<8x1024xf32>
    %cst_5 = arith.constant 2.000000e-01 : f32
    %7 = vector.broadcast %cst_5 : f32 to vector<8x1024xf32>
    %8 = arith.mulf %7, %6 : vector<8x1024xf32>
    %9 = arith.maximumf %6, %8 : vector<8x1024xf32>
    %10 = arith.truncf %9 : vector<8x1024xf32> to vector<8x1024xbf16>
    %c0_6 = arith.constant 0 : index
    %c0_7 = arith.constant 0 : index
    %11 = vector.load %arg4[%c0_6, %c0_7] : memref<1024x512xbf16, #tpu.memory_space<vmem>>, vector<1024x512xbf16>
    %cst_8 = arith.constant dense<0.000000e+00> : vector<8x512xf32>
    %12 = tpu.matmul %10, %11, %cst_8 {dimension_numbers = #tpu.dot_dimension_numbers<[1], [0], [0], [1], [0, 0, 1, 1], [], []>} : vector<8x1024xbf16>, vector<1024x512xbf16>, vector<8x512xf32> -> vector<8x512xf32>
    %c0_9 = arith.constant 0 : index
    %c0_10 = arith.constant 0 : index
    %13 = vector.load %arg5[%c0_9, %c0_10] : memref<1x512xf32, #tpu.memory_space<vmem>>, vector<1x512xf32>
    %14 = vector.broadcast %13 : vector<1x512xf32> to vector<8x512xf32>
    %15 = arith.addf %12, %14 : vector<8x512xf32>
    %cst_11 = arith.constant 2.000000e-01 : f32
    %16 = vector.broadcast %cst_11 : f32 to vector<8x512xf32>
    %17 = arith.mulf %16, %15 : vector<8x512xf32>
    %18 = arith.maximumf %15, %17 : vector<8x512xf32>
    %19 = arith.truncf %18 : vector<8x512xf32> to vector<8x512xbf16>
    %c0_12 = arith.constant 0 : index
    %c0_13 = arith.constant 0 : index
    %20 = vector.load %arg6[%c0_12, %c0_13] : memref<512x256xbf16, #tpu.memory_space<vmem>>, vector<512x256xbf16>
    %cst_14 = arith.constant dense<0.000000e+00> : vector<8x256xf32>
    %21 = tpu.matmul %19, %20, %cst_14 {dimension_numbers = #tpu.dot_dimension_numbers<[1], [0], [0], [1], [0, 0, 1, 1], [], []>} : vector<8x512xbf16>, vector<512x256xbf16>, vector<8x256xf32> -> vector<8x256xf32>
    %c0_15 = arith.constant 0 : index
    %c0_16 = arith.constant 0 : index
    %22 = vector.load %arg7[%c0_15, %c0_16] : memref<1x256xf32, #tpu.memory_space<vmem>>, vector<1x256xf32>
    %23 = vector.broadcast %22 : vector<1x256xf32> to vector<8x256xf32>
    %24 = arith.addf %21, %23 : vector<8x256xf32>
    %cst_17 = arith.constant 2.000000e-01 : f32
    %25 = vector.broadcast %cst_17 : f32 to vector<8x256xf32>
    %26 = arith.mulf %25, %24 : vector<8x256xf32>
    %27 = arith.maximumf %24, %26 : vector<8x256xf32>
    %28 = arith.truncf %27 : vector<8x256xf32> to vector<8x256xbf16>
    %c0_18 = arith.constant 0 : index
    %c0_19 = arith.constant 0 : index
    %29 = vector.load %arg8[%c0_18, %c0_19] : memref<256x128xbf16, #tpu.memory_space<vmem>>, vector<256x128xbf16>
    %cst_20 = arith.constant dense<0.000000e+00> : vector<8x128xf32>
    %30 = tpu.matmul %28, %29, %cst_20 {dimension_numbers = #tpu.dot_dimension_numbers<[1], [0], [0], [1], [0, 0, 1, 1], [], []>} : vector<8x256xbf16>, vector<256x128xbf16>, vector<8x128xf32> -> vector<8x128xf32>
    %31 = vector.extract_strided_slice %30 {offsets = [0, 0], sizes = [8, 1], strides = [1, 1]} : vector<8x128xf32> to vector<8x1xf32>
    %c0_21 = arith.constant 0 : index
    %c0_22 = arith.constant 0 : index
    %32 = vector.load %arg9[%c0_21, %c0_22] : memref<1x1xf32, #tpu.memory_space<vmem>>, vector<1x1xf32>
    %33 = vector.broadcast %32 : vector<1x1xf32> to vector<8x1xf32>
    %34 = arith.addf %31, %33 : vector<8x1xf32>
    %c0_23 = arith.constant 0 : index
    %c0_24 = arith.constant 0 : index
    %35 = vector.load %arg10[%c0_23, %c0_24] : memref<8x1xf32, #tpu.memory_space<vmem>>, vector<8x1xf32>
    tpu.vector_store %arg10[%c0_23, %c0_24], %34 {strides = array<i32>} : memref<8x1xf32, #tpu.memory_space<vmem>>, vector<8x1xf32>,
    return
  }
  func.func @transform_0(%arg0: i32) -> (i32, i32) {
    %c0_i32 = arith.constant 0 : i32
    %c0_i32_0 = arith.constant 0 : i32
    return %arg0, %c0_i32 : i32, i32
  }
  func.func @transform_1(%arg0: i32) -> (i32, i32) {
    %c0_i32 = arith.constant 0 : i32
    %c0_i32_0 = arith.constant 0 : i32
    %c0_i32_1 = arith.constant 0 : i32
    return %c0_i32, %c0_i32_0 : i32, i32
  }
  func.func @transform_2(%arg0: i32) -> (i32, i32) {
    %c0_i32 = arith.constant 0 : i32
    %c0_i32_0 = arith.constant 0 : i32
    %c0_i32_1 = arith.constant 0 : i32
    return %c0_i32, %c0_i32_0 : i32, i32
  }
  func.func @transform_3(%arg0: i32) -> (i32, i32) {
    %c0_i32 = arith.constant 0 : i32
    %c0_i32_0 = arith.constant 0 : i32
    %c0_i32_1 = arith.constant 0 : i32
    return %c0_i32, %c0_i32_0 : i32, i32
  }
  func.func @transform_4(%arg0: i32) -> (i32, i32) {
    %c0_i32 = arith.constant 0 : i32
    %c0_i32_0 = arith.constant 0 : i32
    %c0_i32_1 = arith.constant 0 : i32
    return %c0_i32, %c0_i32_0 : i32, i32
  }
  func.func @transform_5(%arg0: i32) -> (i32, i32) {
    %c0_i32 = arith.constant 0 : i32
    %c0_i32_0 = arith.constant 0 : i32
    %c0_i32_1 = arith.constant 0 : i32
    return %c0_i32, %c0_i32_0 : i32, i32
  }
  func.func @transform_6(%arg0: i32) -> (i32, i32) {
    %c0_i32 = arith.constant 0 : i32
    %c0_i32_0 = arith.constant 0 : i32
    %c0_i32_1 = arith.constant 0 : i32
    return %c0_i32, %c0_i32_0 : i32, i32
  }
  func.func @transform_7(%arg0: i32) -> (i32, i32) {
    %c0_i32 = arith.constant 0 : i32
    %c0_i32_0 = arith.constant 0 : i32
    %c0_i32_1 = arith.constant 0 : i32
    return %c0_i32, %c0_i32_0 : i32, i32
  }
  func.func @transform_8(%arg0: i32) -> (i32, i32) {
    %c0_i32 = arith.constant 0 : i32
    %c0_i32_0 = arith.constant 0 : i32
    %c0_i32_1 = arith.constant 0 : i32
    return %c0_i32, %c0_i32_0 : i32, i32
  }
  func.func @transform_9(%arg0: i32) -> (i32, i32) {
    %c0_i32 = arith.constant 0 : i32
    %c0_i32_0 = arith.constant 0 : i32
    return %arg0, %c0_i32 : i32, i32
  }
}

</mosaic_0001>

<bundles_post_ra>
// kernel: discriminator_forward.1
= control target key start
LH: loop header
LB: loop body
LE: loop exit
PB: predicated region body
PF: predicated region fallthrough
CT: control target
= control target key end

     0   :  { %s7514_s0 = inlined_call_operand.vmem [shape: f32[8,784], index: 0, kind: input, shape index: {}]   ;;  %s7515_s1 = inlined_call_operand.hbm [shape: bf16[784,1024], index: 1, kind: input, shape index: {}]   ;;  %s7516_s2 = inlined_call_operand.hbm [shape: f32[1,1024], index: 2, kind: input, shape index: {}]   ;;  %s7517_s3 = inlined_call_operand.hbm [shape: bf16[1024,512], index: 3, kind: input, shape index: {}]   ;;  %s7518_s4 = inlined_call_operand.hbm [shape: f32[1,512], index: 4, kind: input, shape index: {}]   ;;  %s7519_s5 = inlined_call_operand.hbm [shape: bf16[512,256], index: 5, kind: input, shape index: {}]   ;;  %s7520_s6 = inlined_call_operand.hbm [shape: f32[1,256], index: 6, kind: input, shape index: {}]   ;;  %s7521_s7 = inlined_call_operand.hbm [shape: bf16[256,128], index: 7, kind: input, shape index: {}]   ;;  %s7522_s8 = inlined_call_operand.<no memory space> [shape: f32[1,1], index: 8, kind: input, shape index: {}]   ;;  %s7523_s9 = inlined_call_operand.vmem [shape: f32[8,1], index: 9, kind: output, shape index: {}]  }
   0x1   :  { %v14_v0 = vstv %s7522_s8 }
   0x2   :  { %15 = vst [vmem:[#allocation2] sm:$0x1] %v14_v0 }
   0x3   :  { %16 = vsyncpa [#allocation4], 0 }
   0x4   :  { %17 = vsyncpa [#allocation6], 0 }
   0x5   :  { %18 = vsyncpa [#allocation9], 0 }
   0x6   :  { %19 = vsyncpa [#allocation12], 0  ;;  %s7200_s11 = smov [#allocation5]   ;;  %s7201_s13 = smov [#allocation8]  }
   0x7   :  { %s40_s12 = sshll.u32 %s7200_s11, 4  ;;  %s62_s14 = sshll.u32 %s7201_s13, 4  ;;  %s41_s12 = int_to_ptr.vmem [resolvable:$true] %s40_s12  ;;  %s63_s14 = int_to_ptr.vmem [resolvable:$true] %s62_s14 }
   0x8   :  { %s7060_s15 = scalar_lea.vmem %s41_s12, 128  ;;  %p7065_p1 = scmp.lt.s32.totalorder %s41_s12, %s41_s12 }
   0x9   :  { %p7061_p0 = scmp.ne.s32.totalorder %s41_s12, %s7060_s15  ;;  %p7066_p2 = scmp.lt.s32.totalorder %s7060_s15, %s7060_s15 }
   0xb   :  { %p7067_p3 = por %p7066_p2, %p7065_p1 }
   0xd   :  { %p7068_p4 = pnand %p7067_p3, %p7061_p0 }
   0xf   :  { %7071 = shalt.err (!%p7068_p4)
}
  0x10   :  { %43 = dma.hbm_to_vmem [thread:$0]  %s7516_s2, 128, %s41_s12, [#allocation6]  }
  0x11   :  { %s7080_s17 = scalar_lea.vmem %s63_s14, 64  ;;  %p7085_p6 = scmp.lt.s32.totalorder %s63_s14, %s63_s14 }
  0x12   :  { %p7081_p5 = scmp.ne.s32.totalorder %s63_s14, %s7080_s17  ;;  %p7086_p7 = scmp.lt.s32.totalorder %s7080_s17, %s7080_s17 }
  0x14   :  { %p7087_p8 = por %p7086_p7, %p7085_p6 }
  0x16   :  { %p7088_p9 = pnand %p7087_p8, %p7081_p5 }
  0x18   :  { %7091 = shalt.err (!%p7088_p9)
}
  0x19   :  { %65 = dma.hbm_to_vmem [thread:$0]  %s7518_s4, 64, %s63_s14, [#allocation9]  }
  0x1a   :  { %s7202_s20 = smov [#allocation11]   ;;  %s7203_s22 = smov [#allocation3]  }
  0x1b   :  { %s84_s21 = sshll.u32 %s7202_s20, 4  ;;  %s27_s23 = sshll.u32 %s7203_s22, 4  ;;  %s85_s21 = int_to_ptr.vmem [resolvable:$true] %s84_s21  ;;  %s28_s23 = int_to_ptr.vmem [resolvable:$true] %s27_s23 }
  0x1c   :  { %s7100_s24 = scalar_lea.vmem %s85_s21, 32  ;;  %p7105_p11 = scmp.lt.s32.totalorder %s85_s21, %s85_s21 }
  0x1d   :  { %p7101_p10 = scmp.ne.s32.totalorder %s85_s21, %s7100_s24  ;;  %p7106_p12 = scmp.lt.s32.totalorder %s7100_s24, %s7100_s24 }
  0x1f   :  { %p7107_p13 = por %p7106_p12, %p7105_p11 }
  0x21   :  { %p7108_p0 = pnand %p7107_p13, %p7101_p10 }
  0x23   :  { %7111 = shalt.err (!%p7108_p0)
}
  0x24   :  { %87 = dma.hbm_to_vmem [thread:$0]  %s7520_s6, 32, %s85_s21, [#allocation12]  }
  0x25   :  { %s7120_s26 = scalar_lea.vmem %s28_s23, 50176  ;;  %p7125_p2 = scmp.lt.s32.totalorder %s28_s23, %s28_s23 }
  0x26   :  { %p7121_p1 = scmp.ne.s32.totalorder %s28_s23, %s7120_s26  ;;  %p7126_p3 = scmp.lt.s32.totalorder %s7120_s26, %s7120_s26 }
  0x28   :  { %p7127_p4 = por %p7126_p3, %p7125_p2 }
  0x2a   :  { %p7128_p5 = pnand %p7127_p4, %p7121_p1 }
  0x2c   :  { %7131 = shalt.err (!%p7128_p5)
}
  0x2d   :  { %s7204_s4 = smov 512   ;;  %s7205_s27 = smov 32  }
  0x2e   :  { %33 = dma.hbm_to_vmem [thread:$0]  %s7515_s1, 50176, %s28_s23, [#allocation4], %s7204_s4, %s7204_s4, %s7205_s27  }
  0x2f   :  { %s7206_s30 = smov [#allocation7]  }
  0x30   :  { %s49_s10 = sshll.u32 %s7206_s30, 4  ;;  %s50_s10 = int_to_ptr.vmem [resolvable:$true] %s49_s10 }
  0x31   :  { %s7140_s11 = scalar_lea.vmem %s50_s10, 32768  ;;  %p7145_p7 = scmp.lt.s32.totalorder %s50_s10, %s50_s10 }
  0x32   :  { %p7141_p6 = scmp.ne.s32.totalorder %s50_s10, %s7140_s11  ;;  %p7146_p8 = scmp.lt.s32.totalorder %s7140_s11, %s7140_s11 }
  0x34   :  { %p7147_p9 = por %p7146_p8, %p7145_p7 }
  0x36   :  { %p7148_p10 = pnand %p7147_p9, %p7141_p6 }
  0x38   :  { %7151 = shalt.err (!%p7148_p10)
}
  0x39   :  { %s7207_s6 = smov 256   ;;  %s7208_s12 = smov 16  }
  0x3a   :  { %55 = dma.hbm_to_vmem [thread:$0]  %s7517_s3, 32768, %s50_s10, [#allocation6], %s7207_s6, %s7207_s6, %s7208_s12  }
  0x3b   :  { %s7209_s15 = smov [#allocation10]  }
  0x3c   :  { %s71_s16 = sshll.u32 %s7209_s15, 4  ;;  %s72_s16 = int_to_ptr.vmem [resolvable:$true] %s71_s16 }
  0x3d   :  { %s7160_s1 = scalar_lea.vmem %s72_s16, 8192  ;;  %p7165_p12 = scmp.lt.s32.totalorder %s72_s16, %s72_s16 }
  0x3e   :  { %p7161_p11 = scmp.ne.s32.totalorder %s72_s16, %s7160_s1  ;;  %p7166_p13 = scmp.lt.s32.totalorder %s7160_s1, %s7160_s1 }
  0x40   :  { %p7167_p0 = por %p7166_p13, %p7165_p12 }
  0x42   :  { %p7168_p1 = pnand %p7167_p0, %p7161_p11 }
  0x44   :  { %7171 = shalt.err (!%p7168_p1)
}
  0x45   :  { %s7210_s8 = smov 128   ;;  %s7211_s17 = smov 8  }
  0x46   :  { %77 = dma.hbm_to_vmem [thread:$0]  %s7519_s5, 8192, %s72_s16, [#allocation9], %s7210_s8, %s7210_s8, %s7211_s17  }
  0x47   :  { %s7212_s20 = smov [#allocation13]  }
  0x48   :  { %s93_s21 = sshll.u32 %s7212_s20, 4  ;;  %s94_s21 = int_to_ptr.vmem [resolvable:$true] %s93_s21 }
  0x49   :  { %s7180_s3 = scalar_lea.vmem %s94_s21, 2048  ;;  %p7185_p3 = scmp.lt.s32.totalorder %s94_s21, %s94_s21 }
  0x4a   :  { %p7181_p2 = scmp.ne.s32.totalorder %s94_s21, %s7180_s3  ;;  %p7186_p4 = scmp.lt.s32.totalorder %s7180_s3, %s7180_s3 }
  0x4c   :  { %p7187_p5 = por %p7186_p4, %p7185_p3 }
  0x4e   :  { %p7188_p6 = pnand %p7187_p5, %p7181_p2 }
  0x50   :  { %7191 = shalt.err (!%p7188_p6)
}
  0x51   :  { %s7213_s22 = smov 64   ;;  %s7214_s23 = smov 4  }
  0x52   :  { %99 = dma.hbm_to_vmem [thread:$0]  %s7521_s7, 2048, %s94_s21, [#allocation12], %s7213_s22, %s7213_s22, %s7214_s23  }
  0x53   :  { %7192 = dma.done.wait [#allocation4], 50176  }
  0x54   :  { %7193 = vsyncadd [#allocation4], 4294917120 }
  0x55   :  { %7194 = dma.done.wait [#allocation6], 32896  }
  0x56   :  { %7195 = vsyncadd [#allocation6], 4294934400 }
  0x57   :  { %7196 = dma.done.wait [#allocation9], 8256  }
  0x58   :  { %7197 = vsyncadd [#allocation9], 4294959040 }
  0x59   :  { %7198 = dma.done.wait [#allocation12], 2080  }
  0x5a   :  { %7199 = vsyncadd [#allocation12], 4294965216  ;;  %v194_v1 = vld [vmem:[#allocation3 + $0x1c0] sm:$0xff]  ;;  %v127_v55 = vld [vmem:[%s7514_s0 + $0x18] sm:$0xff]  ;;  %vm2532_vm0 = vcmask 130048   ;;  %vm5774_vm1 = vcmask 7168  }
  0x5b   :  { %v198_v2 = vld [vmem:[#allocation3 + $0x1e0] sm:$0xff]  ;;  %v7298_v60 = vpack.c.bf16 %v127_v55, %v127_v55 }
  0x5c   :  { %v322_v3 = vld [vmem:[#allocation3 + $0x5c0] sm:$0xff]  ;;  %v5841_v4 = vcombine.high %v194_v1, %v198_v2  ;;  %v5840_v6 = vcombine.low %v194_v1, %v198_v2 }
  0x5d   :  { %v326_v5 = vld [vmem:[#allocation3 + $0x5e0] sm:$0xff]  ;;  %2609 = vmatprep.mubr.bf16.mxu1 %v7298_v60 }
  0x5e   :  { %v186_v7 = vld [vmem:[#allocation3 + $0x180] sm:$0xff]  ;;  %v5969_v9 = vcombine.high %v322_v3, %v326_v5  ;;  %v5968_v10 = vcombine.low %v322_v3, %v326_v5  ;;  %2536 = vmatprep.subr.bf16.mxu0 %v5841_v4 }
  0x5f   :  { %v190_v8 = vld [vmem:[#allocation3 + $0x1a0] sm:$0xff]  ;;  %2537 = vmatpush1.bf16.msra.mxu0 %v5840_v6 }
  0x60   :  { %v5833_v11 = vcombine.high %v186_v7, %v190_v8  ;;  %v314_v12 = vld [vmem:[#allocation3 + $0x580] sm:$0xff]  ;;  %2577 = vmatprep.subr.bf16.mxu1 %v5969_v9  ;;  %v5832_v19 = vcombine.low %v186_v7, %v190_v8 }
  0x61   :  { %v318_v13 = vld [vmem:[#allocation3 + $0x5a0] sm:$0xff]  ;;  %2578 = vmatpush1.bf16.msra.mxu1 %v5968_v10 }
  0x62   :  { %v178_v14 = vld [vmem:[#allocation3 + $0x140] sm:$0xff]  ;;  %v5961_v15 = vcombine.high %v314_v12, %v318_v13  ;;  %2538 = vmatprep.subr.bf16.mxu0 %v5833_v11  ;;  %v5960_v20 = vcombine.low %v314_v12, %v318_v13 }
  0x63   :  { %v182_v16 = vld [vmem:[#allocation3 + $0x160] sm:$0xff]  ;;  %2539 = vmatpush1.bf16.msra.mxu0 %v5832_v19 }
  0x64   :  { %v306_v17 = vld [vmem:[#allocation3 + $0x540] sm:$0xff]  ;;  %v5825_v21 = vcombine.high %v178_v14, %v182_v16  ;;  %2579 = vmatprep.subr.bf16.mxu1 %v5961_v15  ;;  %v5824_v27 = vcombine.low %v178_v14, %v182_v16 }
  0x65   :  { %v310_v18 = vld [vmem:[#allocation3 + $0x560] sm:$0xff]  ;;  %2580 = vmatpush1.bf16.msra.mxu1 %v5960_v20 }
  0x66   :  { %v5953_v22 = vcombine.high %v306_v17, %v310_v18  ;;  %v170_v23 = vld [vmem:[#allocation3 + $0x100] sm:$0xff]  ;;  %2540 = vmatprep.subr.bf16.mxu0 %v5825_v21  ;;  %v5952_v28 = vcombine.low %v306_v17, %v310_v18 }
  0x67   :  { %v174_v24 = vld [vmem:[#allocation3 + $0x120] sm:$0xff]  ;;  %2541 = vmatpush1.bf16.msra.mxu0 %v5824_v27 }
  0x68   :  { %v298_v25 = vld [vmem:[#allocation3 + $0x500] sm:$0xff]  ;;  %v5817_v29 = vcombine.high %v170_v23, %v174_v24  ;;  %2581 = vmatprep.subr.bf16.mxu1 %v5953_v22  ;;  %v5816_v35 = vcombine.low %v170_v23, %v174_v24 }
  0x69   :  { %v302_v26 = vld [vmem:[#allocation3 + $0x520] sm:$0xff]  ;;  %2582 = vmatpush1.bf16.msra.mxu1 %v5952_v28 }
  0x6a   :  { %v5945_v30 = vcombine.high %v298_v25, %v302_v26  ;;  %v162_v31 = vld [vmem:[#allocation3 + $0xc0] sm:$0xff]  ;;  %2542 = vmatprep.subr.bf16.mxu0 %v5817_v29  ;;  %v5944_v36 = vcombine.low %v298_v25, %v302_v26 }
  0x6b   :  { %v166_v32 = vld [vmem:[#allocation3 + $0xe0] sm:$0xff]  ;;  %2543 = vmatpush1.bf16.msra.mxu0 %v5816_v35 }
  0x6c   :  { %v290_v33 = vld [vmem:[#allocation3 + $0x4c0] sm:$0xff]  ;;  %v5809_v37 = vcombine.high %v162_v31, %v166_v32  ;;  %2583 = vmatprep.subr.bf16.mxu1 %v5945_v30  ;;  %v5808_v43 = vcombine.low %v162_v31, %v166_v32 }
  0x6d   :  { %v294_v34 = vld [vmem:[#allocation3 + $0x4e0] sm:$0xff]  ;;  %2584 = vmatpush1.bf16.msra.mxu1 %v5944_v36 }
  0x6e   :  { %v5937_v38 = vcombine.high %v290_v33, %v294_v34  ;;  %v154_v39 = vld [vmem:[#allocation3 + $0x80] sm:$0xff]  ;;  %2544 = vmatprep.subr.bf16.mxu0 %v5809_v37  ;;  %v5936_v44 = vcombine.low %v290_v33, %v294_v34 }
  0x6f   :  { %v158_v40 = vld [vmem:[#allocation3 + $0xa0] sm:$0xff]  ;;  %2545 = vmatpush1.bf16.msra.mxu0 %v5808_v43 }
  0x70   :  { %v282_v41 = vld [vmem:[#allocation3 + $0x480] sm:$0xff]  ;;  %v5801_v45 = vcombine.high %v154_v39, %v158_v40  ;;  %2585 = vmatprep.subr.bf16.mxu1 %v5937_v38  ;;  %v5800_v51 = vcombine.low %v154_v39, %v158_v40 }
  0x71   :  { %v286_v42 = vld [vmem:[#allocation3 + $0x4a0] sm:$0xff]  ;;  %2586 = vmatpush1.bf16.msra.mxu1 %v5936_v44 }
  0x72   :  { %v5929_v46 = vcombine.high %v282_v41, %v286_v42  ;;  %v146_v47 = vld [vmem:[#allocation3 + $0x40] sm:$0xff]  ;;  %2546 = vmatprep.subr.bf16.mxu0 %v5801_v45  ;;  %v5928_v52 = vcombine.low %v282_v41, %v286_v42 }
  0x73   :  { %v150_v48 = vld [vmem:[#allocation3 + $0x60] sm:$0xff]  ;;  %2547 = vmatpush1.bf16.msra.mxu0 %v5800_v51 }
  0x74   :  { %v274_v49 = vld [vmem:[#allocation3 + $0x440] sm:$0xff]  ;;  %v5793_v53 = vcombine.high %v146_v47, %v150_v48  ;;  %2587 = vmatprep.subr.bf16.mxu1 %v5929_v46  ;;  %v5792_v63 = vcombine.low %v146_v47, %v150_v48 }
  0x75   :  { %v278_v50 = vld [vmem:[#allocation3 + $0x460] sm:$0xff]  ;;  %2588 = vmatpush1.bf16.msra.mxu1 %v5928_v52 }
  0x76   :  { %v125_v54 = vld [vmem:[%s7514_s0 + $0x8] sm:$0xff]  ;;  %v5921_v56 = vcombine.high %v274_v49, %v278_v50  ;;  %2548 = vmatprep.subr.bf16.mxu0 %v5793_v53  ;;  %v5920_v0 = vcombine.low %v274_v49, %v278_v50 }
  0x77   :  { %v138_v57 = vld [vmem:[#allocation3] sm:$0xff]  ;;  %v7296_v59 = vpack.c.bf16 %v125_v54, %v125_v54  ;;  %2549 = vmatpush1.bf16.msra.mxu0 %v5792_v63 }
  0x78   :  { %v142_v58 = vld [vmem:[#allocation3 + $0x20] sm:$0xff]  ;;  %2589 = vmatprep.subr.bf16.mxu1 %v5921_v56 }
  0x79   :  { %v266_v61 = vld [vmem:[#allocation3 + $0x400] sm:$0xff]  ;;  %2568 = vmatprep.mubr.bf16.mxu0 %v7296_v59  ;;  %v5785_v1 = vcombine.high %v138_v57, %v142_v58  ;;  %v5784_v7 = vcombine.low %v138_v57, %v142_v58  ;;  %2590 = vmatpush1.bf16.msra.mxu1 %v5920_v0 }
  0x7a   :  { %v270_v62 = vld [vmem:[#allocation3 + $0x420] sm:$0xff] }
  0x7b   :  { %v5913_v2 = vcombine.high %v266_v61, %v270_v62  ;;  %v258_v3 = vld [vmem:[#allocation3 + $0x3c0] sm:$0xff]  ;;  %2550 = vmatprep.subr.bf16.mxu0 %v5785_v1  ;;  %v5912_v8 = vcombine.low %v266_v61, %v270_v62 }
  0x7c   :  { %v262_v4 = vld [vmem:[#allocation3 + $0x3e0] sm:$0xff]  ;;  %2551 = vmatpush1.bf16.msra.mxu0 %v5784_v7 }
  0x7d   :  { %v386_v5 = vld [vmem:[#allocation3 + $0x7c0] sm:$0xff]  ;;  %v5905_v9 = vcombine.high %v258_v3, %v262_v4  ;;  %2591 = vmatprep.subr.bf16.mxu1 %v5913_v2  ;;  %v5904_v15 = vcombine.low %v258_v3, %v262_v4 }
  0x7e   :  { %v390_v6 = vld [vmem:[#allocation3 + $0x7e0] sm:$0xff]  ;;  %2592 = vmatpush1.bf16.msra.mxu1 %v5912_v8 }
  0x7f   :  { %v6033_v10 = vcombine.high %v386_v5, %v390_v6  ;;  %v250_v11 = vld [vmem:[#allocation3 + $0x380] sm:$0xff]  ;;  %2552 = vmatprep.subr.bf16.mxu0 %v5905_v9  ;;  %v6032_v16 = vcombine.low %v386_v5, %v390_v6 }
  0x80   :  { %v254_v12 = vld [vmem:[#allocation3 + $0x3a0] sm:$0xff]  ;;  %2553 = vmatpush2.bf16.msra.mxu0 %v5904_v15 }
  0x81   :  { %v378_v13 = vld [vmem:[#allocation3 + $0x780] sm:$0xff]  ;;  %v5897_v17 = vcombine.high %v250_v11, %v254_v12  ;;  %2593 = vmatprep.subr.bf16.mxu1 %v6033_v10  ;;  %v5896_v23 = vcombine.low %v250_v11, %v254_v12  ;;  %v126_v12 = vld [vmem:[%s7514_s0 + $0x10] sm:$0xff] }
  0x82   :  { %v382_v14 = vld [vmem:[#allocation3 + $0x7a0] sm:$0xff]  ;;  %2594 = vmatpush2.bf16.msra.mxu1 %v6032_v16 }
  0x83   :  { %v6025_v18 = vcombine.high %v378_v13, %v382_v14  ;;  %v242_v19 = vld [vmem:[#allocation3 + $0x340] sm:$0xff]  ;;  %2554 = vmatprep.subr.bf16.mxu0 %v5897_v17  ;;  %v6024_v24 = vcombine.low %v378_v13, %v382_v14 }
  0x84   :  { %v246_v20 = vld [vmem:[#allocation3 + $0x360] sm:$0xff]  ;;  %2555 = vmatpush2.bf16.msra.mxu0 %v5896_v23 }
  0x85   :  { %v370_v21 = vld [vmem:[#allocation3 + $0x740] sm:$0xff]  ;;  %v5889_v25 = vcombine.high %v242_v19, %v246_v20  ;;  %2595 = vmatprep.subr.bf16.mxu1 %v6025_v18  ;;  %v5888_v31 = vcombine.low %v242_v19, %v246_v20  ;;  %v195_v18 = vld [vmem:[#allocation3 + $0x1c8] sm:$0xff]  ;;  %v7310_v20 = vpack.c.bf16 %v126_v12, %v126_v12 }
  0x86   :  { %v374_v22 = vld [vmem:[#allocation3 + $0x760] sm:$0xff]  ;;  %2596 = vmatpush2.bf16.msra.mxu1 %v6024_v24  ;;  %v199_v19 = vld [vmem:[#allocation3 + $0x1e8] sm:$0xff] }
  0x87   :  { %v6017_v26 = vcombine.high %v370_v21, %v374_v22  ;;  %v234_v27 = vld [vmem:[#allocation3 + $0x300] sm:$0xff]  ;;  %2556 = vmatprep.subr.bf16.mxu0 %v5889_v25  ;;  %v6016_v32 = vcombine.low %v370_v21, %v374_v22  ;;  %v5843_v25 = vcombine.high %v195_v18, %v199_v19 }
  0x88   :  { %v238_v28 = vld [vmem:[#allocation3 + $0x320] sm:$0xff]  ;;  %2557 = vmatpush2.bf16.msra.mxu0 %v5888_v31 }
  0x89   :  { %v362_v29 = vld [vmem:[#allocation3 + $0x700] sm:$0xff]  ;;  %v5881_v33 = vcombine.high %v234_v27, %v238_v28  ;;  %2597 = vmatprep.subr.bf16.mxu1 %v6017_v26  ;;  %v5880_v39 = vcombine.low %v234_v27, %v238_v28  ;;  %v130_v28 = vld [vmem:[%s7514_s0 + $0x30] sm:$0xff] }
  0x8a   :  { %v366_v30 = vld [vmem:[#allocation3 + $0x720] sm:$0xff]  ;;  %2598 = vmatpush2.bf16.msra.mxu1 %v6016_v32  ;;  %v187_v32 = vld [vmem:[#allocation3 + $0x188] sm:$0xff] }
  0x8b   :  { %v6009_v34 = vcombine.high %v362_v29, %v366_v30  ;;  %v226_v35 = vld [vmem:[#allocation3 + $0x2c0] sm:$0xff]  ;;  %2558 = vmatprep.subr.bf16.mxu0 %v5881_v33  ;;  %v6008_v40 = vcombine.low %v362_v29, %v366_v30  ;;  %v191_v33 = vld [vmem:[#allocation3 + $0x1a8] sm:$0xff] }
  0x8c   :  { %v230_v36 = vld [vmem:[#allocation3 + $0x2e0] sm:$0xff]  ;;  %2559 = vmatpush2.bf16.msra.mxu0 %v5880_v39  ;;  %v5842_v39 = vcombine.low %v195_v18, %v199_v19 }
  0x8d   :  { %v354_v37 = vld [vmem:[#allocation3 + $0x6c0] sm:$0xff]  ;;  %v5873_v41 = vcombine.high %v226_v35, %v230_v36  ;;  %2599 = vmatprep.subr.bf16.mxu1 %v6009_v34  ;;  %v5872_v47 = vcombine.low %v226_v35, %v230_v36  ;;  %v7215_v34 = vmov 0  }
  0x8e   :  { %v358_v38 = vld [vmem:[#allocation3 + $0x6e0] sm:$0xff]  ;;  %2600 = vmatpush2.bf16.msra.mxu1 %v6008_v40 }
  0x8f   :  { %v6001_v42 = vcombine.high %v354_v37, %v358_v38  ;;  %v218_v43 = vld [vmem:[#allocation3 + $0x280] sm:$0xff]  ;;  %2560 = vmatprep.subr.bf16.mxu0 %v5873_v41  ;;  %v6000_v48 = vcombine.low %v354_v37, %v358_v38  ;;  %v7324_v38 = vpack.c.bf16 %v130_v28, %v130_v28  ;;  %v179_v41 = vld [vmem:[#allocation3 + $0x148] sm:$0xff] }
  0x90   :  { %v222_v44 = vld [vmem:[#allocation3 + $0x2a0] sm:$0xff]  ;;  %2561 = vmatpush2.bf16.msra.mxu0 %v5872_v47  ;;  %v5834_v47 = vcombine.low %v187_v32, %v191_v33 }
  0x91   :  { %v346_v45 = vld [vmem:[#allocation3 + $0x680] sm:$0xff]  ;;  %v5865_v49 = vcombine.high %v218_v43, %v222_v44  ;;  %2601 = vmatprep.subr.bf16.mxu1 %v6001_v42  ;;  %v5864_v55 = vcombine.low %v218_v43, %v222_v44  ;;  %v183_v42 = vld [vmem:[#allocation3 + $0x168] sm:$0xff]  ;;  %v5835_v43 = vcombine.high %v187_v32, %v191_v33 }
  0x92   :  { %v350_v46 = vld [vmem:[#allocation3 + $0x6a0] sm:$0xff]  ;;  %2602 = vmatpush2.bf16.msra.mxu1 %v6000_v48  ;;  %v259_v33 = vld [vmem:[#allocation3 + $0x3c8] sm:$0xff] }
  0x93   :  { %v5993_v50 = vcombine.high %v346_v45, %v350_v46  ;;  %v210_v51 = vld [vmem:[#allocation3 + $0x240] sm:$0xff]  ;;  %2562 = vmatprep.subr.bf16.mxu0 %v5865_v49  ;;  %v5992_v56 = vcombine.low %v346_v45, %v350_v46  ;;  %v171_v49 = vld [vmem:[#allocation3 + $0x108] sm:$0xff] }
  0x94   :  { %v214_v52 = vld [vmem:[#allocation3 + $0x260] sm:$0xff]  ;;  %2563 = vmatpush2.bf16.msra.mxu0 %v5864_v55 }
  0x95   :  { %v338_v53 = vld [vmem:[#allocation3 + $0x640] sm:$0xff]  ;;  %v5857_v57 = vcombine.high %v210_v51, %v214_v52  ;;  %2603 = vmatprep.subr.bf16.mxu1 %v5993_v50  ;;  %v5856_v1 = vcombine.low %v210_v51, %v214_v52  ;;  %v175_v50 = vld [vmem:[#allocation3 + $0x128] sm:$0xff] }
  0x96   :  { %v342_v54 = vld [vmem:[#allocation3 + $0x660] sm:$0xff]  ;;  %2604 = vmatpush2.bf16.msra.mxu1 %v5992_v56 }
  0x97   :  { %v5985_v58 = vcombine.high %v338_v53, %v342_v54  ;;  %v202_v61 = vld [vmem:[#allocation3 + $0x200] sm:$0xff]  ;;  %2564 = vmatprep.subr.bf16.mxu0 %v5857_v57  ;;  %v5984_v2 = vcombine.low %v338_v53, %v342_v54  ;;  %v5827_v53 = vcombine.high %v179_v41, %v183_v42  ;;  %v5826_v57 = vcombine.low %v179_v41, %v183_v42 }
  0x98   :  { %v206_v62 = vld [vmem:[#allocation3 + $0x220] sm:$0xff]  ;;  %2565 = vmatpush2.bf16.msra.mxu0 %v5856_v1  ;;  %v5818_v1 = vcombine.low %v171_v49, %v175_v50 }
  0x99   :  { %v330_v63 = vld [vmem:[#allocation3 + $0x600] sm:$0xff]  ;;  %v5849_v3 = vcombine.high %v202_v61, %v206_v62  ;;  %2605 = vmatprep.subr.bf16.mxu1 %v5985_v58  ;;  %v5848_v9 = vcombine.low %v202_v61, %v206_v62  ;;  %v5819_v61 = vcombine.high %v171_v49, %v175_v50  ;;  %v163_v62 = vld [vmem:[#allocation3 + $0xc8] sm:$0xff] }
  0x9a   :  { %v334_v0 = vld [vmem:[#allocation3 + $0x620] sm:$0xff]  ;;  %2606 = vmatpush2.bf16.msra.mxu1 %v5984_v2 }
  0x9b   :  { %v5977_v4 = vcombine.high %v330_v63, %v334_v0  ;;  %v450_v5 = vld [vmem:[#allocation3 + $0x9c0] sm:$0xff]  ;;  %2566 = vmatprep.subr.bf16.mxu0 %v5849_v3  ;;  %v5976_v11 = vcombine.low %v330_v63, %v334_v0  ;;  %v167_v63 = vld [vmem:[#allocation3 + $0xe8] sm:$0xff] }
  0x9c   :  { %v454_v6 = vld [vmem:[#allocation3 + $0x9e0] sm:$0xff]  ;;  %2567 = vmatpush2.bf16.msra.mxu0 %v5848_v9  ;;  %v5810_v9 = vcombine.low %v163_v62, %v167_v63 }
  0x9d   :  { %v522_v7 = vld [vmem:[#allocation3 + $0xc00] sm:$0xff]  ;;  %v6097_v13 = vcombine.high %v450_v5, %v454_v6  ;;  %2607 = vmatprep.subr.bf16.mxu1 %v5977_v4  ;;  %v6096_v21 = vcombine.low %v450_v5, %v454_v6  ;;  %v5811_v5 = vcombine.high %v163_v62, %v167_v63  ;;  %v155_v6 = vld [vmem:[#allocation3 + $0x88] sm:$0xff] }
  0x9e   :  { %v526_v8 = vld [vmem:[#allocation3 + $0xc20] sm:$0xff]  ;;  %2608 = vmatpush2.bf16.msra.mxu1 %v5976_v11  ;;  %v239_v62 = vld [vmem:[#allocation3 + $0x328] sm:$0xff] }
  0x9f   :  { %v124_v10 = vld [vmem:[%s7514_s0] sm:$0xff]  ;;  %v6169_v14 = vcombine.high %v522_v7, %v526_v8  ;;  %v129_v22 = vld [vmem:[%s7514_s0 + $0x28] sm:$0xff]  ;;  %2618 = vmatprep.subr.bf16.mxu0 %v6097_v13  ;;  %v6168_v23 = vcombine.low %v522_v7, %v526_v8 }
  0xa0   :  { %v442_v15 = vld [vmem:[#allocation3 + $0x980] sm:$0xff]  ;;  %v7308_v17 = vpack.c.bf16 %v124_v10, %v124_v10  ;;  %v7319_v29 = vpack.c.bf16 %v129_v22, %v129_v22  ;;  %v159_v7 = vld [vmem:[#allocation3 + $0xa8] sm:$0xff] }
  0xa1   :  { %v446_v16 = vld [vmem:[#allocation3 + $0x9a0] sm:$0xff]  ;;  %2673 = vmatprep.subr.bf16.mxu1 %v6169_v14  ;;  %2610 = vmatmul.mubr.bf16.vlgmr.msra.gmra.mxu1 %v7310_v20  ;;  %v5803_v13 = vcombine.high %v155_v6, %v159_v7  ;;  %v147_v14 = vld [vmem:[#allocation3 + $0x48] sm:$0xff]  ;;  %v5802_v18 = vcombine.low %v155_v6, %v159_v7 }
  0xa2   :  { %v6089_v24 = vcombine.high %v442_v15, %v446_v16  ;;  %v434_v26 = vld [vmem:[#allocation3 + $0x940] sm:$0xff]  ;;  %2569 = vmatmul.mubr.bf16.vlgmr.msra.gmra.mxu0 %v7308_v17  ;;  %v6088_v30 = vcombine.low %v442_v15, %v446_v16  ;;  %2674 = vmatpush1.bf16.msra.mxu1 %v6168_v23  ;;  %v151_v15 = vld [vmem:[#allocation3 + $0x68] sm:$0xff] }
  0xa3   :  { %v438_v27 = vld [vmem:[#allocation3 + $0x960] sm:$0xff]  ;;  %2619 = vmatpush1.bf16.msra.mxu0 %v6096_v21  ;;  %2691 = vmatprep.mubr.bf16.mxu1 %v7215_v34  ;;  %v5795_v23 = vcombine.high %v147_v14, %v151_v15  ;;  %v231_v6 = vld [vmem:[#allocation3 + $0x2e8] sm:$0xff] }
  0xa4   :  { %2620 = vmatprep.subr.bf16.mxu0 %v6089_v24  ;;  %v6081_v31 = vcombine.high %v434_v26, %v438_v27  ;;  %2700 = vmatprep.subr.bf16.mxu1 %v5843_v25  ;;  %v426_v35 = vld [vmem:[#allocation3 + $0x900] sm:$0xff]  ;;  %v6080_v37 = vcombine.low %v434_v26, %v438_v27  ;;  %v139_v24 = vld [vmem:[#allocation3 + $0x8] sm:$0xff]  ;;  %v5794_v27 = vcombine.low %v147_v14, %v151_v15 }
  0xa5   :  { %v430_v36 = vld [vmem:[#allocation3 + $0x920] sm:$0xff]  ;;  %2650 = vmatprep.mubr.bf16.mxu0 %v7319_v29  ;;  %v143_v25 = vld [vmem:[#allocation3 + $0x28] sm:$0xff] }
  0xa6   :  { %v6073_v40 = vcombine.high %v426_v35, %v430_v36  ;;  %v418_v44 = vld [vmem:[#allocation3 + $0x8c0] sm:$0xff]  ;;  %v6072_v46 = vcombine.low %v426_v35, %v430_v36  ;;  %v5787_v32 = vcombine.high %v139_v24, %v143_v25  ;;  %v263_v35 = vld [vmem:[#allocation3 + $0x3e8] sm:$0xff] }
  0xa7   :  { %2621 = vmatpush1.bf16.msra.mxu0 %v6088_v30  ;;  %v422_v45 = vld [vmem:[#allocation3 + $0x8e0] sm:$0xff]  ;;  %v5907_v42 = vcombine.high %v259_v33, %v263_v35  ;;  %v223_v14 = vld [vmem:[#allocation3 + $0x2a8] sm:$0xff] }
  0xa8   :  { %2622 = vmatprep.subr.bf16.mxu0 %v6081_v31  ;;  %v6065_v48 = vcombine.high %v418_v44, %v422_v45  ;;  %v410_v51 = vld [vmem:[#allocation3 + $0x880] sm:$0xff]  ;;  %v6064_v54 = vcombine.low %v418_v44, %v422_v45  ;;  %v255_v44 = vld [vmem:[#allocation3 + $0x3a8] sm:$0xff] }
  0xa9   :  { %6176 = vmatmul.mubr.msk.bf16.vlgmr.msra.gmra.mxu1 %vm2532_vm0, %v7324_v38  ;;  %v414_v52 = vld [vmem:[#allocation3 + $0x8a0] sm:$0xff] }
  0xaa   :  { %2701 = vmatpush1.bf16.msra.mxu1 %v5842_v39  ;;  %2732 = vmatprep.mubr.bf16.mxu1 %v7296_v59  ;;  %v402_v55 = vld [vmem:[#allocation3 + $0x840] sm:$0xff]  ;;  %v6057_v58 = vcombine.high %v410_v51, %v414_v52  ;;  %v6056_v0 = vcombine.low %v410_v51, %v414_v52  ;;  %v243_v51 = vld [vmem:[#allocation3 + $0x348] sm:$0xff] }
  0xab   :  { %2623 = vmatpush1.bf16.msra.mxu0 %v6080_v37  ;;  %2702 = vmatprep.subr.bf16.mxu1 %v5835_v43  ;;  %v406_v56 = vld [vmem:[#allocation3 + $0x860] sm:$0xff]  ;;  %v5786_v37 = vcombine.low %v139_v24, %v143_v25  ;;  %v251_v43 = vld [vmem:[#allocation3 + $0x388] sm:$0xff] }
  0xac   :  { %2624 = vmatprep.subr.bf16.mxu0 %v6073_v40  ;;  %v6049_v2 = vcombine.high %v402_v55, %v406_v56  ;;  %v394_v3 = vld [vmem:[#allocation3 + $0x800] sm:$0xff]  ;;  %v6048_v8 = vcombine.low %v402_v55, %v406_v56  ;;  %v5899_v50 = vcombine.high %v251_v43, %v255_v44  ;;  %v247_v52 = vld [vmem:[#allocation3 + $0x368] sm:$0xff] }
  0xad   :  { %v398_v4 = vld [vmem:[#allocation3 + $0x820] sm:$0xff]  ;;  %v215_v24 = vld [vmem:[#allocation3 + $0x268] sm:$0xff] }
  0xae   :  { %2703 = vmatpush1.bf16.msra.mxu1 %v5834_v47  ;;  %v6041_v10 = vcombine.high %v394_v3, %v398_v4  ;;  %v514_v11 = vld [vmem:[#allocation3 + $0xbc0] sm:$0xff]  ;;  %v6040_v16 = vcombine.low %v394_v3, %v398_v4 }
  0xaf   :  { %2625 = vmatpush1.bf16.msra.mxu0 %v6072_v46  ;;  %2704 = vmatprep.subr.bf16.mxu1 %v5827_v53  ;;  %v518_v12 = vld [vmem:[#allocation3 + $0xbe0] sm:$0xff]  ;;  %v5906_v46 = vcombine.low %v259_v33, %v263_v35  ;;  %v203_v35 = vld [vmem:[#allocation3 + $0x208] sm:$0xff] }
  0xb0   :  { %2626 = vmatprep.subr.bf16.mxu0 %v6065_v48  ;;  %v6161_v19 = vcombine.high %v514_v11, %v518_v12  ;;  %v506_v21 = vld [vmem:[#allocation3 + $0xb80] sm:$0xff]  ;;  %v6160_v26 = vcombine.low %v514_v11, %v518_v12 }
  0xb1   :  { %v510_v22 = vld [vmem:[#allocation3 + $0xba0] sm:$0xff] }
  0xb2   :  { %2705 = vmatpush1.bf16.msra.mxu1 %v5826_v57  ;;  %v6153_v28 = vcombine.high %v506_v21, %v510_v22  ;;  %v498_v30 = vld [vmem:[#allocation3 + $0xb40] sm:$0xff]  ;;  %v6152_v36 = vcombine.low %v506_v21, %v510_v22  ;;  %v323_v21 = vld [vmem:[#allocation3 + $0x5c8] sm:$0xff] }
  0xb3   :  { %2627 = vmatpush1.bf16.msra.mxu0 %v6064_v54  ;;  %2706 = vmatprep.subr.bf16.mxu1 %v5819_v61  ;;  %v502_v31 = vld [vmem:[#allocation3 + $0xb60] sm:$0xff]  ;;  %v5898_v54 = vcombine.low %v251_v43, %v255_v44  ;;  %v235_v61 = vld [vmem:[#allocation3 + $0x308] sm:$0xff] }
  0xb4   :  { %2628 = vmatprep.subr.bf16.mxu0 %v6057_v58  ;;  %v6145_v39 = vcombine.high %v498_v30, %v502_v31  ;;  %v490_v40 = vld [vmem:[#allocation3 + $0xb00] sm:$0xff]  ;;  %v6144_v45 = vcombine.low %v498_v30, %v502_v31  ;;  %v5891_v58 = vcombine.high %v243_v51, %v247_v52  ;;  %v5883_v4 = vcombine.high %v235_v61, %v239_v62  ;;  %v327_v22 = vld [vmem:[#allocation3 + $0x5e8] sm:$0xff] }
  0xb5   :  { %v494_v41 = vld [vmem:[#allocation3 + $0xb20] sm:$0xff]  ;;  %v315_v30 = vld [vmem:[#allocation3 + $0x588] sm:$0xff] }
  0xb6   :  { %2707 = vmatpush1.bf16.msra.mxu1 %v5818_v1  ;;  %v6137_v47 = vcombine.high %v490_v40, %v494_v41  ;;  %v482_v48 = vld [vmem:[#allocation3 + $0xac0] sm:$0xff]  ;;  %v6136_v53 = vcombine.low %v490_v40, %v494_v41  ;;  %v319_v31 = vld [vmem:[#allocation3 + $0x5a8] sm:$0xff] }
  0xb7   :  { %2629 = vmatpush1.bf16.msra.mxu0 %v6056_v0  ;;  %2708 = vmatprep.subr.bf16.mxu1 %v5811_v5  ;;  %v486_v49 = vld [vmem:[#allocation3 + $0xae0] sm:$0xff]  ;;  %v5890_v0 = vcombine.low %v243_v51, %v247_v52  ;;  %v227_v5 = vld [vmem:[#allocation3 + $0x2c8] sm:$0xff]  ;;  %v5963_v40 = vcombine.high %v315_v30, %v319_v31 }
  0xb8   :  { %2630 = vmatprep.subr.bf16.mxu0 %v6049_v2  ;;  %v6129_v55 = vcombine.high %v482_v48, %v486_v49  ;;  %v474_v56 = vld [vmem:[#allocation3 + $0xa80] sm:$0xff]  ;;  %v6128_v63 = vcombine.low %v482_v48, %v486_v49  ;;  %v5875_v12 = vcombine.high %v227_v5, %v231_v6  ;;  %v307_v41 = vld [vmem:[#allocation3 + $0x548] sm:$0xff] }
  0xb9   :  { %v478_v57 = vld [vmem:[#allocation3 + $0xaa0] sm:$0xff]  ;;  %v451_v44 = vld [vmem:[#allocation3 + $0x9c8] sm:$0xff] }
  0xba   :  { %2709 = vmatpush1.bf16.msra.mxu1 %v5810_v9  ;;  %v6121_v1 = vcombine.high %v474_v56, %v478_v57  ;;  %v466_v2 = vld [vmem:[#allocation3 + $0xa40] sm:$0xff]  ;;  %v6120_v7 = vcombine.low %v474_v56, %v478_v57  ;;  %v299_v49 = vld [vmem:[#allocation3 + $0x508] sm:$0xff] }
  0xbb   :  { %2631 = vmatpush1.bf16.msra.mxu0 %v6048_v8  ;;  %2710 = vmatprep.subr.bf16.mxu1 %v5803_v13  ;;  %v470_v3 = vld [vmem:[#allocation3 + $0xa60] sm:$0xff]  ;;  %v5882_v8 = vcombine.low %v235_v61, %v239_v62  ;;  %v219_v13 = vld [vmem:[#allocation3 + $0x288] sm:$0xff] }
  0xbc   :  { %2632 = vmatprep.subr.bf16.mxu0 %v6041_v10  ;;  %v6113_v9 = vcombine.high %v466_v2, %v470_v3  ;;  %v458_v10 = vld [vmem:[#allocation3 + $0xa00] sm:$0xff]  ;;  %v6112_v15 = vcombine.low %v466_v2, %v470_v3  ;;  %v443_v52 = vld [vmem:[#allocation3 + $0x988] sm:$0xff] }
  0xbd   :  { %v462_v11 = vld [vmem:[#allocation3 + $0xa20] sm:$0xff]  ;;  %v291_v57 = vld [vmem:[#allocation3 + $0x4c8] sm:$0xff] }
  0xbe   :  { %2711 = vmatpush1.bf16.msra.mxu1 %v5802_v18  ;;  %v6105_v18 = vcombine.high %v458_v10, %v462_v11  ;;  %v128_v25 = vld [vmem:[%s7514_s0 + $0x20] sm:$0xff]  ;;  %v435_v62 = vld [vmem:[#allocation3 + $0x948] sm:$0xff] }
  0xbf   :  { %2633 = vmatpush1.bf16.msra.mxu0 %v6040_v16  ;;  %2712 = vmatprep.subr.bf16.mxu1 %v5795_v23  ;;  %v5874_v16 = vcombine.low %v227_v5, %v231_v6  ;;  %v5867_v23 = vcombine.high %v219_v13, %v223_v14  ;;  %v7332_v33 = vpack.c.bf16 %v128_v25, %v128_v25  ;;  %v283_v3 = vld [vmem:[#allocation3 + $0x488] sm:$0xff] }
  0xc0   :  { %2634 = vmatprep.subr.bf16.mxu0 %v6161_v19  ;;  %v211_v19 = vld [vmem:[#allocation3 + $0x248] sm:$0xff] }
  0xc1   :  { %v427_v6 = vld [vmem:[#allocation3 + $0x908] sm:$0xff] }
  0xc2   :  { %2713 = vmatpush1.bf16.msra.mxu1 %v5794_v27  ;;  %v5866_v27 = vcombine.low %v219_v13, %v223_v14  ;;  %v419_v14 = vld [vmem:[#allocation3 + $0x8c8] sm:$0xff] }
  0xc3   :  { %2635 = vmatpush2.bf16.msra.mxu0 %v6160_v26  ;;  %2714 = vmatprep.subr.bf16.mxu1 %v5787_v32  ;;  %v6104_v26 = vcombine.low %v458_v10, %v462_v11  ;;  %v5859_v32 = vcombine.high %v211_v19, %v215_v24  ;;  %v279_v10 = vld [vmem:[#allocation3 + $0x468] sm:$0xff] }
  0xc4   :  { %2636 = vmatprep.subr.bf16.mxu0 %v6153_v28  ;;  %v5971_v28 = vcombine.high %v323_v21, %v327_v22 }
  0xc6   :  { %2715 = vmatpush1.bf16.msra.mxu1 %v5786_v37  ;;  %v5970_v37 = vcombine.low %v323_v21, %v327_v22  ;;  %v411_v21 = vld [vmem:[#allocation3 + $0x888] sm:$0xff] }
  0xc7   :  { %2637 = vmatpush2.bf16.msra.mxu0 %v6152_v36  ;;  %2716 = vmatprep.subr.bf16.mxu1 %v5907_v42  ;;  %v207_v36 = vld [vmem:[#allocation3 + $0x228] sm:$0xff] }
  0xc8   :  { %2638 = vmatprep.subr.bf16.mxu0 %v6145_v39  ;;  %v5858_v39 = vcombine.low %v211_v19, %v215_v24  ;;  %v311_v42 = vld [vmem:[#allocation3 + $0x568] sm:$0xff]  ;;  %v5851_v43 = vcombine.high %v203_v35, %v207_v36 }
  0xc9   :  { %v5955_v48 = vcombine.high %v307_v41, %v311_v42  ;;  %v415_v22 = vld [vmem:[#allocation3 + $0x8a8] sm:$0xff] }
  0xca   :  { %2717 = vmatpush2.bf16.msra.mxu1 %v5906_v46  ;;  %v5962_v46 = vcombine.low %v315_v30, %v319_v31  ;;  %v271_v24 = vld [vmem:[#allocation3 + $0x428] sm:$0xff] }
  0xcb   :  { %2639 = vmatpush2.bf16.msra.mxu0 %v6144_v45  ;;  %2718 = vmatprep.subr.bf16.mxu1 %v5899_v50  ;;  %v455_v45 = vld [vmem:[#allocation3 + $0x9e8] sm:$0xff] }
  0xcc   :  { %2640 = vmatprep.subr.bf16.mxu0 %v6137_v47  ;;  %v5850_v47 = vcombine.low %v203_v35, %v207_v36  ;;  %v303_v50 = vld [vmem:[#allocation3 + $0x528] sm:$0xff]  ;;  %v6099_v51 = vcombine.high %v451_v44, %v455_v45  ;;  %v6059_v36 = vcombine.high %v411_v21, %v415_v22 }
  0xcd   :  { %v5947_v56 = vcombine.high %v299_v49, %v303_v50  ;;  %v407_v35 = vld [vmem:[#allocation3 + $0x868] sm:$0xff] }
  0xce   :  { %2719 = vmatpush2.bf16.msra.mxu1 %v5898_v54  ;;  %v5954_v54 = vcombine.low %v307_v41, %v311_v42  ;;  %v395_v41 = vld [vmem:[#allocation3 + $0x808] sm:$0xff] }
  0xcf   :  { %2641 = vmatpush2.bf16.msra.mxu0 %v6136_v53  ;;  %2720 = vmatprep.subr.bf16.mxu1 %v5891_v58  ;;  %v447_v53 = vld [vmem:[#allocation3 + $0x9a8] sm:$0xff] }
  0xd0   :  { %2642 = vmatprep.subr.bf16.mxu0 %v6129_v55  ;;  %v6098_v55 = vcombine.low %v451_v44, %v455_v45  ;;  %v295_v58 = vld [vmem:[#allocation3 + $0x4e8] sm:$0xff]  ;;  %v6091_v61 = vcombine.high %v443_v52, %v447_v53 }
  0xd1   :  { %v5939_v2 = vcombine.high %v291_v57, %v295_v58  ;;  %v399_v42 = vld [vmem:[#allocation3 + $0x828] sm:$0xff] }
  0xd2   :  { %2721 = vmatpush2.bf16.msra.mxu1 %v5890_v0  ;;  %v5946_v0 = vcombine.low %v299_v49, %v303_v50  ;;  %v383_v44 = vld [vmem:[#allocation3 + $0x7a8] sm:$0xff] }
  0xd3   :  { %2643 = vmatpush2.bf16.msra.mxu0 %v6128_v63  ;;  %2722 = vmatprep.subr.bf16.mxu1 %v5883_v4  ;;  %v439_v63 = vld [vmem:[#allocation3 + $0x968] sm:$0xff] }
  0xd4   :  { %2644 = vmatprep.subr.bf16.mxu0 %v6121_v1  ;;  %v6090_v1 = vcombine.low %v443_v52, %v447_v53  ;;  %v287_v4 = vld [vmem:[#allocation3 + $0x4a8] sm:$0xff]  ;;  %v6083_v5 = vcombine.high %v435_v62, %v439_v63  ;;  %v6082_v11 = vcombine.low %v435_v62, %v439_v63  ;;  %v6043_v53 = vcombine.high %v395_v41, %v399_v42 }
  0xd5   :  { %v515_v49 = vld [vmem:[#allocation3 + $0xbc8] sm:$0xff] }
  0xd6   :  { %2723 = vmatpush2.bf16.msra.mxu1 %v5882_v8  ;;  %v5938_v8 = vcombine.low %v291_v57, %v295_v58  ;;  %v519_v50 = vld [vmem:[#allocation3 + $0xbe8] sm:$0xff] }
  0xd7   :  { %2645 = vmatpush2.bf16.msra.mxu0 %v6120_v7  ;;  %2724 = vmatprep.subr.bf16.mxu1 %v5875_v12  ;;  %v431_v7 = vld [vmem:[#allocation3 + $0x928] sm:$0xff]  ;;  %v5931_v12 = vcombine.high %v283_v3, %v287_v4  ;;  %v6163_v63 = vcombine.high %v515_v49, %v519_v50 }
  0xd8   :  { %2646 = vmatprep.subr.bf16.mxu0 %v6113_v9  ;;  %v275_v9 = vld [vmem:[#allocation3 + $0x448] sm:$0xff]  ;;  %v6075_v13 = vcombine.high %v427_v6, %v431_v7 }
  0xd9   :  { %v5923_v19 = vcombine.high %v275_v9, %v279_v10  ;;  %v375_v52 = vld [vmem:[#allocation3 + $0x768] sm:$0xff] }
  0xda   :  { %2725 = vmatpush2.bf16.msra.mxu1 %v5874_v16  ;;  %v5930_v16 = vcombine.low %v283_v3, %v287_v4  ;;  %v507_v57 = vld [vmem:[#allocation3 + $0xb88] sm:$0xff] }
  0xdb   :  { %2647 = vmatpush2.bf16.msra.mxu0 %v6112_v15  ;;  %2726 = vmatprep.subr.bf16.mxu1 %v5867_v23  ;;  %v423_v15 = vld [vmem:[#allocation3 + $0x8e8] sm:$0xff] }
  0xdc   :  { %2648 = vmatprep.subr.bf16.mxu0 %v6105_v18  ;;  %v6074_v18 = vcombine.low %v427_v6, %v431_v7  ;;  %v267_v23 = vld [vmem:[#allocation3 + $0x408] sm:$0xff]  ;;  %v6067_v25 = vcombine.high %v419_v14, %v423_v15  ;;  %v6066_v30 = vcombine.low %v419_v14, %v423_v15 }
  0xdd   :  { %v5915_v31 = vcombine.high %v267_v23, %v271_v24  ;;  %v511_v58 = vld [vmem:[#allocation3 + $0xba8] sm:$0xff] }
  0xde   :  { %2727 = vmatpush2.bf16.msra.mxu1 %v5866_v27  ;;  %v387_v27 = vld [vmem:[#allocation3 + $0x7c8] sm:$0xff]  ;;  %v6155_v7 = vcombine.high %v507_v57, %v511_v58 }
  0xdf   :  { %2649 = vmatpush2.bf16.msra.mxu0 %v6104_v26  ;;  %2728 = vmatprep.subr.bf16.mxu1 %v5859_v32  ;;  %v5922_v26 = vcombine.low %v275_v9, %v279_v10  ;;  %v403_v32 = vld [vmem:[#allocation3 + $0x848] sm:$0xff]  ;;  %v6154_v9 = vcombine.low %v507_v57, %v511_v58 }
  0xe0   :  { %2741 = vmatprep.subr.bf16.mxu0 %v5971_v28  ;;  %v391_v28 = vld [vmem:[#allocation3 + $0x7e8] sm:$0xff]  ;;  %v6051_v45 = vcombine.high %v403_v32, %v407_v35 }
  0xe1   :  { %v367_v62 = vld [vmem:[#allocation3 + $0x728] sm:$0xff] }
  0xe2   :  { %2651 = vmatmul.mubr.bf16.vlgmr.msra.gmra.mxu0 %v7332_v33  ;;  %2729 = vmatpush2.bf16.msra.mxu1 %v5858_v39  ;;  %v6058_v39 = vcombine.low %v411_v21, %v415_v22  ;;  %v499_v3 = vld [vmem:[#allocation3 + $0xb48] sm:$0xff] }
  0xe3   :  { %2742 = vmatpush1.bf16.msra.mxu0 %v5970_v37  ;;  %2773 = vmatprep.mubr.bf16.mxu0 %v7298_v60  ;;  %v5914_v37 = vcombine.low %v267_v23, %v271_v24  ;;  %v503_v4 = vld [vmem:[#allocation3 + $0xb68] sm:$0xff] }
  0xe4   :  { %2743 = vmatprep.subr.bf16.mxu0 %v5963_v40  ;;  %2730 = vmatprep.subr.bf16.mxu1 %v5851_v43  ;;  %v6035_v40 = vcombine.high %v387_v27, %v391_v28  ;;  %v379_v43 = vld [vmem:[#allocation3 + $0x788] sm:$0xff]  ;;  %v6147_v15 = vcombine.high %v499_v3, %v503_v4 }
  0xe5   :  { %v359_v6 = vld [vmem:[#allocation3 + $0x6e8] sm:$0xff] }
  0xe6   :  { %2731 = vmatpush2.bf16.msra.mxu1 %v5850_v47  ;;  %v6050_v47 = vcombine.low %v403_v32, %v407_v35  ;;  %v351_v14 = vld [vmem:[#allocation3 + $0x6a8] sm:$0xff] }
  0xe7   :  { %2744 = vmatpush1.bf16.msra.mxu0 %v5962_v46  ;;  %2782 = vmatprep.subr.bf16.mxu1 %v6099_v51  ;;  %v6034_v46 = vcombine.low %v387_v27, %v391_v28  ;;  %v371_v51 = vld [vmem:[#allocation3 + $0x748] sm:$0xff] }
  0xe8   :  { %2745 = vmatprep.subr.bf16.mxu0 %v5955_v48  ;;  %v6027_v48 = vcombine.high %v379_v43, %v383_v44  ;;  %v483_v21 = vld [vmem:[#allocation3 + $0xac8] sm:$0xff] }
  0xe9   :  { %2733 = vmatmul.mubr.bf16.vlgmr.msra.gmra.mxu1 %v7308_v17  ;;  %v487_v22 = vld [vmem:[#allocation3 + $0xae8] sm:$0xff] }
  0xea   :  { %2783 = vmatpush1.bf16.msra.mxu1 %v6098_v55  ;;  %2814 = vmatprep.mubr.bf16.mxu1 %v7319_v29  ;;  %v6042_v55 = vcombine.low %v395_v41, %v399_v42  ;;  %v339_v23 = vld [vmem:[#allocation3 + $0x648] sm:$0xff] }
  0xeb   :  { %2746 = vmatpush1.bf16.msra.mxu0 %v5954_v54  ;;  %2784 = vmatprep.subr.bf16.mxu1 %v6091_v61  ;;  %v6026_v54 = vcombine.low %v379_v43, %v383_v44  ;;  %v363_v61 = vld [vmem:[#allocation3 + $0x708] sm:$0xff]  ;;  %v196_v43 = vld [vmem:[#allocation3 + $0x1d0] sm:$0xff] }
  0xec   :  { %2747 = vmatprep.subr.bf16.mxu0 %v5947_v56  ;;  %v6019_v56 = vcombine.high %v371_v51, %v375_v52  ;;  %v343_v24 = vld [vmem:[#allocation3 + $0x668] sm:$0xff]  ;;  %v200_v44 = vld [vmem:[#allocation3 + $0x1f0] sm:$0xff] }
  0xed   :  { %v5987_v28 = vcombine.high %v339_v23, %v343_v24  ;;  %v331_v32 = vld [vmem:[#allocation3 + $0x608] sm:$0xff] }
  0xee   :  { %2785 = vmatpush1.bf16.msra.mxu1 %v6090_v1  ;;  %v6162_v1 = vcombine.low %v515_v49, %v519_v50  ;;  %v335_v35 = vld [vmem:[#allocation3 + $0x628] sm:$0xff] }
  0xef   :  { %2748 = vmatpush1.bf16.msra.mxu0 %v5946_v0  ;;  %2786 = vmatprep.subr.bf16.mxu1 %v6083_v5  ;;  %v6018_v0 = vcombine.low %v371_v51, %v375_v52  ;;  %v355_v5 = vld [vmem:[#allocation3 + $0x6c8] sm:$0xff]  ;;  %v188_v51 = vld [vmem:[#allocation3 + $0x190] sm:$0xff] }
  0xf0   :  { %2749 = vmatprep.subr.bf16.mxu0 %v5939_v2  ;;  %v6011_v2 = vcombine.high %v363_v61, %v367_v62  ;;  %v6003_v10 = vcombine.high %v355_v5, %v359_v6  ;;  %v467_v41 = vld [vmem:[#allocation3 + $0xa48] sm:$0xff]  ;;  %v192_v52 = vld [vmem:[#allocation3 + $0x1b0] sm:$0xff] }
  0xf1   :  { %v471_v42 = vld [vmem:[#allocation3 + $0xa68] sm:$0xff]  ;;  %v5837_v58 = vcombine.high %v188_v51, %v192_v52 }
  0xf2   :  { %2787 = vmatpush1.bf16.msra.mxu1 %v6082_v11  ;;  %v491_v11 = vld [vmem:[#allocation3 + $0xb08] sm:$0xff]  ;;  %v6114_v57 = vcombine.low %v467_v41, %v471_v42 }
  0xf3   :  { %2750 = vmatpush1.bf16.msra.mxu0 %v5938_v8  ;;  %2788 = vmatprep.subr.bf16.mxu1 %v6075_v13  ;;  %v6010_v8 = vcombine.low %v363_v61, %v367_v62  ;;  %v347_v13 = vld [vmem:[#allocation3 + $0x688] sm:$0xff] }
  0xf4   :  { %2751 = vmatprep.subr.bf16.mxu0 %v5931_v12  ;;  %v495_v12 = vld [vmem:[#allocation3 + $0xb28] sm:$0xff] }
  0xf5   :  { %v6138_v27 = vcombine.low %v491_v11, %v495_v12  ;;  %v459_v49 = vld [vmem:[#allocation3 + $0xa08] sm:$0xff] }
  0xf6   :  { %2789 = vmatpush1.bf16.msra.mxu1 %v6074_v18  ;;  %v6146_v18 = vcombine.low %v499_v3, %v503_v4  ;;  %v463_v50 = vld [vmem:[#allocation3 + $0xa28] sm:$0xff] }
  0xf7   :  { %2752 = vmatpush1.bf16.msra.mxu0 %v5930_v16  ;;  %2790 = vmatprep.subr.bf16.mxu1 %v6067_v25  ;;  %v6002_v16 = vcombine.low %v355_v5, %v359_v6  ;;  %v6139_v25 = vcombine.high %v491_v11, %v495_v12  ;;  %v523_v61 = vld [vmem:[#allocation3 + $0xc08] sm:$0xff]  ;;  %v6106_v3 = vcombine.low %v459_v49, %v463_v50  ;;  %v324_v5 = vld [vmem:[#allocation3 + $0x5d0] sm:$0xff] }
  0xf8   :  { %2753 = vmatprep.subr.bf16.mxu0 %v5923_v19  ;;  %v5995_v19 = vcombine.high %v347_v13, %v351_v14  ;;  %v527_v62 = vld [vmem:[#allocation3 + $0xc28] sm:$0xff]  ;;  %v328_v6 = vld [vmem:[#allocation3 + $0x5f0] sm:$0xff] }
  0xf9   :  { %v164_v11 = vld [vmem:[#allocation3 + $0xd0] sm:$0xff] }
  0xfa   :  { %2791 = vmatpush1.bf16.msra.mxu1 %v6066_v30  ;;  %v475_v30 = vld [vmem:[#allocation3 + $0xa88] sm:$0xff]  ;;  %v168_v12 = vld [vmem:[#allocation3 + $0xf0] sm:$0xff] }
  0xfb   :  { %2754 = vmatpush1.bf16.msra.mxu0 %v5922_v26  ;;  %2792 = vmatprep.subr.bf16.mxu1 %v6059_v36  ;;  %v5994_v26 = vcombine.low %v347_v13, %v351_v14  ;;  %v6131_v36 = vcombine.high %v483_v21, %v487_v22  ;;  %v5973_v13 = vcombine.high %v324_v5, %v328_v6 }
  0xfc   :  { %2755 = vmatprep.subr.bf16.mxu0 %v5915_v31  ;;  %v479_v31 = vld [vmem:[#allocation3 + $0xaa8] sm:$0xff] }
  0xfe   :  { %2793 = vmatpush1.bf16.msra.mxu1 %v6058_v39  ;;  %v6130_v39 = vcombine.low %v483_v21, %v487_v22  ;;  %v160_v21 = vld [vmem:[#allocation3 + $0xb0] sm:$0xff]  ;;  %v5812_v22 = vcombine.low %v164_v11, %v168_v12 }
  0xff   :  { %2756 = vmatpush1.bf16.msra.mxu0 %v5914_v37  ;;  %2794 = vmatprep.subr.bf16.mxu1 %v6051_v45  ;;  %v5986_v37 = vcombine.low %v339_v23, %v343_v24  ;;  %v6123_v45 = vcombine.high %v475_v30, %v479_v31  ;;  %v5972_v23 = vcombine.low %v324_v5, %v328_v6 }
 0x100   :  { %2757 = vmatprep.subr.bf16.mxu0 %v6035_v40  ;;  %v5979_v40 = vcombine.high %v331_v32, %v335_v35 }
 0x102   :  { %2795 = vmatpush1.bf16.msra.mxu1 %v6050_v47  ;;  %v6122_v47 = vcombine.low %v475_v30, %v479_v31 }
 0x103   :  { %2758 = vmatpush2.bf16.msra.mxu0 %v6034_v46  ;;  %2796 = vmatprep.subr.bf16.mxu1 %v6043_v53  ;;  %v5978_v46 = vcombine.low %v331_v32, %v335_v35  ;;  %v6115_v53 = vcombine.high %v467_v41, %v471_v42 }
 0x104   :  { %2759 = vmatprep.subr.bf16.mxu0 %v6027_v48  ;;  %v5845_v48 = vcombine.high %v196_v43, %v200_v44 }
 0x106   :  { %2797 = vmatpush1.bf16.msra.mxu1 %v6042_v55  ;;  %v180_v55 = vld [vmem:[#allocation3 + $0x150] sm:$0xff] }
 0x107   :  { %2760 = vmatpush2.bf16.msra.mxu0 %v6026_v54  ;;  %2798 = vmatprep.subr.bf16.mxu1 %v6163_v63  ;;  %v5844_v54 = vcombine.low %v196_v43, %v200_v44  ;;  %v6107_v63 = vcombine.high %v459_v49, %v463_v50 }
 0x108   :  { %2761 = vmatprep.subr.bf16.mxu0 %v6019_v56  ;;  %v184_v56 = vld [vmem:[#allocation3 + $0x170] sm:$0xff] }
 0x109   :  { %v5829_v4 = vcombine.high %v180_v55, %v184_v56 }
 0x10a   :  { %2799 = vmatpush2.bf16.msra.mxu1 %v6162_v1  ;;  %v172_v1 = vld [vmem:[#allocation3 + $0x110] sm:$0xff] }
 0x10b   :  { %2762 = vmatpush2.bf16.msra.mxu0 %v6018_v0  ;;  %2800 = vmatprep.subr.bf16.mxu1 %v6155_v7  ;;  %v5836_v0 = vcombine.low %v188_v51, %v192_v52  ;;  %v6171_v7 = vcombine.high %v523_v61, %v527_v62 }
 0x10c   :  { %2763 = vmatprep.subr.bf16.mxu0 %v6011_v2  ;;  %v176_v2 = vld [vmem:[#allocation3 + $0x130] sm:$0xff] }
 0x10d   :  { %v5820_v14 = vcombine.low %v172_v1, %v176_v2 }
 0x10e   :  { %2801 = vmatpush2.bf16.msra.mxu1 %v6154_v9  ;;  %v6170_v9 = vcombine.low %v523_v61, %v527_v62 }
 0x10f   :  { %2764 = vmatpush2.bf16.msra.mxu0 %v6010_v8  ;;  %2802 = vmatprep.subr.bf16.mxu1 %v6147_v15  ;;  %v5828_v8 = vcombine.low %v180_v55, %v184_v56  ;;  %v5813_v15 = vcombine.high %v164_v11, %v168_v12  ;;  %v252_v55 = vld [vmem:[#allocation3 + $0x390] sm:$0xff] }
 0x110   :  { %2765 = vmatprep.subr.bf16.mxu0 %v6003_v10  ;;  %v5821_v10 = vcombine.high %v172_v1, %v176_v2  ;;  %v256_v56 = vld [vmem:[#allocation3 + $0x3b0] sm:$0xff] }
 0x111   :  { %v5901_v62 = vcombine.high %v252_v55, %v256_v56  ;;  %v244_v1 = vld [vmem:[#allocation3 + $0x350] sm:$0xff] }
 0x112   :  { %2803 = vmatpush2.bf16.msra.mxu1 %v6146_v18  ;;  %v320_v18 = vld [vmem:[#allocation3 + $0x5b0] sm:$0xff] }
 0x113   :  { %2766 = vmatpush2.bf16.msra.mxu0 %v6002_v16  ;;  %2804 = vmatprep.subr.bf16.mxu1 %v6139_v25  ;;  %v316_v16 = vld [vmem:[#allocation3 + $0x590] sm:$0xff] }
 0x114   :  { %2767 = vmatprep.subr.bf16.mxu0 %v5995_v19  ;;  %v156_v19 = vld [vmem:[#allocation3 + $0x90] sm:$0xff]  ;;  %v5965_v30 = vcombine.high %v316_v16, %v320_v18  ;;  %v5964_v32 = vcombine.low %v316_v16, %v320_v18 }
 0x115   :  { %v5805_v24 = vcombine.high %v156_v19, %v160_v21  ;;  %v308_v25 = vld [vmem:[#allocation3 + $0x550] sm:$0xff]  ;;  %v5804_v31 = vcombine.low %v156_v19, %v160_v21 }
 0x116   :  { %2805 = vmatpush2.bf16.msra.mxu1 %v6138_v27  ;;  %v148_v27 = vld [vmem:[#allocation3 + $0x50] sm:$0xff] }
 0x117   :  { %2768 = vmatpush2.bf16.msra.mxu0 %v5994_v26  ;;  %2806 = vmatprep.subr.bf16.mxu1 %v6131_v36  ;;  %v312_v26 = vld [vmem:[#allocation3 + $0x570] sm:$0xff] }
 0x118   :  { %2769 = vmatprep.subr.bf16.mxu0 %v5987_v28  ;;  %v152_v28 = vld [vmem:[#allocation3 + $0x70] sm:$0xff]  ;;  %v5957_v41 = vcombine.high %v308_v25, %v312_v26  ;;  %v5956_v43 = vcombine.low %v308_v25, %v312_v26 }
 0x119   :  { %v5797_v35 = vcombine.high %v148_v27, %v152_v28  ;;  %v300_v36 = vld [vmem:[#allocation3 + $0x510] sm:$0xff]  ;;  %v5796_v42 = vcombine.low %v148_v27, %v152_v28 }
 0x11a   :  { %2807 = vmatpush2.bf16.msra.mxu1 %v6130_v39  ;;  %v140_v39 = vld [vmem:[#allocation3 + $0x10] sm:$0xff] }
 0x11b   :  { %2770 = vmatpush2.bf16.msra.mxu0 %v5986_v37  ;;  %2808 = vmatprep.subr.bf16.mxu1 %v6123_v45  ;;  %v304_v37 = vld [vmem:[#allocation3 + $0x530] sm:$0xff] }
 0x11c   :  { %2771 = vmatprep.subr.bf16.mxu0 %v5979_v40  ;;  %v144_v40 = vld [vmem:[#allocation3 + $0x30] sm:$0xff]  ;;  %v5949_v49 = vcombine.high %v300_v36, %v304_v37  ;;  %v5948_v51 = vcombine.low %v300_v36, %v304_v37 }
 0x11d   :  { %v5789_v44 = vcombine.high %v140_v39, %v144_v40  ;;  %v292_v45 = vld [vmem:[#allocation3 + $0x4d0] sm:$0xff]  ;;  %v5788_v50 = vcombine.low %v140_v39, %v144_v40 }
 0x11e   :  { %2809 = vmatpush2.bf16.msra.mxu1 %v6122_v47  ;;  %v260_v47 = vld [vmem:[#allocation3 + $0x3d0] sm:$0xff] }
 0x11f   :  { %2772 = vmatpush2.bf16.msra.mxu0 %v5978_v46  ;;  %2810 = vmatprep.subr.bf16.mxu1 %v6115_v53  ;;  %v296_v46 = vld [vmem:[#allocation3 + $0x4f0] sm:$0xff] }
 0x120   :  { %2864 = vmatprep.subr.bf16.mxu0 %v5845_v48  ;;  %v264_v48 = vld [vmem:[#allocation3 + $0x3f0] sm:$0xff]  ;;  %v5940_v61 = vcombine.low %v292_v45, %v296_v46 }
 0x121   :  { %v5909_v52 = vcombine.high %v260_v47, %v264_v48  ;;  %v284_v53 = vld [vmem:[#allocation3 + $0x490] sm:$0xff] }
 0x122   :  { %2774 = vmatmul.mubr.bf16.vlgmr.msra.gmra.mxu0 %v7310_v20  ;;  %2811 = vmatpush2.bf16.msra.mxu1 %v6114_v57  ;;  %v5941_v57 = vcombine.high %v292_v45, %v296_v46  ;;  %v248_v2 = vld [vmem:[#allocation3 + $0x370] sm:$0xff] }
 0x123   :  { %2865 = vmatpush1.bf16.msra.mxu0 %v5844_v54  ;;  %2896 = vmatprep.mubr.bf16.mxu0 %v7296_v59  ;;  %v288_v54 = vld [vmem:[#allocation3 + $0x4b0] sm:$0xff]  ;;  %v5893_v6 = vcombine.high %v244_v1, %v248_v2  ;;  %v5892_v12 = vcombine.low %v244_v1, %v248_v2  ;;  %v7350_v1 = vld [vmem:[#allocation5] sm:$0xff] }
 0x124   :  { %2866 = vmatprep.subr.bf16.mxu0 %v5837_v58  ;;  %2812 = vmatprep.subr.bf16.mxu1 %v6107_v63  ;;  %v5908_v58 = vcombine.low %v260_v47, %v264_v48  ;;  %v276_v63 = vld [vmem:[#allocation3 + $0x450] sm:$0xff]  ;;  %v5932_v5 = vcombine.low %v284_v53, %v288_v54 }
 0x125   :  { %v392_v16 = vld [vmem:[#allocation3 + $0x7f0] sm:$0xff] }
 0x126   :  { %2813 = vmatpush2.bf16.msra.mxu1 %v6106_v3  ;;  %v5933_v3 = vcombine.high %v284_v53, %v288_v54  ;;  %v228_v18 = vld [vmem:[#allocation3 + $0x2d0] sm:$0xff] }
 0x127   :  { %2867 = vmatpush1.bf16.msra.mxu0 %v5836_v0  ;;  %2837 = vmatprep.subr.bf16.mxu1 %v6171_v7  ;;  %v280_v0 = vld [vmem:[#allocation3 + $0x470] sm:$0xff] }
 0x128   :  { %2868 = vmatprep.subr.bf16.mxu0 %v5829_v4  ;;  %v5900_v4 = vcombine.low %v252_v55, %v256_v56  ;;  %v268_v7 = vld [vmem:[#allocation3 + $0x410] sm:$0xff]  ;;  %v5925_v11 = vcombine.high %v276_v63, %v280_v0 }
 0x129   :  { %2815 = vmatmul.mubr.bf16.vlgmr.msra.gmra.mxu1 %v7332_v33  ;;  %v232_v19 = vld [vmem:[#allocation3 + $0x2f0] sm:$0xff] }
 0x12a   :  { %2838 = vmatpush1.bf16.msra.mxu1 %v6170_v9  ;;  %2855 = vmatprep.mubr.bf16.mxu1 %v7215_v34  ;;  %v236_v9 = vld [vmem:[#allocation3 + $0x310] sm:$0xff] }
 0x12b   :  { %2869 = vmatpush1.bf16.msra.mxu0 %v5828_v8  ;;  %2905 = vmatprep.subr.bf16.mxu1 %v5973_v13  ;;  %v272_v8 = vld [vmem:[#allocation3 + $0x430] sm:$0xff]  ;;  %v5924_v13 = vcombine.low %v276_v63, %v280_v0 }
 0x12c   :  { %2870 = vmatprep.subr.bf16.mxu0 %v5821_v10  ;;  %v240_v10 = vld [vmem:[#allocation3 + $0x330] sm:$0xff]  ;;  %v5917_v21 = vcombine.high %v268_v7, %v272_v8 }
 0x12d   :  { %v380_v25 = vld [vmem:[#allocation3 + $0x790] sm:$0xff] }
 0x12e   :  { %v384_v26 = vld [vmem:[#allocation3 + $0x7b0] sm:$0xff] }
 0x12f   :  { %2871 = vmatpush1.bf16.msra.mxu0 %v5820_v14  ;;  %v5885_v14 = vcombine.high %v236_v9, %v240_v10  ;;  %v220_v27 = vld [vmem:[#allocation3 + $0x290] sm:$0xff]  ;;  %v6029_v36 = vcombine.high %v380_v25, %v384_v26 }
 0x130   :  { %2872 = vmatprep.subr.bf16.mxu0 %v5813_v15  ;;  %v388_v15 = vld [vmem:[#allocation3 + $0x7d0] sm:$0xff] }
 0x131   :  { %6177 = vmatmul.mubr.msk.bf16.vlgmr.msra.gmra.mxu1 %vm2532_vm0, %v7324_v38  ;;  %v224_v28 = vld [vmem:[#allocation3 + $0x2b0] sm:$0xff] }
 0x132   :  { %2906 = vmatpush1.bf16.msra.mxu1 %v5972_v23  ;;  %2937 = vmatprep.mubr.bf16.mxu1 %v7298_v60  ;;  %v5916_v23 = vcombine.low %v268_v7, %v272_v8  ;;  %v212_v37 = vld [vmem:[#allocation3 + $0x250] sm:$0xff] }
 0x133   :  { %2873 = vmatpush1.bf16.msra.mxu0 %v5812_v22  ;;  %2907 = vmatprep.subr.bf16.mxu1 %v5965_v30  ;;  %v5884_v22 = vcombine.low %v236_v9, %v240_v10  ;;  %v6037_v30 = vcombine.high %v388_v15, %v392_v16  ;;  %v216_v39 = vld [vmem:[#allocation3 + $0x270] sm:$0xff] }
 0x134   :  { %2874 = vmatprep.subr.bf16.mxu0 %v5805_v24  ;;  %v5877_v24 = vcombine.high %v228_v18, %v232_v19  ;;  %v372_v40 = vld [vmem:[#allocation3 + $0x750] sm:$0xff]  ;;  %v5861_v45 = vcombine.high %v212_v37, %v216_v39 }
 0x135   :  { %v204_v47 = vld [vmem:[#allocation3 + $0x210] sm:$0xff] }
 0x136   :  { %2908 = vmatpush1.bf16.msra.mxu1 %v5964_v32  ;;  %v6036_v32 = vcombine.low %v388_v15, %v392_v16  ;;  %v208_v48 = vld [vmem:[#allocation3 + $0x230] sm:$0xff] }
 0x137   :  { %2875 = vmatpush1.bf16.msra.mxu0 %v5804_v31  ;;  %2909 = vmatprep.subr.bf16.mxu1 %v5957_v41  ;;  %v5876_v31 = vcombine.low %v228_v18, %v232_v19  ;;  %v376_v41 = vld [vmem:[#allocation3 + $0x770] sm:$0xff]  ;;  %v5853_v54 = vcombine.high %v204_v47, %v208_v48 }
 0x138   :  { %2876 = vmatprep.subr.bf16.mxu0 %v5797_v35  ;;  %v5869_v35 = vcombine.high %v220_v27, %v224_v28  ;;  %v6021_v46 = vcombine.high %v372_v40, %v376_v41  ;;  %v6020_v53 = vcombine.low %v372_v40, %v376_v41  ;;  %v452_v56 = vld [vmem:[#allocation3 + $0x9d0] sm:$0xff] }
 0x139   :  { %v348_v7 = vld [vmem:[#allocation3 + $0x690] sm:$0xff] }
 0x13a   :  { %2910 = vmatpush1.bf16.msra.mxu1 %v5956_v43  ;;  %v532_v43 = vlaneseq  ;;  %v352_v8 = vld [vmem:[#allocation3 + $0x6b0] sm:$0xff] }
 0x13b   :  { %2877 = vmatpush1.bf16.msra.mxu0 %v5796_v42  ;;  %2911 = vmatprep.subr.bf16.mxu1 %v5949_v49  ;;  %v5868_v42 = vcombine.low %v220_v27, %v224_v28  ;;  %v364_v49 = vld [vmem:[#allocation3 + $0x710] sm:$0xff] }
 0x13c   :  { %2878 = vmatprep.subr.bf16.mxu0 %v5789_v44  ;;  %v6028_v44 = vcombine.low %v380_v25, %v384_v26  ;;  %v436_v15 = vld [vmem:[#allocation3 + $0x950] sm:$0xff]  ;;  %v5996_v26 = vcombine.low %v348_v7, %v352_v8 }
 0x13d   :  { %v440_v16 = vld [vmem:[#allocation3 + $0x970] sm:$0xff] }
 0x13e   :  { %2912 = vmatpush1.bf16.msra.mxu1 %v5948_v51  ;;  %v5860_v51 = vcombine.low %v212_v37, %v216_v39  ;;  %v340_v19 = vld [vmem:[#allocation3 + $0x650] sm:$0xff]  ;;  %v6085_v27 = vcombine.high %v436_v15, %v440_v16 }
 0x13f   :  { %2879 = vmatpush1.bf16.msra.mxu0 %v5788_v50  ;;  %2913 = vmatprep.subr.bf16.mxu1 %v5941_v57  ;;  %v368_v50 = vld [vmem:[#allocation3 + $0x730] sm:$0xff] }
 0x140   :  { %2880 = vmatprep.subr.bf16.mxu0 %v5909_v52  ;;  %v7345_v52 = vshrl.u32 %v532_v43, 7  ;;  %v6013_v55 = vcombine.high %v364_v49, %v368_v50  ;;  %v456_v57 = vld [vmem:[#allocation3 + $0x9f0] sm:$0xff]  ;;  %v6012_v0 = vcombine.low %v364_v49, %v368_v50  ;;  %v6084_v43 = vcombine.low %v436_v15, %v440_v16 }
 0x141   :  { %v6101_v2 = vcombine.high %v452_v56, %v456_v57  ;;  %v6100_v10 = vcombine.low %v452_v56, %v456_v57  ;;  %v332_v37 = vld [vmem:[#allocation3 + $0x610] sm:$0xff] }
 0x142   :  { %2914 = vmatpush1.bf16.msra.mxu1 %v5940_v61  ;;  %v360_v61 = vld [vmem:[#allocation3 + $0x6f0] sm:$0xff]  ;;  %v7348_v63 = vsub.s32 0, %v7345_v52 }
 0x143   :  { %2881 = vmatpush2.bf16.msra.mxu0 %v5908_v58  ;;  %2915 = vmatprep.subr.bf16.mxu1 %v5933_v3  ;;  %v356_v58 = vld [vmem:[#allocation3 + $0x6d0] sm:$0xff] }
 0x144   :  { %2882 = vmatprep.subr.bf16.mxu0 %v5901_v62  ;;  %v5852_v62 = vcombine.low %v204_v47, %v208_v48  ;;  %v6005_v3 = vcombine.high %v356_v58, %v360_v61  ;;  %v535_v9 = vrot.slane %v7350_v1, %v7348_v63  ;;  %v336_v39 = vld [vmem:[#allocation3 + $0x630] sm:$0xff] }
 0x145   :  { %v5981_v48 = vcombine.high %v332_v37, %v336_v39  ;;  %v420_v49 = vld [vmem:[#allocation3 + $0x8d0] sm:$0xff]  ;;  %v5980_v56 = vcombine.low %v332_v37, %v336_v39 }
 0x146   :  { %2916 = vmatpush1.bf16.msra.mxu1 %v5932_v5  ;;  %v444_v5 = vld [vmem:[#allocation3 + $0x990] sm:$0xff] }
 0x147   :  { %2883 = vmatpush2.bf16.msra.mxu0 %v5900_v4  ;;  %2917 = vmatprep.subr.bf16.mxu1 %v5925_v11  ;;  %v7353_v4 = vsub.s32 1, %v7345_v52  ;;  %v6004_v11 = vcombine.low %v356_v58, %v360_v61  ;;  %v424_v50 = vld [vmem:[#allocation3 + $0x8f0] sm:$0xff] }
 0x148   :  { %2884 = vmatprep.subr.bf16.mxu0 %v5893_v6  ;;  %v448_v6 = vld [vmem:[#allocation3 + $0x9b0] sm:$0xff]  ;;  %v6069_v57 = vcombine.high %v420_v49, %v424_v50 }
 0x149   :  { %v396_v15 = vld [vmem:[#allocation3 + $0x810] sm:$0xff] }
 0x14a   :  { %2918 = vmatpush1.bf16.msra.mxu1 %v5924_v13  ;;  %v539_v13 = vrot.slane %v7350_v1, %v7353_v4  ;;  %v400_v16 = vld [vmem:[#allocation3 + $0x830] sm:$0xff] }
 0x14b   :  { %2885 = vmatpush2.bf16.msra.mxu0 %v5892_v12  ;;  %2919 = vmatprep.subr.bf16.mxu1 %v5917_v21  ;;  %v6093_v12 = vcombine.high %v444_v5, %v448_v6  ;;  %v344_v21 = vld [vmem:[#allocation3 + $0x670] sm:$0xff] }
 0x14c   :  { %2886 = vmatprep.subr.bf16.mxu0 %v5885_v14  ;;  %v5997_v14 = vcombine.high %v348_v7, %v352_v8  ;;  %v508_v37 = vld [vmem:[#allocation3 + $0xb90] sm:$0xff] }
 0x14d   :  { %v512_v39 = vld [vmem:[#allocation3 + $0xbb0] sm:$0xff] }
 0x14e   :  { %2920 = vmatpush1.bf16.msra.mxu1 %v5916_v23 }
 0x14f   :  { %2887 = vmatpush2.bf16.msra.mxu0 %v5884_v22  ;;  %2921 = vmatprep.subr.bf16.mxu1 %v6037_v30 }
 0x150   :  { %2888 = vmatprep.subr.bf16.mxu0 %v5877_v24  ;;  %v6092_v24 = vcombine.low %v444_v5, %v448_v6  ;;  %v6068_v6 = vcombine.low %v420_v49, %v424_v50  ;;  %v165_v49 = vld [vmem:[#allocation3 + $0xd8] sm:$0xff] }
 0x151   :  { %v169_v50 = vld [vmem:[#allocation3 + $0xf8] sm:$0xff] }
 0x152   :  { %2922 = vmatpush2.bf16.msra.mxu1 %v6036_v32  ;;  %v5989_v32 = vcombine.high %v340_v19, %v344_v21 }
 0x153   :  { %2889 = vmatpush2.bf16.msra.mxu0 %v5876_v31  ;;  %2923 = vmatprep.subr.bf16.mxu1 %v6029_v36  ;;  %v432_v36 = vld [vmem:[#allocation3 + $0x930] sm:$0xff] }
 0x154   :  { %2890 = vmatprep.subr.bf16.mxu0 %v5869_v35  ;;  %v428_v35 = vld [vmem:[#allocation3 + $0x910] sm:$0xff] }
 0x156   :  { %2924 = vmatpush2.bf16.msra.mxu1 %v6028_v44  ;;  %v5988_v44 = vcombine.low %v340_v19, %v344_v21  ;;  %v193_v19 = vld [vmem:[#allocation3 + $0x1b8] sm:$0xff] }
 0x157   :  { %2891 = vmatpush2.bf16.msra.mxu0 %v5868_v42  ;;  %2925 = vmatprep.subr.bf16.mxu1 %v6021_v46 }
 0x158   :  { %2892 = vmatprep.subr.bf16.mxu0 %v5861_v45  ;;  %v6077_v45 = vcombine.high %v428_v35, %v432_v36 }
 0x15a   :  { %2926 = vmatpush2.bf16.msra.mxu1 %v6020_v53  ;;  %v528_v53 = vld [vmem:[#allocation3 + $0xc30] sm:$0xff] }
 0x15b   :  { %2893 = vmatpush2.bf16.msra.mxu0 %v5860_v51  ;;  %2927 = vmatprep.subr.bf16.mxu1 %v6013_v55  ;;  %v524_v51 = vld [vmem:[#allocation3 + $0xc10] sm:$0xff]  ;;  %v6076_v55 = vcombine.low %v428_v35, %v432_v36 }
 0x15c   :  { %2894 = vmatprep.subr.bf16.mxu0 %v5853_v54  ;;  %v6173_v61 = vcombine.high %v524_v51, %v528_v53  ;;  %v6172_v7 = vcombine.low %v524_v51, %v528_v53  ;;  %v6156_v51 = vcombine.low %v508_v37, %v512_v39 }
 0x15e   :  { %2928 = vmatpush2.bf16.msra.mxu1 %v6012_v0  ;;  %v416_v0 = vld [vmem:[#allocation3 + $0x8b0] sm:$0xff] }
 0x15f   :  { %2895 = vmatpush2.bf16.msra.mxu0 %v5852_v62  ;;  %2929 = vmatprep.subr.bf16.mxu1 %v6005_v3  ;;  %v412_v62 = vld [vmem:[#allocation3 + $0x890] sm:$0xff]  ;;  %v201_v3 = vld [vmem:[#allocation3 + $0x1f8] sm:$0xff] }
 0x160   :  { %2946 = vmatprep.subr.bf16.mxu0 %v6101_v2  ;;  %v197_v2 = vld [vmem:[#allocation3 + $0x1d8] sm:$0xff]  ;;  %v6061_v8 = vcombine.high %v412_v62, %v416_v0 }
 0x161   :  { %v2611_v23 = vpop.f32.mrf.mxu1 }
 0x162   :  { %v2570_v18 = vpop.f32.mrf.mxu0  ;;  %2897 = vmatmul.mubr.bf16.vlgmr.msra.gmra.mxu0 %v7308_v17  ;;  %2930 = vmatpush2.bf16.msra.mxu1 %v6004_v11  ;;  %v404_v11 = vld [vmem:[#allocation3 + $0x850] sm:$0xff] }
 0x163   :  { %v2571_v22 = vadd.f32 %v2570_v18, %v535_v9  ;;  %2947 = vmatpush1.bf16.msra.mxu0 %v6100_v10  ;;  %2978 = vmatprep.mubr.bf16.mxu0 %v7319_v29  ;;  %v2613_v31 = vpop.f32.mrf.mxu1  ;;  %v5847_v10 = vcombine.high %v197_v2, %v201_v3  ;;  %v189_v18 = vld [vmem:[#allocation3 + $0x198] sm:$0xff] }
 0x164   :  { %v2572_v25 = vpop.f32.mrf.mxu0  ;;  %2948 = vmatprep.subr.bf16.mxu0 %v6093_v12  ;;  %2931 = vmatprep.subr.bf16.mxu1 %v5997_v14  ;;  %v408_v12 = vld [vmem:[#allocation3 + $0x870] sm:$0xff] }
 0x165   :  { %v7361_v28 = vadd.f32 %v2611_v23, %v2571_v22  ;;  %v2573_v30 = vadd.f32 %v2572_v25, %v539_v13  ;;  %v2615_v42 = vpop.f32.mrf.mxu1  ;;  %v6060_v13 = vcombine.low %v412_v62, %v416_v0  ;;  %v6053_v14 = vcombine.high %v404_v11, %v408_v12  ;;  %v516_v25 = vld [vmem:[#allocation3 + $0xbd0] sm:$0xff]  ;;  %v161_v62 = vld [vmem:[#allocation3 + $0xb8] sm:$0xff] }
 0x166   :  { %v2574_v40 = vpop.f32.mrf.mxu0  ;;  %2932 = vmatpush2.bf16.msra.mxu1 %v5996_v26  ;;  %v6052_v21 = vcombine.low %v404_v11, %v408_v12  ;;  %v5846_v22 = vcombine.low %v197_v2, %v201_v3  ;;  %v6045_v23 = vcombine.high %v396_v15, %v400_v16  ;;  %v520_v26 = vld [vmem:[#allocation3 + $0xbf0] sm:$0xff]  ;;  %v177_v42 = vld [vmem:[#allocation3 + $0x138] sm:$0xff]  ;;  %v5814_v2 = vcombine.low %v165_v49, %v169_v50 }
 0x167   :  { %v7363_v41 = vadd.f32 %v2613_v31, %v2573_v30  ;;  %2949 = vmatpush1.bf16.msra.mxu0 %v6092_v24  ;;  %v2616_v47 = vpop.f32.mrf.mxu1  ;;  %2933 = vmatprep.subr.bf16.mxu1 %v5989_v32  ;;  %v5839_v24 = vcombine.high %v189_v18, %v193_v19  ;;  %v185_v30 = vld [vmem:[#allocation3 + $0x178] sm:$0xff]  ;;  %v6044_v31 = vcombine.low %v396_v15, %v400_v16  ;;  %v480_v15 = vld [vmem:[#allocation3 + $0xab0] sm:$0xff] }
 0x168   :  { %2950 = vmatprep.subr.bf16.mxu0 %v6085_v27  ;;  %v2575_v46 = vpop.f32.mrf.mxu0  ;;  %v181_v27 = vld [vmem:[#allocation3 + $0x158] sm:$0xff]  ;;  %v5838_v32 = vcombine.low %v189_v18, %v193_v19  ;;  %v6165_v35 = vcombine.high %v516_v25, %v520_v26  ;;  %v500_v47 = vld [vmem:[#allocation3 + $0xb50] sm:$0xff] }
 0x169   :  { %v7365_v54 = vpop.f32.mrf.mxu1  ;;  %v5831_v36 = vcombine.high %v181_v27, %v185_v30  ;;  %v173_v40 = vld [vmem:[#allocation3 + $0x118] sm:$0xff] }
 0x16a   :  { %2934 = vmatpush2.bf16.msra.mxu1 %v5988_v44  ;;  %v5830_v44 = vcombine.low %v181_v27, %v185_v30  ;;  %v5823_v46 = vcombine.high %v173_v40, %v177_v42  ;;  %v5822_v53 = vcombine.low %v173_v40, %v177_v42  ;;  %v141_v16 = vld [vmem:[#allocation3 + $0x18] sm:$0xff] }
 0x16b   :  { %2951 = vmatpush1.bf16.msra.mxu0 %v6084_v43  ;;  %v7367_v58 = vpop.f32.mrf.mxu1  ;;  %2935 = vmatprep.subr.bf16.mxu1 %v5981_v48  ;;  %v6164_v43 = vcombine.low %v516_v25, %v520_v26  ;;  %v504_v48 = vld [vmem:[#allocation3 + $0xb70] sm:$0xff]  ;;  %v145_v18 = vld [vmem:[#allocation3 + $0x38] sm:$0xff] }
 0x16c   :  { %2952 = vmatprep.subr.bf16.mxu0 %v6077_v45  ;;  %v6157_v45 = vcombine.high %v508_v37, %v512_v39  ;;  %v6148_v0 = vcombine.low %v500_v47, %v504_v48  ;;  %v472_v25 = vld [vmem:[#allocation3 + $0xa70] sm:$0xff]  ;;  %v261_v26 = vld [vmem:[#allocation3 + $0x3d8] sm:$0xff] }
 0x16d   :  { %v2697_v5 = vpop.f32.mrf.mxu1  ;;  %v265_v27 = vld [vmem:[#allocation3 + $0x3f8] sm:$0xff]  ;;  %v464_v37 = vld [vmem:[#allocation3 + $0xa30] sm:$0xff] }
 0x16e   :  { %2936 = vmatpush2.bf16.msra.mxu1 %v5980_v56  ;;  %v492_v56 = vld [vmem:[#allocation3 + $0xb10] sm:$0xff]  ;;  %v253_v39 = vld [vmem:[#allocation3 + $0x398] sm:$0xff] }
 0x16f   :  { %2953 = vmatpush1.bf16.msra.mxu0 %v6076_v55  ;;  %v2698_v9 = vpop.f32.mrf.mxu1  ;;  %3001 = vmatprep.subr.bf16.mxu1 %v6173_v61  ;;  %v5815_v55 = vcombine.high %v165_v49, %v169_v50  ;;  %v157_v61 = vld [vmem:[#allocation3 + $0x98] sm:$0xff] }
 0x170   :  { %2954 = vmatprep.subr.bf16.mxu0 %v6069_v57  ;;  %v496_v57 = vld [vmem:[#allocation3 + $0xb30] sm:$0xff]  ;;  %v5807_v5 = vcombine.high %v157_v61, %v161_v62  ;;  %v153_v9 = vld [vmem:[#allocation3 + $0x78] sm:$0xff]  ;;  %v5806_v11 = vcombine.low %v157_v61, %v161_v62 }
 0x171   :  { %2938 = vmatmul.mubr.bf16.vlgmr.msra.gmra.mxu1 %v7310_v20  ;;  %v6141_v3 = vcombine.high %v492_v56, %v496_v57  ;;  %v257_v40 = vld [vmem:[#allocation3 + $0x3b8] sm:$0xff] }
 0x172   :  { %3002 = vmatpush1.bf16.msra.mxu1 %v6172_v7  ;;  %3019 = vmatprep.mubr.bf16.mxu1 %v7215_v34  ;;  %v488_v7 = vld [vmem:[#allocation3 + $0xaf0] sm:$0xff]  ;;  %v249_v49 = vld [vmem:[#allocation3 + $0x378] sm:$0xff] }
 0x173   :  { %2955 = vmatpush1.bf16.msra.mxu0 %v6068_v6  ;;  %3028 = vmatprep.subr.bf16.mxu1 %v5847_v10  ;;  %v484_v6 = vld [vmem:[#allocation3 + $0xad0] sm:$0xff]  ;;  %v6140_v10 = vcombine.low %v492_v56, %v496_v57  ;;  %v321_v56 = vld [vmem:[#allocation3 + $0x5b8] sm:$0xff] }
 0x174   :  { %2956 = vmatprep.subr.bf16.mxu0 %v6061_v8  ;;  %v149_v8 = vld [vmem:[#allocation3 + $0x58] sm:$0xff]  ;;  %v6133_v12 = vcombine.high %v484_v6, %v488_v7  ;;  %v6132_v19 = vcombine.low %v484_v6, %v488_v7 }
 0x175   :  { %v237_v57 = vld [vmem:[#allocation3 + $0x318] sm:$0xff] }
 0x176   :  { %v241_v61 = vld [vmem:[#allocation3 + $0x338] sm:$0xff] }
 0x177   :  { %2957 = vmatpush1.bf16.msra.mxu0 %v6060_v13  ;;  %v5799_v13 = vcombine.high %v149_v8, %v153_v9  ;;  %v313_v6 = vld [vmem:[#allocation3 + $0x578] sm:$0xff] }
 0x178   :  { %2958 = vmatprep.subr.bf16.mxu0 %v6053_v14  ;;  %v476_v14 = vld [vmem:[#allocation3 + $0xa90] sm:$0xff] }
 0x179   :  { %6178 = vmatmul.mubr.msk.bf16.vlgmr.msra.gmra.mxu1 %vm2532_vm0, %v7324_v38  ;;  %v6124_v30 = vcombine.low %v476_v14, %v480_v15 }
 0x17a   :  { %3029 = vmatpush1.bf16.msra.mxu1 %v5846_v22  ;;  %3060 = vmatprep.mubr.bf16.mxu1 %v7296_v59  ;;  %v6149_v59 = vcombine.high %v500_v47, %v504_v48  ;;  %v6125_v22 = vcombine.high %v476_v14, %v480_v15  ;;  %v329_v47 = vld [vmem:[#allocation3 + $0x5f8] sm:$0xff] }
 0x17b   :  { %2959 = vmatpush1.bf16.msra.mxu0 %v6052_v21  ;;  %3030 = vmatprep.subr.bf16.mxu1 %v5839_v24  ;;  %v5798_v21 = vcombine.low %v149_v8, %v153_v9  ;;  %v468_v24 = vld [vmem:[#allocation3 + $0xa50] sm:$0xff]  ;;  %v245_v48 = vld [vmem:[#allocation3 + $0x358] sm:$0xff] }
 0x17c   :  { %2960 = vmatprep.subr.bf16.mxu0 %v6045_v23  ;;  %v5791_v23 = vcombine.high %v141_v16, %v145_v18  ;;  %v6116_v42 = vcombine.low %v468_v24, %v472_v25  ;;  %v229_v8 = vld [vmem:[#allocation3 + $0x2d8] sm:$0xff] }
 0x17d   :  { %v233_v9 = vld [vmem:[#allocation3 + $0x2f8] sm:$0xff] }
 0x17e   :  { %3031 = vmatpush1.bf16.msra.mxu1 %v5838_v32  ;;  %v6117_v32 = vcombine.high %v468_v24, %v472_v25  ;;  %v5878_v25 = vcombine.low %v229_v8, %v233_v9 }
 0x17f   :  { %2961 = vmatpush1.bf16.msra.mxu0 %v6044_v31  ;;  %3032 = vmatprep.subr.bf16.mxu1 %v5831_v36  ;;  %v5790_v31 = vcombine.low %v141_v16, %v145_v18  ;;  %v460_v36 = vld [vmem:[#allocation3 + $0xa10] sm:$0xff]  ;;  %v5879_v18 = vcombine.high %v229_v8, %v233_v9 }
 0x180   :  { %2962 = vmatprep.subr.bf16.mxu0 %v6165_v35  ;;  %v5911_v35 = vcombine.high %v261_v26, %v265_v27  ;;  %v6108_v50 = vcombine.low %v460_v36, %v464_v37 }
 0x182   :  { %3033 = vmatpush1.bf16.msra.mxu1 %v5830_v44  ;;  %v6109_v44 = vcombine.high %v460_v36, %v464_v37 }
 0x183   :  { %2963 = vmatpush2.bf16.msra.mxu0 %v6164_v43  ;;  %3034 = vmatprep.subr.bf16.mxu1 %v5823_v46  ;;  %v5910_v43 = vcombine.low %v261_v26, %v265_v27  ;;  %v325_v46 = vld [vmem:[#allocation3 + $0x5d8] sm:$0xff] }
 0x184   :  { %2964 = vmatprep.subr.bf16.mxu0 %v6157_v45  ;;  %v5903_v45 = vcombine.high %v253_v39, %v257_v40  ;;  %v5974_v62 = vcombine.low %v325_v46, %v329_v47 }
 0x186   :  { %3035 = vmatpush1.bf16.msra.mxu1 %v5822_v53  ;;  %v5975_v53 = vcombine.high %v325_v46, %v329_v47 }
 0x187   :  { %2965 = vmatpush2.bf16.msra.mxu0 %v6156_v51  ;;  %3036 = vmatprep.subr.bf16.mxu1 %v5815_v55  ;;  %v5902_v51 = vcombine.low %v253_v39, %v257_v40  ;;  %v317_v55 = vld [vmem:[#allocation3 + $0x598] sm:$0xff] }
 0x188   :  { %2966 = vmatprep.subr.bf16.mxu0 %v6149_v59  ;;  %v5895_v59 = vcombine.high %v245_v48, %v249_v49 }
 0x18a   :  { %3037 = vmatpush1.bf16.msra.mxu1 %v5814_v2  ;;  %v5967_v2 = vcombine.high %v317_v55, %v321_v56 }
 0x18b   :  { %2967 = vmatpush2.bf16.msra.mxu0 %v6148_v0  ;;  %3038 = vmatprep.subr.bf16.mxu1 %v5807_v5  ;;  %v5894_v0 = vcombine.low %v245_v48, %v249_v49  ;;  %v309_v5 = vld [vmem:[#allocation3 + $0x558] sm:$0xff] }
 0x18c   :  { %2968 = vmatprep.subr.bf16.mxu0 %v6141_v3  ;;  %v5887_v3 = vcombine.high %v237_v57, %v241_v61  ;;  %v5959_v14 = vcombine.high %v309_v5, %v313_v6 }
 0x18e   :  { %3039 = vmatpush1.bf16.msra.mxu1 %v5806_v11  ;;  %v5966_v11 = vcombine.low %v317_v55, %v321_v56  ;;  %v453_v55 = vld [vmem:[#allocation3 + $0x9d8] sm:$0xff] }
 0x18f   :  { %2969 = vmatpush2.bf16.msra.mxu0 %v6140_v10  ;;  %3040 = vmatprep.subr.bf16.mxu1 %v5799_v13  ;;  %v457_v56 = vld [vmem:[#allocation3 + $0x9f8] sm:$0xff] }
 0x190   :  { %2970 = vmatprep.subr.bf16.mxu0 %v6133_v12  ;;  %v5886_v12 = vcombine.low %v237_v57, %v241_v61  ;;  %v6102_v8 = vcombine.low %v453_v55, %v457_v56 }
 0x192   :  { %3041 = vmatpush1.bf16.msra.mxu1 %v5798_v21  ;;  %v305_v21 = vld [vmem:[#allocation3 + $0x538] sm:$0xff] }
 0x193   :  { %2971 = vmatpush2.bf16.msra.mxu0 %v6132_v19  ;;  %3042 = vmatprep.subr.bf16.mxu1 %v5791_v23  ;;  %v301_v19 = vld [vmem:[#allocation3 + $0x518] sm:$0xff] }
 0x194   :  { %2972 = vmatprep.subr.bf16.mxu0 %v6125_v22  ;;  %v221_v22 = vld [vmem:[#allocation3 + $0x298] sm:$0xff]  ;;  %v5951_v26 = vcombine.high %v301_v19, %v305_v21  ;;  %v5950_v36 = vcombine.low %v301_v19, %v305_v21 }
 0x196   :  { %3043 = vmatpush1.bf16.msra.mxu1 %v5790_v31  ;;  %v213_v31 = vld [vmem:[#allocation3 + $0x258] sm:$0xff] }
 0x197   :  { %2973 = vmatpush2.bf16.msra.mxu0 %v6124_v30  ;;  %3044 = vmatprep.subr.bf16.mxu1 %v5911_v35  ;;  %v293_v30 = vld [vmem:[#allocation3 + $0x4d8] sm:$0xff] }
 0x198   :  { %2974 = vmatprep.subr.bf16.mxu0 %v6117_v32  ;;  %v217_v32 = vld [vmem:[#allocation3 + $0x278] sm:$0xff] }
 0x199   :  { %v5863_v40 = vcombine.high %v213_v31, %v217_v32  ;;  %v5862_v48 = vcombine.low %v213_v31, %v217_v32  ;;  %v425_v31 = vld [vmem:[#allocation3 + $0x8f8] sm:$0xff] }
 0x19a   :  { %3045 = vmatpush2.bf16.msra.mxu1 %v5910_v43  ;;  %v289_v43 = vld [vmem:[#allocation3 + $0x4b8] sm:$0xff] }
 0x19b   :  { %2975 = vmatpush2.bf16.msra.mxu0 %v6116_v42  ;;  %3046 = vmatprep.subr.bf16.mxu1 %v5903_v45  ;;  %v285_v42 = vld [vmem:[#allocation3 + $0x498] sm:$0xff] }
 0x19c   :  { %2976 = vmatprep.subr.bf16.mxu0 %v6109_v44  ;;  %v205_v44 = vld [vmem:[#allocation3 + $0x218] sm:$0xff]  ;;  %v5935_v49 = vcombine.high %v285_v42, %v289_v43  ;;  %v5934_v57 = vcombine.low %v285_v42, %v289_v43 }
 0x19d   :  { %v209_v45 = vld [vmem:[#allocation3 + $0x238] sm:$0xff] }
 0x19e   :  { %3047 = vmatpush2.bf16.msra.mxu1 %v5902_v51  ;;  %v5855_v51 = vcombine.high %v205_v44, %v209_v45  ;;  %v5854_v61 = vcombine.low %v205_v44, %v209_v45  ;;  %v413_v42 = vld [vmem:[#allocation3 + $0x898] sm:$0xff] }
 0x19f   :  { %2977 = vmatpush2.bf16.msra.mxu0 %v6108_v50  ;;  %3048 = vmatprep.subr.bf16.mxu1 %v5895_v59  ;;  %v281_v59 = vld [vmem:[#allocation3 + $0x478] sm:$0xff] }
 0x1a0   :  { %3069 = vmatprep.subr.bf16.mxu0 %v5975_v53  ;;  %v277_v53 = vld [vmem:[#allocation3 + $0x458] sm:$0xff] }
 0x1a1   :  { %v417_v43 = vld [vmem:[#allocation3 + $0x8b8] sm:$0xff] }
 0x1a2   :  { %v2652_v7 = vpop.f32.mrf.mxu0  ;;  %2979 = vmatmul.mubr.bf16.vlgmr.msra.gmra.mxu0 %v7332_v33  ;;  %3049 = vmatpush2.bf16.msra.mxu1 %v5894_v0  ;;  %v6103_v0 = vcombine.high %v453_v55, %v457_v56 }
 0x1a3   :  { %v2653_v10 = vadd.f32 %v2652_v7, %v7361_v28  ;;  %3070 = vmatpush1.bf16.msra.mxu0 %v5974_v62  ;;  %3101 = vmatprep.mubr.bf16.mxu0 %v7298_v60  ;;  %v225_v28 = vld [vmem:[#allocation3 + $0x2b8] sm:$0xff]  ;;  %v5958_v60 = vcombine.low %v309_v5, %v313_v6  ;;  %v5927_v62 = vcombine.high %v277_v53, %v281_v59 }
 0x1a4   :  { %v2654_v13 = vpop.f32.mrf.mxu0  ;;  %3071 = vmatprep.subr.bf16.mxu0 %v5967_v2  ;;  %3050 = vmatprep.subr.bf16.mxu1 %v5887_v3  ;;  %v5871_v27 = vcombine.high %v221_v22, %v225_v28  ;;  %v269_v2 = vld [vmem:[#allocation3 + $0x418] sm:$0xff]  ;;  %v5926_v7 = vcombine.low %v277_v53, %v281_v59  ;;  %v6062_v59 = vcombine.low %v413_v42, %v417_v43 }
 0x1a5   :  { %v7378_v15 = vadd.f32 %v7365_v54, %v2653_v10  ;;  %v2655_v16 = vadd.f32 %v2654_v13, %v7363_v41  ;;  %v297_v41 = vld [vmem:[#allocation3 + $0x4f8] sm:$0xff] }
 0x1a6   :  { %v2656_v23 = vpop.f32.mrf.mxu0  ;;  %3051 = vmatpush2.bf16.msra.mxu1 %v5886_v12  ;;  %v5943_v37 = vcombine.high %v293_v30, %v297_v41  ;;  %v5942_v47 = vcombine.low %v293_v30, %v297_v41  ;;  %v273_v3 = vld [vmem:[#allocation3 + $0x438] sm:$0xff] }
 0x1a7   :  { %v7382_v24 = vadd.f32 %v7367_v58, %v2655_v16  ;;  %3072 = vmatpush1.bf16.msra.mxu0 %v5966_v11  ;;  %3052 = vmatprep.subr.bf16.mxu1 %v5879_v18  ;;  %v5870_v58 = vcombine.low %v221_v22, %v225_v28  ;;  %v445_v5 = vld [vmem:[#allocation3 + $0x998] sm:$0xff]  ;;  %v5919_v9 = vcombine.high %v269_v2, %v273_v3 }
 0x1a8   :  { %3073 = vmatprep.subr.bf16.mxu0 %v5959_v14  ;;  %v2657_v54 = vpop.f32.mrf.mxu0  ;;  %v449_v6 = vld [vmem:[#allocation3 + $0x9b8] sm:$0xff]  ;;  %v5918_v16 = vcombine.low %v269_v2, %v273_v3 }
 0x1a9   :  { %v7384_v35 = vpop.f32.mrf.mxu1  ;;  %v6095_v10 = vcombine.high %v445_v5, %v449_v6  ;;  %v389_v11 = vld [vmem:[#allocation3 + $0x7d8] sm:$0xff]  ;;  %v6094_v18 = vcombine.low %v445_v5, %v449_v6 }
 0x1aa   :  { %3053 = vmatpush2.bf16.msra.mxu1 %v5878_v25  ;;  %v393_v12 = vld [vmem:[#allocation3 + $0x7f8] sm:$0xff] }
 0x1ab   :  { %3074 = vmatpush1.bf16.msra.mxu0 %v5958_v60  ;;  %v7386_v39 = vpop.f32.mrf.mxu1  ;;  %3054 = vmatprep.subr.bf16.mxu1 %v5871_v27  ;;  %v437_v13 = vld [vmem:[#allocation3 + $0x958] sm:$0xff]  ;;  %v6039_v19 = vcombine.high %v389_v11, %v393_v12  ;;  %v6038_v25 = vcombine.low %v389_v11, %v393_v12 }
 0x1ac   :  { %3075 = vmatprep.subr.bf16.mxu0 %v5951_v26  ;;  %v441_v14 = vld [vmem:[#allocation3 + $0x978] sm:$0xff] }
 0x1ad   :  { %v2738_v46 = vpop.f32.mrf.mxu1  ;;  %v6087_v21 = vcombine.high %v437_v13, %v441_v14  ;;  %v381_v22 = vld [vmem:[#allocation3 + $0x798] sm:$0xff]  ;;  %v6086_v26 = vcombine.low %v437_v13, %v441_v14 }
 0x1ae   :  { %3055 = vmatpush2.bf16.msra.mxu1 %v5870_v58  ;;  %v385_v28 = vld [vmem:[#allocation3 + $0x7b8] sm:$0xff] }
 0x1af   :  { %3076 = vmatpush1.bf16.msra.mxu0 %v5950_v36  ;;  %v2739_v50 = vpop.f32.mrf.mxu1  ;;  %3056 = vmatprep.subr.bf16.mxu1 %v5863_v40  ;;  %v429_v23 = vld [vmem:[#allocation3 + $0x918] sm:$0xff]  ;;  %v6030_v32 = vcombine.low %v381_v22, %v385_v28 }
 0x1b0   :  { %3077 = vmatprep.subr.bf16.mxu0 %v5943_v37  ;;  %v433_v60 = vld [vmem:[#allocation3 + $0x938] sm:$0xff] }
 0x1b1   :  { %v6079_v54 = vcombine.high %v429_v23, %v433_v60  ;;  %v373_v27 = vld [vmem:[#allocation3 + $0x758] sm:$0xff]  ;;  %v6078_v36 = vcombine.low %v429_v23, %v433_v60  ;;  %v3193_v60 = vmul.f32 0.2, %v7382_v24 }
 0x1b2   :  { %3057 = vmatpush2.bf16.msra.mxu1 %v5862_v48  ;;  %v377_v30 = vld [vmem:[#allocation3 + $0x778] sm:$0xff] }
 0x1b3   :  { %3078 = vmatpush1.bf16.msra.mxu0 %v5942_v47  ;;  %3058 = vmatprep.subr.bf16.mxu1 %v5855_v51  ;;  %v421_v41 = vld [vmem:[#allocation3 + $0x8d8] sm:$0xff]  ;;  %v6022_v44 = vcombine.low %v373_v27, %v377_v30  ;;  %v6063_v47 = vcombine.high %v413_v42, %v417_v43 }
 0x1b4   :  { %3079 = vmatprep.subr.bf16.mxu0 %v5935_v49  ;;  %v6071_v58 = vcombine.high %v421_v41, %v425_v31  ;;  %v365_v37 = vld [vmem:[#allocation3 + $0x718] sm:$0xff]  ;;  %v6070_v45 = vcombine.low %v421_v41, %v425_v31 }
 0x1b5   :  { %v369_v40 = vld [vmem:[#allocation3 + $0x738] sm:$0xff] }
 0x1b6   :  { %3059 = vmatpush2.bf16.msra.mxu1 %v5854_v61  ;;  %v6015_v46 = vcombine.high %v365_v37, %v369_v40  ;;  %v357_v48 = vld [vmem:[#allocation3 + $0x6d8] sm:$0xff]  ;;  %v6014_v53 = vcombine.low %v365_v37, %v369_v40 }
 0x1b7   :  { %3080 = vmatpush1.bf16.msra.mxu0 %v5934_v57  ;;  %3110 = vmatprep.subr.bf16.mxu1 %v6103_v0  ;;  %v361_v49 = vld [vmem:[#allocation3 + $0x6f8] sm:$0xff] }
 0x1b8   :  { %3081 = vmatprep.subr.bf16.mxu0 %v5927_v62  ;;  %v405_v50 = vld [vmem:[#allocation3 + $0x858] sm:$0xff]  ;;  %v6007_v55 = vcombine.high %v357_v48, %v361_v49  ;;  %v6006_v2 = vcombine.low %v357_v48, %v361_v49 }
 0x1b9   :  { %3061 = vmatmul.mubr.bf16.vlgmr.msra.gmra.mxu1 %v7308_v17  ;;  %v6031_v17 = vcombine.high %v381_v22, %v385_v28  ;;  %v409_v51 = vld [vmem:[#allocation3 + $0x878] sm:$0xff] }
 0x1ba   :  { %3111 = vmatpush1.bf16.msra.mxu1 %v6102_v8  ;;  %3142 = vmatprep.mubr.bf16.mxu1 %v7319_v29  ;;  %v6023_v29 = vcombine.high %v373_v27, %v377_v30  ;;  %v6055_v56 = vcombine.high %v405_v50, %v409_v51  ;;  %v349_v57 = vld [vmem:[#allocation3 + $0x698] sm:$0xff]  ;;  %v6054_v3 = vcombine.low %v405_v50, %v409_v51 }
 0x1bb   :  { %3082 = vmatpush1.bf16.msra.mxu0 %v5926_v7  ;;  %3112 = vmatprep.subr.bf16.mxu1 %v6095_v10  ;;  %v353_v61 = vld [vmem:[#allocation3 + $0x6b8] sm:$0xff] }
 0x1bc   :  { %3083 = vmatprep.subr.bf16.mxu0 %v5919_v9  ;;  %v397_v62 = vld [vmem:[#allocation3 + $0x818] sm:$0xff]  ;;  %v5999_v5 = vcombine.high %v349_v57, %v353_v61  ;;  %v5998_v11 = vcombine.low %v349_v57, %v353_v61 }
 0x1bd   :  { %v401_v0 = vld [vmem:[#allocation3 + $0x838] sm:$0xff] }
 0x1be   :  { %3113 = vmatpush1.bf16.msra.mxu1 %v6094_v18  ;;  %v6047_v6 = vcombine.high %v397_v62, %v401_v0  ;;  %v341_v7 = vld [vmem:[#allocation3 + $0x658] sm:$0xff]  ;;  %v6046_v12 = vcombine.low %v397_v62, %v401_v0 }
 0x1bf   :  { %3084 = vmatpush1.bf16.msra.mxu0 %v5918_v16  ;;  %3114 = vmatprep.subr.bf16.mxu1 %v6087_v21  ;;  %v345_v8 = vld [vmem:[#allocation3 + $0x678] sm:$0xff] }
 0x1c0   :  { %3085 = vmatprep.subr.bf16.mxu0 %v6039_v19  ;;  %v517_v9 = vld [vmem:[#allocation3 + $0xbd8] sm:$0xff]  ;;  %v5991_v13 = vcombine.high %v341_v7, %v345_v8  ;;  %v5990_v22 = vcombine.low %v341_v7, %v345_v8 }
 0x1c1   :  { %v521_v10 = vld [vmem:[#allocation3 + $0xbf8] sm:$0xff] }
 0x1c2   :  { %3115 = vmatpush1.bf16.msra.mxu1 %v6086_v26  ;;  %v6167_v14 = vcombine.high %v517_v9, %v521_v10  ;;  %v333_v16 = vld [vmem:[#allocation3 + $0x618] sm:$0xff]  ;;  %v6166_v28 = vcombine.low %v517_v9, %v521_v10 }
 0x1c3   :  { %3086 = vmatpush2.bf16.msra.mxu0 %v6038_v25  ;;  %3116 = vmatprep.subr.bf16.mxu1 %v6079_v54  ;;  %v337_v18 = vld [vmem:[#allocation3 + $0x638] sm:$0xff]  ;;  %v542_v25 = vsub.s32 2, %v7345_v52 }
 0x1c4   :  { %3087 = vmatprep.subr.bf16.mxu0 %v6031_v17  ;;  %v509_v19 = vld [vmem:[#allocation3 + $0xb98] sm:$0xff]  ;;  %v5983_v23 = vcombine.high %v333_v16, %v337_v18  ;;  %v5982_v27 = vcombine.low %v333_v16, %v337_v18 }
 0x1c5   :  { %v513_v21 = vld [vmem:[#allocation3 + $0xbb8] sm:$0xff]  ;;  %v543_v31 = vrot.slane %v7350_v1, %v542_v25 }
 0x1c6   :  { %3117 = vmatpush1.bf16.msra.mxu1 %v6078_v36  ;;  %v6159_v26 = vcombine.high %v509_v19, %v513_v21  ;;  %v501_v17 = vld [vmem:[#allocation3 + $0xb58] sm:$0xff]  ;;  %v6158_v30 = vcombine.low %v509_v19, %v513_v21  ;;  %v3201_v36 = vmax.f32 %v7382_v24, %v3193_v60 }
 0x1c7   :  { %3088 = vmatpush2.bf16.msra.mxu0 %v6030_v32  ;;  %3118 = vmatprep.subr.bf16.mxu1 %v6071_v58  ;;  %v505_v54 = vld [vmem:[#allocation3 + $0xb78] sm:$0xff]  ;;  %v2735_v43 = vadd.f32 %v7384_v35, %v543_v31 }
 0x1c8   :  { %3089 = vmatprep.subr.bf16.mxu0 %v6023_v29  ;;  %v6557_v41 = vld [vmem:[#allocation7 + $0xe4] ss:$16 sps:$4 sm:$0xff]   ;;  %v6151_v32 = vcombine.high %v501_v17, %v505_v54  ;;  %v6555_v37 = vld [vmem:[#allocation7 + $0xe0] ss:$16 sps:$4 sm:$0xff]   ;;  %v6150_v40 = vcombine.low %v501_v17, %v505_v54 }
 0x1c9   :  { %v493_v29 = vld [vmem:[#allocation3 + $0xb18] sm:$0xff] }
 0x1ca   :  { %3119 = vmatpush1.bf16.msra.mxu1 %v6070_v45  ;;  %v497_v58 = vld [vmem:[#allocation3 + $0xb38] sm:$0xff]  ;;  %v7397_v45 = vpack.c.bf16 %v3201_v36, %v3201_v36 }
 0x1cb   :  { %3090 = vmatpush2.bf16.msra.mxu0 %v6022_v44  ;;  %3120 = vmatprep.subr.bf16.mxu1 %v6063_v47  ;;  %v6560_v42 = vld [vmem:[#allocation7 + $0xc4] ss:$16 sps:$4 sm:$0xff]   ;;  %v6143_v44 = vcombine.high %v493_v29, %v497_v58  ;;  %v6558_v49 = vld [vmem:[#allocation7 + $0xc0] ss:$16 sps:$4 sm:$0xff]   ;;  %v6142_v50 = vcombine.low %v493_v29, %v497_v58 }
 0x1cc   :  { %3091 = vmatprep.subr.bf16.mxu0 %v6015_v46  ;;  %v485_v47 = vld [vmem:[#allocation3 + $0xad8] sm:$0xff] }
 0x1cd   :  { %v489_v48 = vld [vmem:[#allocation3 + $0xaf8] sm:$0xff] }
 0x1ce   :  { %3121 = vmatpush1.bf16.msra.mxu1 %v6062_v59  ;;  %v6135_v35 = vcombine.high %v485_v47, %v489_v48  ;;  %v477_v59 = vld [vmem:[#allocation3 + $0xa98] sm:$0xff]  ;;  %v6134_v61 = vcombine.low %v485_v47, %v489_v48 }
 0x1cf   :  { %3092 = vmatpush2.bf16.msra.mxu0 %v6014_v53  ;;  %3122 = vmatprep.subr.bf16.mxu1 %v6055_v56  ;;  %v6563_v53 = vld [vmem:[#allocation7 + $0xa4] ss:$16 sps:$4 sm:$0xff]   ;;  %v6561_v57 = vld [vmem:[#allocation7 + $0xa0] ss:$16 sps:$4 sm:$0xff]  }
 0x1d0   :  { %3093 = vmatprep.subr.bf16.mxu0 %v6007_v55  ;;  %v481_v55 = vld [vmem:[#allocation3 + $0xab8] sm:$0xff] }
 0x1d1   :  { %v6566_v62 = vld [vmem:[#allocation7 + $0x84] ss:$16 sps:$4 sm:$0xff]   ;;  %v6564_v7 = vld [vmem:[#allocation7 + $0x80] ss:$16 sps:$4 sm:$0xff]   ;;  %v6126_v10 = vcombine.low %v477_v59, %v481_v55 }
 0x1d2   :  { %3123 = vmatpush1.bf16.msra.mxu1 %v6054_v3  ;;  %v469_v3 = vld [vmem:[#allocation3 + $0xa58] sm:$0xff] }
 0x1d3   :  { %3094 = vmatpush2.bf16.msra.mxu0 %v6006_v2  ;;  %3124 = vmatprep.subr.bf16.mxu1 %v6047_v6  ;;  %v6127_v2 = vcombine.high %v477_v59, %v481_v55  ;;  %v465_v16 = vld [vmem:[#allocation3 + $0xa38] sm:$0xff] }
 0x1d4   :  { %3095 = vmatprep.subr.bf16.mxu0 %v5999_v5  ;;  %v473_v5 = vld [vmem:[#allocation3 + $0xa78] sm:$0xff] }
 0x1d5   :  { %v6567_v19 = vld [vmem:[#allocation7 + $0x60] ss:$16 sps:$4 sm:$0xff]   ;;  %v6584_v48 = vld [vmem:[#allocation7 + $0x1e4] ss:$16 sps:$4 sm:$0xff]  }
 0x1d6   :  { %3125 = vmatpush1.bf16.msra.mxu1 %v6046_v12  ;;  %v529_v17 = vld [vmem:[#allocation3 + $0xc38] sm:$0xff] }
 0x1d7   :  { %3096 = vmatpush2.bf16.msra.mxu0 %v5998_v11  ;;  %3126 = vmatprep.subr.bf16.mxu1 %v6167_v14  ;;  %v6569_v11 = vld [vmem:[#allocation7 + $0x64] ss:$16 sps:$4 sm:$0xff]   ;;  %v6576_v47 = vld [vmem:[#allocation7] ss:$16 sps:$4 sm:$0xff]  }
 0x1d8   :  { %3097 = vmatprep.subr.bf16.mxu0 %v5991_v13  ;;  %v6119_v13 = vcombine.high %v469_v3, %v473_v5  ;;  %v461_v14 = vld [vmem:[#allocation3 + $0xa18] sm:$0xff] }
 0x1d9   :  { %v6110_v31 = vcombine.low %v461_v14, %v465_v16  ;;  %v6596_v59 = vld [vmem:[#allocation7 + $0x1a4] ss:$16 sps:$4 sm:$0xff]  }
 0x1da   :  { %3127 = vmatpush2.bf16.msra.mxu1 %v6166_v28  ;;  %v6572_v28 = vld [vmem:[#allocation7 + $0x44] ss:$16 sps:$4 sm:$0xff]  }
 0x1db   :  { %3098 = vmatpush2.bf16.msra.mxu0 %v5990_v22  ;;  %3128 = vmatprep.subr.bf16.mxu1 %v6159_v26  ;;  %v6118_v22 = vcombine.low %v469_v3, %v473_v5  ;;  %v525_v26 = vld [vmem:[#allocation3 + $0xc18] sm:$0xff] }
 0x1dc   :  { %3099 = vmatprep.subr.bf16.mxu0 %v5983_v23  ;;  %v6111_v23 = vcombine.high %v461_v14, %v465_v16  ;;  %v6175_v36 = vcombine.high %v525_v26, %v529_v17  ;;  %v6593_v55 = vld [vmem:[#allocation7 + $0x2a4] ss:$16 sps:$4 sm:$0xff]   ;;  %v6606_v5 = vld [vmem:[#allocation7 + $0x160] ss:$16 sps:$4 sm:$0xff]   ;;  %v3192_v14 = vmul.f32 0.2, %v7378_v15 }
 0x1dd   :  { %v6605_v3 = vld [vmem:[#allocation7 + $0x264] ss:$16 sps:$4 sm:$0xff]   ;;  %v6615_v16 = vld [vmem:[#allocation7 + $0x220] ss:$16 sps:$4 sm:$0xff]  }
 0x1de   :  { %3129 = vmatpush2.bf16.msra.mxu1 %v6158_v30 }
 0x1df   :  { %3100 = vmatpush2.bf16.msra.mxu0 %v5982_v27  ;;  %3130 = vmatprep.subr.bf16.mxu1 %v6151_v32  ;;  %v6570_v27 = vld [vmem:[#allocation7 + $0x40] ss:$16 sps:$4 sm:$0xff]  }
 0x1e0   :  { %4774 = vmatprep.subr.bf16.mxu0 %v6557_v41 }
 0x1e2   :  { %v2775_v46 = vpop.f32.mrf.mxu0  ;;  %3102 = vmatmul.mubr.bf16.vlgmr.msra.gmra.mxu0 %v7310_v20  ;;  %3131 = vmatpush2.bf16.msra.mxu1 %v6150_v40  ;;  %v546_v20 = vsub.s32 3, %v7345_v52  ;;  %v6174_v40 = vcombine.low %v525_v26, %v529_v17  ;;  %v6627_v17 = vld [vmem:[#allocation7 + $0x3e0] ss:$16 sps:$4 sm:$0xff]  }
 0x1e3   :  { %v2776_v24 = vadd.f32 %v2775_v46, %v2735_v43  ;;  %4775 = vmatpush1.bf16.msra.mxu0 %v6555_v37  ;;  %4806 = vmatprep.mubr.bf16.mxu0 %v7397_v45  ;;  %v6573_v37 = vld [vmem:[#allocation7 + $0x20] ss:$16 sps:$4 sm:$0xff]   ;;  %v6578_v43 = vld [vmem:[#allocation7 + $0x4] ss:$16 sps:$4 sm:$0xff]  }
 0x1e4   :  { %v2777_v51 = vpop.f32.mrf.mxu0  ;;  %4776 = vmatprep.subr.bf16.mxu0 %v6560_v42  ;;  %3132 = vmatprep.subr.bf16.mxu1 %v6143_v44  ;;  %v547_v8 = vrot.slane %v7350_v1, %v546_v20  ;;  %v6581_v44 = vld [vmem:[#allocation7 + $0x2e4] ss:$16 sps:$4 sm:$0xff]  }
 0x1e6   :  { %v2779_v56 = vpop.f32.mrf.mxu0  ;;  %3133 = vmatpush2.bf16.msra.mxu1 %v6142_v50  ;;  %v2737_v21 = vadd.f32 %v7386_v39, %v547_v8  ;;  %v6575_v39 = vld [vmem:[#allocation7 + $0x24] ss:$16 sps:$4 sm:$0xff]   ;;  %v6579_v50 = vld [vmem:[#allocation7 + $0x2e0] ss:$16 sps:$4 sm:$0xff]  }
 0x1e7   :  { %4777 = vmatpush1.bf16.msra.mxu0 %v6558_v49  ;;  %3134 = vmatprep.subr.bf16.mxu1 %v6135_v35  ;;  %v6582_v49 = vld [vmem:[#allocation7 + $0x1e0] ss:$16 sps:$4 sm:$0xff]   ;;  %v6611_v8 = vld [vmem:[#allocation7 + $0x244] ss:$16 sps:$4 sm:$0xff]  }
 0x1e8   :  { %4778 = vmatprep.subr.bf16.mxu0 %v6563_v53  ;;  %v2780_v0 = vpop.f32.mrf.mxu0  ;;  %v2778_v60 = vadd.f32 %v2777_v51, %v2737_v21  ;;  %v6587_v51 = vld [vmem:[#allocation7 + $0x2c4] ss:$16 sps:$4 sm:$0xff]   ;;  %v6594_v56 = vld [vmem:[#allocation7 + $0x1a0] ss:$16 sps:$4 sm:$0xff]  }
 0x1e9   :  { %v2816_v6 = vpop.f32.mrf.mxu1  ;;  %v6590_v53 = vld [vmem:[#allocation7 + $0x1c4] ss:$16 sps:$4 sm:$0xff]   ;;  %v6597_v0 = vld [vmem:[#allocation7 + $0x280] ss:$16 sps:$4 sm:$0xff]  }
 0x1ea   :  { %3135 = vmatpush2.bf16.msra.mxu1 %v6134_v61  ;;  %v2817_v9 = vadd.f32 %v2816_v6, %v2776_v24  ;;  %v6602_v61 = vld [vmem:[#allocation7 + $0x184] ss:$16 sps:$4 sm:$0xff]   ;;  %v6603_v6 = vld [vmem:[#allocation7 + $0x260] ss:$16 sps:$4 sm:$0xff]  }
 0x1eb   :  { %4779 = vmatpush1.bf16.msra.mxu0 %v6561_v57  ;;  %v2818_v12 = vpop.f32.mrf.mxu1  ;;  %3136 = vmatprep.subr.bf16.mxu1 %v6127_v2  ;;  %v6591_v57 = vld [vmem:[#allocation7 + $0x2a0] ss:$16 sps:$4 sm:$0xff]   ;;  %v6608_v2 = vld [vmem:[#allocation7 + $0x164] ss:$16 sps:$4 sm:$0xff]  }
 0x1ec   :  { %4780 = vmatprep.subr.bf16.mxu0 %v6566_v62  ;;  %v2819_v30 = vadd.f32 %v2818_v12, %v2778_v60  ;;  %v6599_v62 = vld [vmem:[#allocation7 + $0x284] ss:$16 sps:$4 sm:$0xff]   ;;  %v6624_v21 = vld [vmem:[#allocation7 + $0x100] ss:$16 sps:$4 sm:$0xff]  }
 0x1ed   :  { %v2820_v18 = vpop.f32.mrf.mxu1  ;;  %v6617_v12 = vld [vmem:[#allocation7 + $0x224] ss:$16 sps:$4 sm:$0xff]   ;;  %v6642_v60 = vld [vmem:[#allocation7 + $0x4e0] ss:$16 sps:$4 sm:$0xff]  }
 0x1ee   :  { %3137 = vmatpush2.bf16.msra.mxu1 %v6126_v10  ;;  %v6609_v10 = vld [vmem:[#allocation7 + $0x240] ss:$16 sps:$4 sm:$0xff]   ;;  %v6626_v18 = vld [vmem:[#allocation7 + $0x104] ss:$16 sps:$4 sm:$0xff]  }
 0x1ef   :  { %4781 = vmatpush1.bf16.msra.mxu0 %v6564_v7  ;;  %v2821_v1 = vpop.f32.mrf.mxu1  ;;  %3138 = vmatprep.subr.bf16.mxu1 %v6119_v13  ;;  %v6614_v7 = vld [vmem:[#allocation7 + $0x144] ss:$16 sps:$4 sm:$0xff]   ;;  %v6618_v13 = vld [vmem:[#allocation7 + $0x120] ss:$16 sps:$4 sm:$0xff]  }
 0x1f0   :  { %4782 = vmatprep.subr.bf16.mxu0 %v6569_v11  ;;  %v6620_v11 = vld [vmem:[#allocation7 + $0x124] ss:$16 sps:$4 sm:$0xff]  }
 0x1f1   :  { %v2857_v54 = vpop.f32.mrf.mxu1  ;;  %v6644_v1 = vld [vmem:[#allocation7 + $0x4e4] ss:$16 sps:$4 sm:$0xff]  }
 0x1f2   :  { %3139 = vmatpush2.bf16.msra.mxu1 %v6118_v22  ;;  %v7406_v41 = vadd.f32 %v2857_v54, %v2817_v9  ;;  %v6612_v9 = vld [vmem:[#allocation7 + $0x140] ss:$16 sps:$4 sm:$0xff]   ;;  %v3200_v22 = vmax.f32 %v7378_v15, %v3192_v14  ;;  %v6650_v54 = vld [vmem:[#allocation7 + $0x4c4] ss:$16 sps:$4 sm:$0xff]  }
 0x1f3   :  { %4783 = vmatpush1.bf16.msra.mxu0 %v6567_v19  ;;  %v2859_v32 = vpop.f32.mrf.mxu1  ;;  %3140 = vmatprep.subr.bf16.mxu1 %v6111_v23  ;;  %v6623_v19 = vld [vmem:[#allocation7 + $0x204] ss:$16 sps:$4 sm:$0xff]   ;;  %v6648_v15 = vld [vmem:[#allocation7 + $0x4c0] ss:$16 sps:$4 sm:$0xff]  }
 0x1f4   :  { %4784 = vmatprep.subr.bf16.mxu0 %v6572_v28  ;;  %v2860_v29 = vadd.f32 %v2859_v32, %v2819_v30  ;;  %v6621_v28 = vld [vmem:[#allocation7 + $0x200] ss:$16 sps:$4 sm:$0xff]   ;;  %v6629_v23 = vld [vmem:[#allocation7 + $0x3e4] ss:$16 sps:$4 sm:$0xff]   ;;  %v7417_v26 = vpack.c.bf16 %v3200_v22, %v3200_v22 }
 0x1f5   :  { %v2861_v58 = vpop.f32.mrf.mxu1  ;;  %v6656_v32 = vld [vmem:[#allocation7 + $0x4a4] ss:$16 sps:$4 sm:$0xff]  }
 0x1f6   :  { %3141 = vmatpush2.bf16.msra.mxu1 %v6110_v31  ;;  %v3195_v46 = vmul.f32 0.2, %v2860_v29  ;;  %v6630_v31 = vld [vmem:[#allocation7 + $0x3c0] ss:$16 sps:$4 sm:$0xff]   ;;  %v6680_v14 = vld [vmem:[#allocation7 + $0x5c4] ss:$16 sps:$4 sm:$0xff]  }
 0x1f7   :  { %4785 = vmatpush1.bf16.msra.mxu0 %v6570_v27  ;;  %v2862_v42 = vpop.f32.mrf.mxu1  ;;  %3165 = vmatprep.subr.bf16.mxu1 %v6175_v36  ;;  %v6632_v27 = vld [vmem:[#allocation7 + $0x3c4] ss:$16 sps:$4 sm:$0xff]   ;;  %v6654_v58 = vld [vmem:[#allocation7 + $0x4a0] ss:$16 sps:$4 sm:$0xff]  }
 0x1f8   :  { %4786 = vmatprep.subr.bf16.mxu0 %v6575_v39  ;;  %v3203_v24 = vmax.f32 %v2860_v29, %v3195_v46  ;;  %v6635_v36 = vld [vmem:[#allocation7 + $0x3a4] ss:$16 sps:$4 sm:$0xff]   ;;  %v6636_v46 = vld [vmem:[#allocation7 + $0x380] ss:$16 sps:$4 sm:$0xff]  }
 0x1f9   :  { %3143 = vmatmul.mubr.bf16.vlgmr.msra.gmra.mxu1 %v7332_v33  ;;  %v6588_v33 = vld [vmem:[#allocation7 + $0x1c0] ss:$16 sps:$4 sm:$0xff]   ;;  %v6683_v22 = vld [vmem:[#allocation7 + $0x5a4] ss:$16 sps:$4 sm:$0xff]  }
 0x1fa   :  { %3166 = vmatpush1.bf16.msra.mxu1 %v6174_v40  ;;  %3183 = vmatprep.mubr.bf16.mxu1 %v7215_v34  ;;  %v7410_v35 = vpack.c.bf16 %v3203_v24, %v3203_v24  ;;  %v6585_v34 = vld [vmem:[#allocation7 + $0x2c0] ss:$16 sps:$4 sm:$0xff]   ;;  %v6662_v40 = vld [vmem:[#allocation7 + $0x484] ss:$16 sps:$4 sm:$0xff]  }
 0x1fb   :  { %4787 = vmatpush1.bf16.msra.mxu0 %v6573_v37  ;;  %4815 = vmatprep.subr.bf16.mxu1 %v6581_v44  ;;  %v6633_v37 = vld [vmem:[#allocation7 + $0x3a0] ss:$16 sps:$4 sm:$0xff]  }
 0x1fc   :  { %4788 = vmatprep.subr.bf16.mxu0 %v6578_v43  ;;  %v6638_v43 = vld [vmem:[#allocation7 + $0x384] ss:$16 sps:$4 sm:$0xff]   ;;  %v6660_v44 = vld [vmem:[#allocation7 + $0x480] ss:$16 sps:$4 sm:$0xff]  }
 0x1fd   :  { %v6663_v24 = vld [vmem:[#allocation7 + $0x460] ss:$16 sps:$4 sm:$0xff]  }
 0x1ff   :  { %4789 = vmatpush1.bf16.msra.mxu0 %v6576_v47  ;;  %v6665_v47 = vld [vmem:[#allocation7 + $0x464] ss:$16 sps:$4 sm:$0xff]  }
 0x200   :  { %4790 = vmatprep.subr.bf16.mxu0 %v6584_v48  ;;  %v6641_v48 = vld [vmem:[#allocation7 + $0x364] ss:$16 sps:$4 sm:$0xff]  }
 0x201   :  { %6179 = vmatmul.mubr.msk.bf16.vlgmr.msra.gmra.mxu1 %vm2532_vm0, %v7324_v38  ;;  %v6600_v38 = vld [vmem:[#allocation7 + $0x180] ss:$16 sps:$4 sm:$0xff]  }
 0x202   :  { %4816 = vmatpush1.bf16.msra.mxu1 %v6579_v50  ;;  %4847 = vmatprep.mubr.bf16.mxu1 %v7410_v35  ;;  %v6668_v50 = vld [vmem:[#allocation7 + $0x444] ss:$16 sps:$4 sm:$0xff]  }
 0x203   :  { %4791 = vmatpush2.bf16.msra.mxu0 %v6582_v49  ;;  %4817 = vmatprep.subr.bf16.mxu1 %v6587_v51  ;;  %v6639_v49 = vld [vmem:[#allocation7 + $0x360] ss:$16 sps:$4 sm:$0xff]   ;;  %v6647_v51 = vld [vmem:[#allocation7 + $0x344] ss:$16 sps:$4 sm:$0xff]  }
 0x204   :  { %4792 = vmatprep.subr.bf16.mxu0 %v6590_v53 }
 0x206   :  { %4818 = vmatpush1.bf16.msra.mxu1 %v6585_v34  ;;  %v6645_v34 = vld [vmem:[#allocation7 + $0x340] ss:$16 sps:$4 sm:$0xff]  }
 0x207   :  { %4793 = vmatpush2.bf16.msra.mxu0 %v6588_v33  ;;  %4819 = vmatprep.subr.bf16.mxu1 %v6593_v55  ;;  %v6666_v33 = vld [vmem:[#allocation7 + $0x440] ss:$16 sps:$4 sm:$0xff]  }
 0x208   :  { %4794 = vmatprep.subr.bf16.mxu0 %v6596_v59  ;;  %v6671_v59 = vld [vmem:[#allocation7 + $0x424] ss:$16 sps:$4 sm:$0xff]  }
 0x20a   :  { %4820 = vmatpush1.bf16.msra.mxu1 %v6591_v57 }
 0x20b   :  { %4795 = vmatpush2.bf16.msra.mxu0 %v6594_v56  ;;  %4821 = vmatprep.subr.bf16.mxu1 %v6599_v62  ;;  %v6653_v56 = vld [vmem:[#allocation7 + $0x324] ss:$16 sps:$4 sm:$0xff]   ;;  %v6651_v62 = vld [vmem:[#allocation7 + $0x320] ss:$16 sps:$4 sm:$0xff]  }
 0x20c   :  { %4796 = vmatprep.subr.bf16.mxu0 %v6602_v61  ;;  %v6669_v61 = vld [vmem:[#allocation7 + $0x420] ss:$16 sps:$4 sm:$0xff]  }
 0x20e   :  { %4822 = vmatpush1.bf16.msra.mxu1 %v6597_v0  ;;  %v3194_v0 = vmul.f32 0.2, %v7406_v41 }
 0x20f   :  { %4797 = vmatpush2.bf16.msra.mxu0 %v6600_v38  ;;  %4823 = vmatprep.subr.bf16.mxu1 %v6605_v3  ;;  %v6674_v38 = vld [vmem:[#allocation7 + $0x404] ss:$16 sps:$4 sm:$0xff]  }
 0x210   :  { %4798 = vmatprep.subr.bf16.mxu0 %v6608_v2  ;;  %v6659_v3 = vld [vmem:[#allocation7 + $0x304] ss:$16 sps:$4 sm:$0xff]  }
 0x212   :  { %4824 = vmatpush1.bf16.msra.mxu1 %v6603_v6  ;;  %v6672_v6 = vld [vmem:[#allocation7 + $0x400] ss:$16 sps:$4 sm:$0xff]  }
 0x213   :  { %4799 = vmatpush2.bf16.msra.mxu0 %v6606_v5  ;;  %4825 = vmatprep.subr.bf16.mxu1 %v6611_v8  ;;  %v6677_v8 = vld [vmem:[#allocation7 + $0x5e4] ss:$16 sps:$4 sm:$0xff]  }
 0x214   :  { %4800 = vmatprep.subr.bf16.mxu0 %v6614_v7  ;;  %v6657_v7 = vld [vmem:[#allocation7 + $0x300] ss:$16 sps:$4 sm:$0xff]  }
 0x216   :  { %4826 = vmatpush1.bf16.msra.mxu1 %v6609_v10 }
 0x217   :  { %4801 = vmatpush2.bf16.msra.mxu0 %v6612_v9  ;;  %4827 = vmatprep.subr.bf16.mxu1 %v6617_v12  ;;  %v3202_v9 = vmax.f32 %v7406_v41, %v3194_v0  ;;  %v6678_v41 = vld [vmem:[#allocation7 + $0x5c0] ss:$16 sps:$4 sm:$0xff]  }
 0x218   :  { %4802 = vmatprep.subr.bf16.mxu0 %v6620_v11  ;;  %v6722_v11 = vld [vmem:[#allocation7 + $0x6e4] ss:$16 sps:$4 sm:$0xff]   ;;  %v6768_v0 = vld [vmem:[#allocation7 + $0x7e0] ss:$16 sps:$4 sm:$0xff]  }
 0x21a   :  { %4828 = vmatpush1.bf16.msra.mxu1 %v6615_v16  ;;  %v6720_v16 = vld [vmem:[#allocation7 + $0x6e0] ss:$16 sps:$4 sm:$0xff]  }
 0x21b   :  { %4803 = vmatpush2.bf16.msra.mxu0 %v6618_v13  ;;  %4829 = vmatprep.subr.bf16.mxu1 %v6623_v19  ;;  %v6675_v13 = vld [vmem:[#allocation7 + $0x5e0] ss:$16 sps:$4 sm:$0xff]  }
 0x21c   :  { %4804 = vmatprep.subr.bf16.mxu0 %v6626_v18  ;;  %v7434_v18 = vpack.c.bf16 %v3202_v9, %v3202_v9 }
 0x21e   :  { %4830 = vmatpush1.bf16.msra.mxu1 %v6621_v28  ;;  %v6726_v28 = vld [vmem:[#allocation7 + $0x6c0] ss:$16 sps:$4 sm:$0xff]  }
 0x21f   :  { %4805 = vmatpush2.bf16.msra.mxu0 %v6624_v21  ;;  %4831 = vmatprep.subr.bf16.mxu1 %v6629_v23  ;;  %v6728_v21 = vld [vmem:[#allocation7 + $0x6c4] ss:$16 sps:$4 sm:$0xff]   ;;  %v6681_v23 = vld [vmem:[#allocation7 + $0x5a0] ss:$16 sps:$4 sm:$0xff]  }
 0x220   :  { %4856 = vmatprep.subr.bf16.mxu0 %v6644_v1  ;;  %v6734_v1 = vld [vmem:[#allocation7 + $0x6a4] ss:$16 sps:$4 sm:$0xff]  }
 0x222   :  { %4807 = vmatmul.mubr.bf16.vlgmr.msra.gmra.mxu0 %v7417_v26  ;;  %v7420_v30 = vpop.f32.mrf.mxu0  ;;  %4832 = vmatpush2.bf16.msra.mxu1 %v6627_v17  ;;  %v6732_v17 = vld [vmem:[#allocation7 + $0x6a0] ss:$16 sps:$4 sm:$0xff]  }
 0x223   :  { %4857 = vmatpush1.bf16.msra.mxu0 %v6642_v60  ;;  %4833 = vmatprep.subr.bf16.mxu1 %v6632_v27  ;;  %v6686_v60 = vld [vmem:[#allocation7 + $0x584] ss:$16 sps:$4 sm:$0xff]   ;;  %v6684_v27 = vld [vmem:[#allocation7 + $0x580] ss:$16 sps:$4 sm:$0xff]  }
 0x224   :  { %v7422_v39 = vpop.f32.mrf.mxu0  ;;  %4858 = vmatprep.subr.bf16.mxu0 %v6650_v54  ;;  %v6740_v54 = vld [vmem:[#allocation7 + $0x684] ss:$16 sps:$4 sm:$0xff]  }
 0x226   :  { %v2902_v29 = vpop.f32.mrf.mxu0  ;;  %4834 = vmatpush2.bf16.msra.mxu1 %v6630_v31  ;;  %v6738_v31 = vld [vmem:[#allocation7 + $0x680] ss:$16 sps:$4 sm:$0xff]  }
 0x227   :  { %4859 = vmatpush1.bf16.msra.mxu0 %v6648_v15  ;;  %4835 = vmatprep.subr.bf16.mxu1 %v6635_v36  ;;  %v6689_v15 = vld [vmem:[#allocation7 + $0x564] ss:$16 sps:$4 sm:$0xff]   ;;  %v6687_v36 = vld [vmem:[#allocation7 + $0x560] ss:$16 sps:$4 sm:$0xff]  }
 0x228   :  { %4860 = vmatprep.subr.bf16.mxu0 %v6656_v32  ;;  %v2903_v42 = vpop.f32.mrf.mxu0  ;;  %v6746_v32 = vld [vmem:[#allocation7 + $0x664] ss:$16 sps:$4 sm:$0xff]  }
 0x229   :  { %v6692_v29 = vld [vmem:[#allocation7 + $0x544] ss:$16 sps:$4 sm:$0xff]  }
 0x22a   :  { %4836 = vmatpush2.bf16.msra.mxu1 %v6633_v37  ;;  %v6752_v37 = vld [vmem:[#allocation7 + $0x644] ss:$16 sps:$4 sm:$0xff]  }
 0x22b   :  { %4861 = vmatpush1.bf16.msra.mxu0 %v6654_v58  ;;  %4837 = vmatprep.subr.bf16.mxu1 %v6638_v43  ;;  %v6744_v58 = vld [vmem:[#allocation7 + $0x660] ss:$16 sps:$4 sm:$0xff]   ;;  %v6695_v42 = vld [vmem:[#allocation7 + $0x524] ss:$16 sps:$4 sm:$0xff]  }
 0x22c   :  { %4862 = vmatprep.subr.bf16.mxu0 %v6662_v40  ;;  %v6690_v40 = vld [vmem:[#allocation7 + $0x540] ss:$16 sps:$4 sm:$0xff]  }
 0x22d   :  { %v6750_v43 = vld [vmem:[#allocation7 + $0x640] ss:$16 sps:$4 sm:$0xff]  }
 0x22e   :  { %4838 = vmatpush2.bf16.msra.mxu1 %v6636_v46  ;;  %v6758_v46 = vld [vmem:[#allocation7 + $0x624] ss:$16 sps:$4 sm:$0xff]  }
 0x22f   :  { %4863 = vmatpush1.bf16.msra.mxu0 %v6660_v44  ;;  %4839 = vmatprep.subr.bf16.mxu1 %v6641_v48  ;;  %v550_v44 = vsub.s32 4, %v7345_v52  ;;  %v6693_v48 = vld [vmem:[#allocation7 + $0x520] ss:$16 sps:$4 sm:$0xff]  }
 0x230   :  { %4864 = vmatprep.subr.bf16.mxu0 %v6665_v47  ;;  %v554_v47 = vsub.s32 5, %v7345_v52 }
 0x231   :  { %v7424_v53 = vpop.f32.mrf.mxu1 }
 0x232   :  { %4840 = vmatpush2.bf16.msra.mxu1 %v6639_v49  ;;  %v6756_v49 = vld [vmem:[#allocation7 + $0x620] ss:$16 sps:$4 sm:$0xff]  }
 0x233   :  { %4865 = vmatpush1.bf16.msra.mxu0 %v6663_v24  ;;  %v7426_v55 = vpop.f32.mrf.mxu1  ;;  %4841 = vmatprep.subr.bf16.mxu1 %v6647_v51  ;;  %v6698_v24 = vld [vmem:[#allocation7 + $0x504] ss:$16 sps:$4 sm:$0xff]  }
 0x234   :  { %4866 = vmatprep.subr.bf16.mxu0 %v6668_v50  ;;  %v7439_v50 = vld [vmem:[#allocation5] sm:$0xff] }
 0x235   :  { %v2943_v57 = vpop.f32.mrf.mxu1  ;;  %v551_v51 = vrot.slane %v7439_v50, %v550_v44 }
 0x236   :  { %4842 = vmatpush2.bf16.msra.mxu1 %v6645_v34  ;;  %v555_v34 = vrot.slane %v7439_v50, %v554_v47  ;;  %v6762_v57 = vld [vmem:[#allocation7 + $0x600] ss:$16 sps:$4 sm:$0xff]   ;;  %v6818_v47 = vld [vmem:[#allocation7 + $0x2ec] ss:$16 sps:$4 sm:$0xff]  }
 0x237   :  { %4867 = vmatpush1.bf16.msra.mxu0 %v6666_v33  ;;  %v2944_v2 = vpop.f32.mrf.mxu1  ;;  %4843 = vmatprep.subr.bf16.mxu1 %v6653_v56  ;;  %v6764_v33 = vld [vmem:[#allocation7 + $0x604] ss:$16 sps:$4 sm:$0xff]   ;;  %v6701_v56 = vld [vmem:[#allocation7 + $0xec] ss:$16 sps:$4 sm:$0xff]  }
 0x238   :  { %4868 = vmatprep.subr.bf16.mxu0 %v6671_v59  ;;  %v6696_v59 = vld [vmem:[#allocation7 + $0x500] ss:$16 sps:$4 sm:$0xff]  }
 0x239   :  { %v7429_v5 = vpop.f32.mrf.mxu1 }
 0x23a   :  { %4844 = vmatpush2.bf16.msra.mxu1 %v6651_v62  ;;  %v6770_v62 = vld [vmem:[#allocation7 + $0x7e4] ss:$16 sps:$4 sm:$0xff]  }
 0x23b   :  { %4869 = vmatpush1.bf16.msra.mxu0 %v6669_v61  ;;  %v7432_v10 = vpop.f32.mrf.mxu1  ;;  %4845 = vmatprep.subr.bf16.mxu1 %v6659_v3  ;;  %v2899_v61 = vadd.f32 %v7420_v30, %v551_v51  ;;  %v6776_v3 = vld [vmem:[#allocation7 + $0x7c4] ss:$16 sps:$4 sm:$0xff]   ;;  %v6714_v51 = vld [vmem:[#allocation7 + $0x48] ss:$16 sps:$4 sm:$0xff]  }
 0x23c   :  { %4870 = vmatprep.subr.bf16.mxu0 %v6674_v38  ;;  %v2901_v38 = vadd.f32 %v7422_v39, %v555_v34  ;;  %v6782_v39 = vld [vmem:[#allocation7 + $0x7a4] ss:$16 sps:$4 sm:$0xff]   ;;  %v6717_v34 = vld [vmem:[#allocation7 + $0x28] ss:$16 sps:$4 sm:$0xff]  }
 0x23d   :  { %v3025_v12 = vpop.f32.mrf.mxu1  ;;  %v2940_v2 = vadd.f32 %v7424_v53, %v2899_v61  ;;  %v6780_v53 = vld [vmem:[#allocation7 + $0x7a0] ss:$16 sps:$4 sm:$0xff]   ;;  %v6729_v61 = vld [vmem:[#allocation7 + $0x1e8] ss:$16 sps:$4 sm:$0xff]  }
 0x23e   :  { %4846 = vmatpush2.bf16.msra.mxu1 %v6657_v7  ;;  %v2942_v7 = vadd.f32 %v7426_v55, %v2901_v38  ;;  %v6735_v38 = vld [vmem:[#allocation7 + $0x1c8] ss:$16 sps:$4 sm:$0xff]  }
 0x23f   :  { %4871 = vmatpush1.bf16.msra.mxu0 %v6672_v6  ;;  %v3026_v19 = vpop.f32.mrf.mxu1  ;;  %4897 = vmatprep.subr.bf16.mxu1 %v6722_v11  ;;  %v6774_v11 = vld [vmem:[#allocation7 + $0x7c0] ss:$16 sps:$4 sm:$0xff]  }
 0x240   :  { %4872 = vmatprep.subr.bf16.mxu0 %v6677_v8 }
 0x241   :  { %4848 = vmatmul.mubr.bf16.vlgmr.msra.gmra.mxu1 %v7434_v18 }
 0x242   :  { %4898 = vmatpush1.bf16.msra.mxu1 %v6720_v16 }
 0x243   :  { %4873 = vmatpush2.bf16.msra.mxu0 %v6675_v13  ;;  %4899 = vmatprep.subr.bf16.mxu1 %v6728_v21 }
 0x244   :  { %4874 = vmatprep.subr.bf16.mxu0 %v6680_v14 }
 0x246   :  { %4900 = vmatpush1.bf16.msra.mxu1 %v6726_v28  ;;  %v6786_v28 = vld [vmem:[#allocation7 + $0x780] ss:$16 sps:$4 sm:$0xff]  }
 0x247   :  { %4875 = vmatpush2.bf16.msra.mxu0 %v6678_v41  ;;  %4901 = vmatprep.subr.bf16.mxu1 %v6734_v1  ;;  %v6788_v41 = vld [vmem:[#allocation7 + $0x784] ss:$16 sps:$4 sm:$0xff]  }
 0x248   :  { %4876 = vmatprep.subr.bf16.mxu0 %v6683_v22 }
 0x24a   :  { %4902 = vmatpush1.bf16.msra.mxu1 %v6732_v17  ;;  %v6794_v17 = vld [vmem:[#allocation7 + $0x764] ss:$16 sps:$4 sm:$0xff]  }
 0x24b   :  { %4877 = vmatpush2.bf16.msra.mxu0 %v6681_v23  ;;  %4903 = vmatprep.subr.bf16.mxu1 %v6740_v54  ;;  %v6702_v54 = vld [vmem:[#allocation7 + $0xc8] ss:$16 sps:$4 sm:$0xff]  }
 0x24c   :  { %4878 = vmatprep.subr.bf16.mxu0 %v6686_v60  ;;  %v6704_v60 = vld [vmem:[#allocation7 + $0xcc] ss:$16 sps:$4 sm:$0xff]  }
 0x24e   :  { %4904 = vmatpush1.bf16.msra.mxu1 %v6738_v31  ;;  %v6798_v31 = vld [vmem:[#allocation7 + $0x740] ss:$16 sps:$4 sm:$0xff]  }
 0x24f   :  { %4879 = vmatpush2.bf16.msra.mxu0 %v6684_v27  ;;  %4905 = vmatprep.subr.bf16.mxu1 %v6746_v32  ;;  %v6800_v27 = vld [vmem:[#allocation7 + $0x744] ss:$16 sps:$4 sm:$0xff]   ;;  %v6705_v32 = vld [vmem:[#allocation7 + $0xa8] ss:$16 sps:$4 sm:$0xff]  }
 0x250   :  { %4880 = vmatprep.subr.bf16.mxu0 %v6689_v15  ;;  %v6707_v15 = vld [vmem:[#allocation7 + $0xac] ss:$16 sps:$4 sm:$0xff]  }
 0x252   :  { %4906 = vmatpush1.bf16.msra.mxu1 %v6744_v58  ;;  %v6804_v58 = vld [vmem:[#allocation7 + $0x720] ss:$16 sps:$4 sm:$0xff]  }
 0x253   :  { %4881 = vmatpush2.bf16.msra.mxu0 %v6687_v36  ;;  %4907 = vmatprep.subr.bf16.mxu1 %v6752_v37  ;;  %v6806_v36 = vld [vmem:[#allocation7 + $0x724] ss:$16 sps:$4 sm:$0xff]   ;;  %v6708_v37 = vld [vmem:[#allocation7 + $0x88] ss:$16 sps:$4 sm:$0xff]  }
 0x254   :  { %4882 = vmatprep.subr.bf16.mxu0 %v6692_v29  ;;  %v6710_v29 = vld [vmem:[#allocation7 + $0x8c] ss:$16 sps:$4 sm:$0xff]  }
 0x256   :  { %4908 = vmatpush1.bf16.msra.mxu1 %v6750_v43  ;;  %v6810_v43 = vld [vmem:[#allocation7 + $0x700] ss:$16 sps:$4 sm:$0xff]  }
 0x257   :  { %4883 = vmatpush2.bf16.msra.mxu0 %v6690_v40  ;;  %4909 = vmatprep.subr.bf16.mxu1 %v6758_v46  ;;  %v6812_v40 = vld [vmem:[#allocation7 + $0x704] ss:$16 sps:$4 sm:$0xff]   ;;  %v6711_v46 = vld [vmem:[#allocation7 + $0x68] ss:$16 sps:$4 sm:$0xff]  }
 0x258   :  { %4884 = vmatprep.subr.bf16.mxu0 %v6695_v42 }
 0x25a   :  { %4910 = vmatpush1.bf16.msra.mxu1 %v6756_v49 }
 0x25b   :  { %4885 = vmatpush2.bf16.msra.mxu0 %v6693_v48  ;;  %4911 = vmatprep.subr.bf16.mxu1 %v6764_v33  ;;  %v6716_v48 = vld [vmem:[#allocation7 + $0x4c] ss:$16 sps:$4 sm:$0xff]  }
 0x25c   :  { %4886 = vmatprep.subr.bf16.mxu0 %v6698_v24  ;;  %v6719_v33 = vld [vmem:[#allocation7 + $0x2c] ss:$16 sps:$4 sm:$0xff]  }
 0x25e   :  { %4912 = vmatpush1.bf16.msra.mxu1 %v6762_v57  ;;  %v6731_v57 = vld [vmem:[#allocation7 + $0x1ec] ss:$16 sps:$4 sm:$0xff]  }
 0x25f   :  { %4887 = vmatpush2.bf16.msra.mxu0 %v6696_v59  ;;  %4913 = vmatprep.subr.bf16.mxu1 %v6770_v62  ;;  %v6725_v59 = vld [vmem:[#allocation7 + $0xc] ss:$16 sps:$4 sm:$0xff]  }
 0x260   :  { %4938 = vmatprep.subr.bf16.mxu0 %v6701_v56  ;;  %v6723_v56 = vld [vmem:[#allocation7 + $0x8] ss:$16 sps:$4 sm:$0xff]   ;;  %v6737_v62 = vld [vmem:[#allocation7 + $0x1cc] ss:$16 sps:$4 sm:$0xff]  }
 0x262   :  { %v2980_v6 = vpop.f32.mrf.mxu0  ;;  %4914 = vmatpush2.bf16.msra.mxu1 %v6768_v0  ;;  %v6743_v0 = vld [vmem:[#allocation7 + $0x1ac] ss:$16 sps:$4 sm:$0xff]  }
 0x263   :  { %v2981_v8 = vadd.f32 %v2980_v6, %v2940_v2  ;;  %4915 = vmatprep.subr.bf16.mxu1 %v6776_v3  ;;  %v6741_v2 = vld [vmem:[#allocation7 + $0x1a8] ss:$16 sps:$4 sm:$0xff]   ;;  %v6749_v3 = vld [vmem:[#allocation7 + $0x18c] ss:$16 sps:$4 sm:$0xff]  }
 0x264   :  { %v2982_v9 = vpop.f32.mrf.mxu0  ;;  %v6747_v6 = vld [vmem:[#allocation7 + $0x188] ss:$16 sps:$4 sm:$0xff]  }
 0x265   :  { %v3022_v30 = vadd.f32 %v7429_v5, %v2981_v8  ;;  %v2983_v12 = vadd.f32 %v2982_v9, %v2942_v7  ;;  %v6699_v5 = vld [vmem:[#allocation7 + $0xe8] ss:$16 sps:$4 sm:$0xff]   ;;  %v6755_v7 = vld [vmem:[#allocation7 + $0x16c] ss:$16 sps:$4 sm:$0xff]  }
 0x266   :  { %v2984_v13 = vpop.f32.mrf.mxu0  ;;  %4916 = vmatpush2.bf16.msra.mxu1 %v6774_v11  ;;  %v6753_v8 = vld [vmem:[#allocation7 + $0x168] ss:$16 sps:$4 sm:$0xff]   ;;  %v6761_v9 = vld [vmem:[#allocation7 + $0x14c] ss:$16 sps:$4 sm:$0xff]  }
 0x267   :  { %v3196_v14 = vmul.f32 0.2, %v3022_v30  ;;  %v3024_v16 = vadd.f32 %v7432_v10, %v2983_v12  ;;  %4917 = vmatprep.subr.bf16.mxu1 %v6782_v39  ;;  %v6792_v10 = vld [vmem:[#allocation7 + $0x760] ss:$16 sps:$4 sm:$0xff]   ;;  %v6759_v11 = vld [vmem:[#allocation7 + $0x148] ss:$16 sps:$4 sm:$0xff]  }
 0x268   :  { %v2985_v19 = vpop.f32.mrf.mxu0  ;;  %v6767_v12 = vld [vmem:[#allocation7 + $0x12c] ss:$16 sps:$4 sm:$0xff]   ;;  %v6765_v13 = vld [vmem:[#allocation7 + $0x128] ss:$16 sps:$4 sm:$0xff]  }
 0x269   :  { %v3197_v21 = vmul.f32 0.2, %v3024_v16  ;;  %v3204_v55 = vmax.f32 %v3022_v30, %v3196_v14  ;;  %v6773_v14 = vld [vmem:[#allocation7 + $0x10c] ss:$16 sps:$4 sm:$0xff]  }
 0x26a   :  { %4918 = vmatpush2.bf16.msra.mxu1 %v6780_v53  ;;  %v6771_v53 = vld [vmem:[#allocation7 + $0x108] ss:$16 sps:$4 sm:$0xff]  }
 0x26b   :  { %v3205_v22 = vmax.f32 %v3024_v16, %v3197_v21  ;;  %4919 = vmatprep.subr.bf16.mxu1 %v6788_v41  ;;  %v7451_v23 = vpack.c.bf16 %v3204_v55, %v3204_v55  ;;  %v6779_v21 = vld [vmem:[#allocation7 + $0x4ec] ss:$16 sps:$4 sm:$0xff]   ;;  %v6777_v41 = vld [vmem:[#allocation7 + $0x4e8] ss:$16 sps:$4 sm:$0xff]  }
 0x26c   :  { %v6785_v55 = vld [vmem:[#allocation7 + $0x4cc] ss:$16 sps:$4 sm:$0xff]  }
 0x26d   :  { %v7449_v1 = vpack.c.bf16 %v3205_v22, %v3205_v22  ;;  %v6783_v22 = vld [vmem:[#allocation7 + $0x4c8] ss:$16 sps:$4 sm:$0xff]  }
 0x26e   :  { %4920 = vmatpush2.bf16.msra.mxu1 %v6786_v28  ;;  %v6791_v28 = vld [vmem:[#allocation7 + $0x4ac] ss:$16 sps:$4 sm:$0xff]  }
 0x26f   :  { %4888 = vmatprep.mubr.bf16.mxu0 %v7449_v1  ;;  %4921 = vmatprep.subr.bf16.mxu1 %v6794_v17  ;;  %v6797_v17 = vld [vmem:[#allocation7 + $0x48c] ss:$16 sps:$4 sm:$0xff]  }
 0x270   :  { %4889 = vmatmul.mubr.bf16.vlgmr.msra.gmra.mxu0 %v7451_v23 }
 0x271   :  { %4939 = vmatpush1.bf16.msra.mxu0 %v6699_v5  ;;  %4970 = vmatprep.mubr.bf16.mxu0 %v7397_v45  ;;  %v6713_v45 = vld [vmem:[#allocation7 + $0x6c] ss:$16 sps:$4 sm:$0xff]   ;;  %v6789_v5 = vld [vmem:[#allocation7 + $0x4a8] ss:$16 sps:$4 sm:$0xff]  }
 0x272   :  { %4940 = vmatprep.subr.bf16.mxu0 %v6704_v60  ;;  %4922 = vmatpush2.bf16.msra.mxu1 %v6792_v10  ;;  %v558_v60 = vsub.s32 6, %v7345_v52  ;;  %v562_v10 = vsub.s32 7, %v7345_v52  ;;  %v7039_v52 = vld [vmem:[#allocation13 + $0x68] sm:$0xff]  }
 0x273   :  { %4923 = vmatprep.subr.bf16.mxu1 %v6800_v27 }
 0x274   :  { %v559_v27 = vrot.slane %v7439_v50, %v558_v60  ;;  %v6846_v60 = vld [vmem:[#allocation7 + $0x248] ss:$16 sps:$4 sm:$0xff]  }
 0x275   :  { %4941 = vmatpush1.bf16.msra.mxu0 %v6702_v54  ;;  %v6795_v54 = vld [vmem:[#allocation7 + $0x488] ss:$16 sps:$4 sm:$0xff]  }
 0x276   :  { %4942 = vmatprep.subr.bf16.mxu0 %v6707_v15  ;;  %4924 = vmatpush2.bf16.msra.mxu1 %v6798_v31 }
 0x277   :  { %4925 = vmatprep.subr.bf16.mxu1 %v6806_v36 }
 0x279   :  { %4943 = vmatpush1.bf16.msra.mxu0 %v6705_v32  ;;  %v7456_v42 = vpop.f32.mrf.mxu1  ;;  %v6801_v32 = vld [vmem:[#allocation7 + $0x468] ss:$16 sps:$4 sm:$0xff]  }
 0x27a   :  { %4944 = vmatprep.subr.bf16.mxu0 %v6710_v29  ;;  %4926 = vmatpush2.bf16.msra.mxu1 %v6804_v58  ;;  %v3063_v36 = vadd.f32 %v7456_v42, %v559_v27  ;;  %v6809_v29 = vld [vmem:[#allocation7 + $0x44c] ss:$16 sps:$4 sm:$0xff]  }
 0x27b   :  { %v7458_v44 = vpop.f32.mrf.mxu1  ;;  %4927 = vmatprep.subr.bf16.mxu1 %v6812_v40  ;;  %v6863_v27 = vld [vmem:[#allocation7 + $0x52c] ss:$16 sps:$4 sm:$0xff]  }
 0x27d   :  { %4945 = vmatpush1.bf16.msra.mxu0 %v6708_v37  ;;  %v3066_v24 = vpop.f32.mrf.mxu1 }
 0x27e   :  { %4946 = vmatprep.subr.bf16.mxu0 %v6713_v45  ;;  %4928 = vmatpush2.bf16.msra.mxu1 %v6810_v43  ;;  %v6807_v43 = vld [vmem:[#allocation7 + $0x448] ss:$16 sps:$4 sm:$0xff]  }
 0x27f   :  { %v3067_v49 = vpop.f32.mrf.mxu1  ;;  %4979 = vmatprep.subr.bf16.mxu1 %v6818_v47 }
 0x281   :  { %4947 = vmatpush1.bf16.msra.mxu0 %v6711_v46 }
 0x282   :  { %4948 = vmatprep.subr.bf16.mxu0 %v6716_v48  ;;  %v6815_v48 = vld [vmem:[#allocation7 + $0x42c] ss:$16 sps:$4 sm:$0xff]  }
 0x285   :  { %4949 = vmatpush1.bf16.msra.mxu0 %v6714_v51 }
 0x286   :  { %4950 = vmatprep.subr.bf16.mxu0 %v6719_v33  ;;  %v6813_v33 = vld [vmem:[#allocation7 + $0x428] ss:$16 sps:$4 sm:$0xff]  }
 0x289   :  { %4951 = vmatpush1.bf16.msra.mxu0 %v6717_v34 }
 0x28a   :  { %4952 = vmatprep.subr.bf16.mxu0 %v6725_v59  ;;  %v6821_v59 = vld [vmem:[#allocation7 + $0x40c] ss:$16 sps:$4 sm:$0xff]  }
 0x28d   :  { %4953 = vmatpush1.bf16.msra.mxu0 %v6723_v56 }
 0x28e   :  { %4954 = vmatprep.subr.bf16.mxu0 %v6731_v57 }
 0x291   :  { %4955 = vmatpush2.bf16.msra.mxu0 %v6729_v61 }
 0x292   :  { %4956 = vmatprep.subr.bf16.mxu0 %v6737_v62  ;;  %v6819_v62 = vld [vmem:[#allocation7 + $0x408] ss:$16 sps:$4 sm:$0xff]  }
 0x295   :  { %4957 = vmatpush2.bf16.msra.mxu0 %v6735_v38 }
 0x296   :  { %4958 = vmatprep.subr.bf16.mxu0 %v6743_v0  ;;  %v6827_v0 = vld [vmem:[#allocation7 + $0x5ec] ss:$16 sps:$4 sm:$0xff]  }
 0x299   :  { %4959 = vmatpush2.bf16.msra.mxu0 %v6741_v2 }
 0x29a   :  { %4960 = vmatprep.subr.bf16.mxu0 %v6749_v3  ;;  %v6816_v3 = vld [vmem:[#allocation7 + $0x2e8] ss:$16 sps:$4 sm:$0xff]  }
 0x29d   :  { %4961 = vmatpush2.bf16.msra.mxu0 %v6747_v6 }
 0x29e   :  { %4962 = vmatprep.subr.bf16.mxu0 %v6755_v7  ;;  %v6824_v7 = vld [vmem:[#allocation7 + $0x2cc] ss:$16 sps:$4 sm:$0xff]  }
 0x2a1   :  { %4963 = vmatpush2.bf16.msra.mxu0 %v6753_v8  ;;  %v6825_v8 = vld [vmem:[#allocation7 + $0x5e8] ss:$16 sps:$4 sm:$0xff]  }
 0x2a2   :  { %v3103_v30 = vpop.f32.mrf.mxu0  ;;  %4964 = vmatprep.subr.bf16.mxu0 %v6761_v9  ;;  %v6833_v9 = vld [vmem:[#allocation7 + $0x5cc] ss:$16 sps:$4 sm:$0xff]  }
 0x2a3   :  { %v3104_v40 = vadd.f32 %v3103_v30, %v3063_v36  ;;  %v6830_v30 = vld [vmem:[#allocation7 + $0x2ac] ss:$16 sps:$4 sm:$0xff]  }
 0x2a4   :  { %v3105_v39 = vpop.f32.mrf.mxu0  ;;  %v6869_v36 = vld [vmem:[#allocation7 + $0x50c] ss:$16 sps:$4 sm:$0xff]  }
 0x2a5   :  { %4965 = vmatpush2.bf16.msra.mxu0 %v6759_v11  ;;  %v6822_v11 = vld [vmem:[#allocation7 + $0x2c8] ss:$16 sps:$4 sm:$0xff]  }
 0x2a6   :  { %4966 = vmatprep.subr.bf16.mxu0 %v6767_v12  ;;  %v3107_v16 = vpop.f32.mrf.mxu0  ;;  %v6831_v12 = vld [vmem:[#allocation7 + $0x5c8] ss:$16 sps:$4 sm:$0xff]  }
 0x2a7   :  { %v6837_v16 = vld [vmem:[#allocation7 + $0x5a8] ss:$16 sps:$4 sm:$0xff]  }
 0x2a8   :  { %v3108_v19 = vpop.f32.mrf.mxu0 }
 0x2a9   :  { %4967 = vmatpush2.bf16.msra.mxu0 %v6765_v13  ;;  %v6828_v13 = vld [vmem:[#allocation7 + $0x2a8] ss:$16 sps:$4 sm:$0xff]   ;;  %v6845_v19 = vld [vmem:[#allocation7 + $0x58c] ss:$16 sps:$4 sm:$0xff]  }
 0x2aa   :  { %4968 = vmatprep.subr.bf16.mxu0 %v6773_v14  ;;  %v6836_v14 = vld [vmem:[#allocation7 + $0x28c] ss:$16 sps:$4 sm:$0xff]  }
 0x2ad   :  { %4969 = vmatpush2.bf16.msra.mxu0 %v6771_v53  ;;  %v6834_v53 = vld [vmem:[#allocation7 + $0x288] ss:$16 sps:$4 sm:$0xff]  }
 0x2ae   :  { %5020 = vmatprep.subr.bf16.mxu0 %v6779_v21  ;;  %v6843_v21 = vld [vmem:[#allocation7 + $0x588] ss:$16 sps:$4 sm:$0xff]  }
 0x2b0   :  { %4971 = vmatmul.mubr.bf16.vlgmr.msra.gmra.mxu0 %v7417_v26  ;;  %v6803_v26 = vld [vmem:[#allocation7 + $0x46c] ss:$16 sps:$4 sm:$0xff]  }
 0x2b1   :  { %5021 = vmatpush1.bf16.msra.mxu0 %v6777_v41  ;;  %5052 = vmatprep.mubr.bf16.mxu0 %v7449_v1  ;;  %v563_v1 = vrot.slane %v7439_v50, %v562_v10  ;;  %v6851_v41 = vld [vmem:[#allocation7 + $0x56c] ss:$16 sps:$4 sm:$0xff]   ;;  %v6855_v10 = vld [vmem:[#allocation7 + $0x548] ss:$16 sps:$4 sm:$0xff]  }
 0x2b2   :  { %5022 = vmatprep.subr.bf16.mxu0 %v6785_v55  ;;  %v6840_v55 = vld [vmem:[#allocation7 + $0x268] ss:$16 sps:$4 sm:$0xff]  }
 0x2b3   :  { %v3065_v37 = vadd.f32 %v7458_v44, %v563_v1  ;;  %v6860_v1 = vld [vmem:[#allocation7 + $0x20c] ss:$16 sps:$4 sm:$0xff]  }
 0x2b5   :  { %5023 = vmatpush1.bf16.msra.mxu0 %v6783_v22  ;;  %v3106_v46 = vadd.f32 %v3105_v39, %v3065_v37  ;;  %v6839_v39 = vld [vmem:[#allocation7 + $0x5ac] ss:$16 sps:$4 sm:$0xff]  }
 0x2b6   :  { %5024 = vmatprep.subr.bf16.mxu0 %v6791_v28  ;;  %v6848_v22 = vld [vmem:[#allocation7 + $0x24c] ss:$16 sps:$4 sm:$0xff]   ;;  %v6849_v28 = vld [vmem:[#allocation7 + $0x568] ss:$16 sps:$4 sm:$0xff]  }
 0x2b7   :  { %v6866_v37 = vld [vmem:[#allocation7 + $0x3ec] ss:$16 sps:$4 sm:$0xff]  }
 0x2b9   :  { %5025 = vmatpush1.bf16.msra.mxu0 %v6789_v5  ;;  %v3144_v15 = vpop.f32.mrf.mxu1  ;;  %v6857_v5 = vld [vmem:[#allocation7 + $0x54c] ss:$16 sps:$4 sm:$0xff]  }
 0x2ba   :  { %5026 = vmatprep.subr.bf16.mxu0 %v6797_v17  ;;  %v3145_v47 = vadd.f32 %v3144_v15, %v3104_v40  ;;  %v6854_v17 = vld [vmem:[#allocation7 + $0x22c] ss:$16 sps:$4 sm:$0xff]   ;;  %v6867_v40 = vld [vmem:[#allocation7 + $0x508] ss:$16 sps:$4 sm:$0xff]  }
 0x2bb   :  { %v3146_v31 = vpop.f32.mrf.mxu1 }
 0x2bc   :  { %v3147_v50 = vadd.f32 %v3146_v31, %v3106_v46  ;;  %v6861_v31 = vld [vmem:[#allocation7 + $0x528] ss:$16 sps:$4 sm:$0xff]   ;;  %v6872_v46 = vld [vmem:[#allocation7 + $0x3cc] ss:$16 sps:$4 sm:$0xff]  }
 0x2bd   :  { %5027 = vmatpush1.bf16.msra.mxu0 %v6795_v54  ;;  %v3148_v58 = vpop.f32.mrf.mxu1 }
 0x2be   :  { %5028 = vmatprep.subr.bf16.mxu0 %v6803_v26  ;;  %v6852_v26 = vld [vmem:[#allocation7 + $0x228] ss:$16 sps:$4 sm:$0xff]  }
 0x2bf   :  { %v3149_v45 = vpop.f32.mrf.mxu1 }
 0x2c0   :  { %v6941_v45 = vld [vmem:[#allocation10 + $0x74] ss:$8 sps:$4 sm:$0xff]  }
 0x2c1   :  { %5029 = vmatpush1.bf16.msra.mxu0 %v6801_v32  ;;  %v3185_v24 = vpop.f32.mrf.mxu1 }
 0x2c2   :  { %5030 = vmatprep.subr.bf16.mxu0 %v6809_v29  ;;  %v3186_v49 = vadd.f32 %v3185_v24, %v3145_v47  ;;  %v6858_v29 = vld [vmem:[#allocation7 + $0x208] ss:$16 sps:$4 sm:$0xff]   ;;  %v6939_v47 = vld [vmem:[#allocation10 + $0x70] ss:$8 sps:$4 sm:$0xff]  }
 0x2c3   :  { %v3187_v51 = vpop.f32.mrf.mxu1  ;;  %v6870_v24 = vld [vmem:[#allocation7 + $0x3c8] ss:$16 sps:$4 sm:$0xff]  }
 0x2c4   :  { %v3198_v42 = vmul.f32 0.2, %v3186_v49  ;;  %v3188_v34 = vadd.f32 %v3187_v51, %v3147_v50  ;;  %v6875_v50 = vld [vmem:[#allocation7 + $0x3ac] ss:$16 sps:$4 sm:$0xff]   ;;  %v6947_v51 = vld [vmem:[#allocation10 + $0x54] ss:$8 sps:$4 sm:$0xff]  }
 0x2c5   :  { %5031 = vmatpush1.bf16.msra.mxu0 %v6807_v43  ;;  %v3189_v56 = vpop.f32.mrf.mxu1  ;;  %v6864_v43 = vld [vmem:[#allocation7 + $0x3e8] ss:$16 sps:$4 sm:$0xff]  }
 0x2c6   :  { %5032 = vmatprep.subr.bf16.mxu0 %v6815_v48  ;;  %v3199_v44 = vmul.f32 0.2, %v3188_v34  ;;  %v3206_v57 = vmax.f32 %v3186_v49, %v3198_v42  ;;  %v6944_v48 = vld [vmem:[#allocation10 + $0x64] ss:$8 sps:$4 sm:$0xff]   ;;  %v6942_v49 = vld [vmem:[#allocation10 + $0x60] ss:$8 sps:$4 sm:$0xff]  }
 0x2c7   :  { %v3190_v61 = vpop.f32.mrf.mxu1  ;;  %v6878_v42 = vld [vmem:[#allocation7 + $0x38c] ss:$16 sps:$4 sm:$0xff]   ;;  %v6876_v56 = vld [vmem:[#allocation7 + $0x388] ss:$16 sps:$4 sm:$0xff]  }
 0x2c8   :  { %v3207_v38 = vmax.f32 %v3188_v34, %v3199_v44  ;;  %v7470_v6 = vpack.c.bf16 %v3206_v57, %v3206_v57  ;;  %v6945_v34 = vld [vmem:[#allocation10 + $0x50] ss:$8 sps:$4 sm:$0xff]   ;;  %v6953_v57 = vld [vmem:[#allocation10 + $0x34] ss:$8 sps:$4 sm:$0xff]  }
 0x2c9   :  { %5033 = vmatpush1.bf16.msra.mxu0 %v6813_v33  ;;  %v6873_v33 = vld [vmem:[#allocation7 + $0x3a8] ss:$16 sps:$4 sm:$0xff]   ;;  %v6881_v44 = vld [vmem:[#allocation7 + $0x36c] ss:$16 sps:$4 sm:$0xff]   ;;  %v7480_v61 = vld [vmem:[#allocation8] sm:$0xf] }
 0x2ca   :  { %5034 = vmatprep.subr.bf16.mxu0 %v6821_v59  ;;  %v7468_v2 = vpack.c.bf16 %v3207_v38, %v3207_v38  ;;  %v6950_v59 = vld [vmem:[#allocation10 + $0x44] ss:$8 sps:$4 sm:$0xff]   ;;  %v6884_v38 = vld [vmem:[#allocation7 + $0x34c] ss:$16 sps:$4 sm:$0xff]  }
 0x2cc   :  { %4929 = vmatprep.mubr.bf16.mxu1 %v7468_v2 }
 0x2cd   :  { %5035 = vmatpush1.bf16.msra.mxu0 %v6819_v62  ;;  %4930 = vmatmul.mubr.bf16.vlgmr.msra.gmra.mxu1 %v7470_v6  ;;  %v6879_v62 = vld [vmem:[#allocation7 + $0x368] ss:$16 sps:$4 sm:$0xff]  }
 0x2ce   :  { %5036 = vmatprep.subr.bf16.mxu0 %v6827_v0  ;;  %4980 = vmatpush1.bf16.msra.mxu1 %v6816_v3  ;;  %v6951_v0 = vld [vmem:[#allocation10 + $0x30] ss:$8 sps:$4 sm:$0xff]   ;;  %v3477_v3 = vrot.slane %v7480_v61, %v7348_v63 }
 0x2cf   :  { %5011 = vmatprep.mubr.bf16.mxu1 %v7410_v35  ;;  %4981 = vmatprep.subr.bf16.mxu1 %v6824_v7  ;;  %v6842_v35 = vld [vmem:[#allocation7 + $0x26c] ss:$16 sps:$4 sm:$0xff]   ;;  %v6956_v7 = vld [vmem:[#allocation10 + $0x24] ss:$8 sps:$4 sm:$0xff]  }
 0x2d1   :  { %5037 = vmatpush2.bf16.msra.mxu0 %v6825_v8  ;;  %v3481_v8 = vrot.slane %v7480_v61, %v7353_v4 }
 0x2d2   :  { %5038 = vmatprep.subr.bf16.mxu0 %v6833_v9  ;;  %4982 = vmatpush1.bf16.msra.mxu1 %v6822_v11  ;;  %v6882_v9 = vld [vmem:[#allocation7 + $0x348] ss:$16 sps:$4 sm:$0xff]   ;;  %v6887_v11 = vld [vmem:[#allocation7 + $0x32c] ss:$16 sps:$4 sm:$0xff]  }
 0x2d3   :  { %4983 = vmatprep.subr.bf16.mxu1 %v6830_v30  ;;  %v6954_v30 = vld [vmem:[#allocation10 + $0x20] ss:$8 sps:$4 sm:$0xff]  }
 0x2d5   :  { %5039 = vmatpush2.bf16.msra.mxu0 %v6831_v12 }
 0x2d6   :  { %5040 = vmatprep.subr.bf16.mxu0 %v6839_v39  ;;  %4984 = vmatpush1.bf16.msra.mxu1 %v6828_v13  ;;  %v6959_v39 = vld [vmem:[#allocation10 + $0x14] ss:$8 sps:$4 sm:$0xff]  }
 0x2d7   :  { %4985 = vmatprep.subr.bf16.mxu1 %v6836_v14 }
 0x2d9   :  { %5041 = vmatpush2.bf16.msra.mxu0 %v6837_v16 }
 0x2da   :  { %5042 = vmatprep.subr.bf16.mxu0 %v6845_v19  ;;  %4986 = vmatpush1.bf16.msra.mxu1 %v6834_v53  ;;  %v6885_v19 = vld [vmem:[#allocation7 + $0x328] ss:$16 sps:$4 sm:$0xff]  }
 0x2db   :  { %4987 = vmatprep.subr.bf16.mxu1 %v6842_v35  ;;  %v6890_v35 = vld [vmem:[#allocation7 + $0x30c] ss:$16 sps:$4 sm:$0xff]  }
 0x2dd   :  { %5043 = vmatpush2.bf16.msra.mxu0 %v6843_v21  ;;  %v6957_v21 = vld [vmem:[#allocation10 + $0x10] ss:$8 sps:$4 sm:$0xff]  }
 0x2de   :  { %5044 = vmatprep.subr.bf16.mxu0 %v6851_v41  ;;  %4988 = vmatpush1.bf16.msra.mxu1 %v6840_v55  ;;  %v6962_v55 = vld [vmem:[#allocation10 + $0x4] ss:$8 sps:$4 sm:$0xff]  }
 0x2df   :  { %4989 = vmatprep.subr.bf16.mxu1 %v6848_v22 }
 0x2e1   :  { %5045 = vmatpush2.bf16.msra.mxu0 %v6849_v28  ;;  %v6888_v28 = vld [vmem:[#allocation7 + $0x308] ss:$16 sps:$4 sm:$0xff]  }
 0x2e2   :  { %v7475_v54 = vpop.f32.mrf.mxu0  ;;  %5046 = vmatprep.subr.bf16.mxu0 %v6857_v5  ;;  %4990 = vmatpush1.bf16.msra.mxu1 %v6846_v60  ;;  %v6893_v60 = vld [vmem:[#allocation7 + $0x6ec] ss:$16 sps:$4 sm:$0xff]  }
 0x2e3   :  { %4991 = vmatprep.subr.bf16.mxu1 %v6854_v17  ;;  %v4809_v12 = vadd.f32 %v7475_v54, %v3477_v3  ;;  %v6960_v17 = vld [vmem:[#allocation10] ss:$8 sps:$4 sm:$0xff]   ;;  %v6891_v54 = vld [vmem:[#allocation7 + $0x6e8] ss:$16 sps:$4 sm:$0xff]  }
 0x2e4   :  { %v7477_v15 = vpop.f32.mrf.mxu0 }
 0x2e5   :  { %5047 = vmatpush2.bf16.msra.mxu0 %v6855_v10  ;;  %v4811_v14 = vadd.f32 %v7477_v15, %v3481_v8  ;;  %v6965_v10 = vld [vmem:[#allocation10 + $0xf4] ss:$8 sps:$4 sm:$0xff]   ;;  %v6968_v15 = vld [vmem:[#allocation10 + $0xe4] ss:$8 sps:$4 sm:$0xff]   ;;  %v6923_v8 = vld [vmem:[#allocation7 + $0x7ac] ss:$16 sps:$4 sm:$0xff]  }
 0x2e6   :  { %v4812_v32 = vpop.f32.mrf.mxu0  ;;  %5048 = vmatprep.subr.bf16.mxu0 %v6863_v27  ;;  %4992 = vmatpush1.bf16.msra.mxu1 %v6852_v26  ;;  %v6896_v27 = vld [vmem:[#allocation7 + $0x6cc] ss:$16 sps:$4 sm:$0xff]  }
 0x2e7   :  { %4993 = vmatprep.subr.bf16.mxu1 %v6860_v1  ;;  %v6963_v26 = vld [vmem:[#allocation10 + $0xf0] ss:$8 sps:$4 sm:$0xff]   ;;  %v6894_v1 = vld [vmem:[#allocation7 + $0x6c8] ss:$16 sps:$4 sm:$0xff]   ;;  %v6966_v32 = vld [vmem:[#allocation10 + $0xe0] ss:$8 sps:$4 sm:$0xff]  }
 0x2e8   :  { %v4813_v58 = vpop.f32.mrf.mxu0 }
 0x2e9   :  { %5049 = vmatpush2.bf16.msra.mxu0 %v6861_v31  ;;  %v6899_v31 = vld [vmem:[#allocation7 + $0x6ac] ss:$16 sps:$4 sm:$0xff]  }
 0x2ea   :  { %5050 = vmatprep.subr.bf16.mxu0 %v6869_v36  ;;  %4994 = vmatpush1.bf16.msra.mxu1 %v6858_v29  ;;  %v6971_v36 = vld [vmem:[#allocation10 + $0xd4] ss:$8 sps:$4 sm:$0xff]   ;;  %v6902_v58 = vld [vmem:[#allocation7 + $0x68c] ss:$16 sps:$4 sm:$0xff]  }
 0x2eb   :  { %4995 = vmatprep.subr.bf16.mxu1 %v6866_v37  ;;  %v6897_v29 = vld [vmem:[#allocation7 + $0x6a8] ss:$16 sps:$4 sm:$0xff]   ;;  %v6969_v37 = vld [vmem:[#allocation10 + $0xd0] ss:$8 sps:$4 sm:$0xff]  }
 0x2ed   :  { %5051 = vmatpush2.bf16.msra.mxu0 %v6867_v40  ;;  %v6974_v40 = vld [vmem:[#allocation10 + $0xc4] ss:$8 sps:$4 sm:$0xff]  }
 0x2ee   :  { %5510 = vmatprep.subr.bf16.mxu0 %v6941_v45  ;;  %4996 = vmatpush2.bf16.msra.mxu1 %v6864_v43  ;;  %v6905_v45 = vld [vmem:[#allocation7 + $0x66c] ss:$16 sps:$4 sm:$0xff]   ;;  %v6977_v43 = vld [vmem:[#allocation10 + $0xb4] ss:$8 sps:$4 sm:$0xff]  }
 0x2ef   :  { %4997 = vmatprep.subr.bf16.mxu1 %v6872_v46  ;;  %v6903_v46 = vld [vmem:[#allocation7 + $0x668] ss:$16 sps:$4 sm:$0xff]  }
 0x2f0   :  { %5053 = vmatmul.mubr.bf16.vlgmr.msra.gmra.mxu0 %v7451_v23  ;;  %v6948_v23 = vld [vmem:[#allocation10 + $0x40] ss:$8 sps:$4 sm:$0xff]  }
 0x2f1   :  { %5511 = vmatpush1.bf16.msra.mxu0 %v6939_v47  ;;  %v6908_v47 = vld [vmem:[#allocation7 + $0x64c] ss:$16 sps:$4 sm:$0xff]  }
 0x2f2   :  { %5512 = vmatprep.subr.bf16.mxu0 %v6944_v48  ;;  %4998 = vmatpush2.bf16.msra.mxu1 %v6870_v24  ;;  %v6975_v48 = vld [vmem:[#allocation10 + $0xb0] ss:$8 sps:$4 sm:$0xff]   ;;  %v6980_v24 = vld [vmem:[#allocation10 + $0xa4] ss:$8 sps:$4 sm:$0xff]  }
 0x2f3   :  { %4999 = vmatprep.subr.bf16.mxu1 %v6875_v50  ;;  %v6906_v50 = vld [vmem:[#allocation7 + $0x648] ss:$16 sps:$4 sm:$0xff]  }
 0x2f5   :  { %5513 = vmatpush1.bf16.msra.mxu0 %v6942_v49  ;;  %v6911_v49 = vld [vmem:[#allocation7 + $0x62c] ss:$16 sps:$4 sm:$0xff]  }
 0x2f6   :  { %5514 = vmatprep.subr.bf16.mxu0 %v6947_v51  ;;  %5000 = vmatpush2.bf16.msra.mxu1 %v6873_v33  ;;  %v6978_v51 = vld [vmem:[#allocation10 + $0xa0] ss:$8 sps:$4 sm:$0xff]   ;;  %v6983_v33 = vld [vmem:[#allocation10 + $0x94] ss:$8 sps:$4 sm:$0xff]  }
 0x2f7   :  { %5001 = vmatprep.subr.bf16.mxu1 %v6878_v42  ;;  %v6909_v42 = vld [vmem:[#allocation7 + $0x628] ss:$16 sps:$4 sm:$0xff]  }
 0x2f9   :  { %5515 = vmatpush1.bf16.msra.mxu0 %v6945_v34  ;;  %v6914_v34 = vld [vmem:[#allocation7 + $0x60c] ss:$16 sps:$4 sm:$0xff]  }
 0x2fa   :  { %5516 = vmatprep.subr.bf16.mxu0 %v6950_v59  ;;  %5002 = vmatpush2.bf16.msra.mxu1 %v6876_v56  ;;  %v6981_v59 = vld [vmem:[#allocation10 + $0x90] ss:$8 sps:$4 sm:$0xff]   ;;  %v6986_v56 = vld [vmem:[#allocation10 + $0x84] ss:$8 sps:$4 sm:$0xff]  }
 0x2fb   :  { %5003 = vmatprep.subr.bf16.mxu1 %v6881_v44  ;;  %v6912_v44 = vld [vmem:[#allocation7 + $0x608] ss:$16 sps:$4 sm:$0xff]  }
 0x2fd   :  { %5517 = vmatpush1.bf16.msra.mxu0 %v6948_v23  ;;  %v6917_v23 = vld [vmem:[#allocation7 + $0x7ec] ss:$16 sps:$4 sm:$0xff]  }
 0x2fe   :  { %5518 = vmatprep.subr.bf16.mxu0 %v6953_v57  ;;  %5004 = vmatpush2.bf16.msra.mxu1 %v6879_v62  ;;  %v6984_v57 = vld [vmem:[#allocation10 + $0x80] ss:$8 sps:$4 sm:$0xff]   ;;  %v6915_v62 = vld [vmem:[#allocation7 + $0x7e8] ss:$16 sps:$4 sm:$0xff]  }
 0x2ff   :  { %5005 = vmatprep.subr.bf16.mxu1 %v6884_v38  ;;  %v6920_v38 = vld [vmem:[#allocation7 + $0x7cc] ss:$16 sps:$4 sm:$0xff]  }
 0x301   :  { %5519 = vmatpush1.bf16.msra.mxu0 %v6951_v0  ;;  %v4849_v13 = vpop.f32.mrf.mxu1  ;;  %v6918_v0 = vld [vmem:[#allocation7 + $0x7c8] ss:$16 sps:$4 sm:$0xff]  }
 0x302   :  { %5520 = vmatprep.subr.bf16.mxu0 %v6956_v7  ;;  %v7488_v16 = vadd.f32 %v4849_v13, %v4809_v12  ;;  %5006 = vmatpush2.bf16.msra.mxu1 %v6882_v9 }
 0x303   :  { %v4851_v53 = vpop.f32.mrf.mxu1  ;;  %5007 = vmatprep.subr.bf16.mxu1 %v6887_v11 }
 0x304   :  { %v7490_v41 = vadd.f32 %v4851_v53, %v4811_v14  ;;  %v6924_v14 = vld [vmem:[#allocation7 + $0x788] ss:$16 sps:$4 sm:$0xff]  }
 0x305   :  { %5521 = vmatpush1.bf16.msra.mxu0 %v6954_v30  ;;  %v4853_v22 = vpop.f32.mrf.mxu1  ;;  %v6921_v30 = vld [vmem:[#allocation7 + $0x7a8] ss:$16 sps:$4 sm:$0xff]  }
 0x306   :  { %5522 = vmatprep.subr.bf16.mxu0 %v6959_v39  ;;  %5008 = vmatpush2.bf16.msra.mxu1 %v6885_v19  ;;  %v6926_v39 = vld [vmem:[#allocation7 + $0x78c] ss:$16 sps:$4 sm:$0xff]   ;;  %v6927_v53 = vld [vmem:[#allocation7 + $0x768] ss:$16 sps:$4 sm:$0xff]  }
 0x307   :  { %v4854_v5 = vpop.f32.mrf.mxu1  ;;  %5009 = vmatprep.subr.bf16.mxu1 %v6890_v35  ;;  %v6929_v19 = vld [vmem:[#allocation7 + $0x76c] ss:$16 sps:$4 sm:$0xff]   ;;  %v6930_v35 = vld [vmem:[#allocation7 + $0x748] ss:$16 sps:$4 sm:$0xff]  }
 0x308   :  { %v6936_v22 = vld [vmem:[#allocation7 + $0x708] ss:$16 sps:$4 sm:$0xff]  }
 0x309   :  { %5523 = vmatpush1.bf16.msra.mxu0 %v6957_v21  ;;  %v6935_v21 = vld [vmem:[#allocation7 + $0x72c] ss:$16 sps:$4 sm:$0xff]   ;;  %v6989_v5 = vld [vmem:[#allocation10 + $0x174] ss:$8 sps:$4 sm:$0xff]  }
 0x30a   :  { %5524 = vmatprep.subr.bf16.mxu0 %v6962_v55  ;;  %5010 = vmatpush2.bf16.msra.mxu1 %v6888_v28  ;;  %v6938_v55 = vld [vmem:[#allocation7 + $0x70c] ss:$16 sps:$4 sm:$0xff]  }
 0x30b   :  { %5061 = vmatprep.subr.bf16.mxu1 %v6893_v60  ;;  %v6987_v28 = vld [vmem:[#allocation10 + $0x170] ss:$8 sps:$4 sm:$0xff]   ;;  %v6992_v60 = vld [vmem:[#allocation10 + $0x164] ss:$8 sps:$4 sm:$0xff]  }
 0x30d   :  { %5525 = vmatpush1.bf16.msra.mxu0 %v6960_v17  ;;  %5012 = vmatmul.mubr.bf16.vlgmr.msra.gmra.mxu1 %v7434_v18  ;;  %v6900_v18 = vld [vmem:[#allocation7 + $0x688] ss:$16 sps:$4 sm:$0xff]   ;;  %v6990_v17 = vld [vmem:[#allocation10 + $0x160] ss:$8 sps:$4 sm:$0xff]  }
 0x30e   :  { %5526 = vmatprep.subr.bf16.mxu0 %v6965_v10  ;;  %5062 = vmatpush1.bf16.msra.mxu1 %v6891_v54  ;;  %v6995_v10 = vld [vmem:[#allocation10 + $0x154] ss:$8 sps:$4 sm:$0xff]   ;;  %v6993_v54 = vld [vmem:[#allocation10 + $0x150] ss:$8 sps:$4 sm:$0xff]  }
 0x30f   :  { %5093 = vmatprep.mubr.bf16.mxu1 %v7468_v2  ;;  %5063 = vmatprep.subr.bf16.mxu1 %v6896_v27  ;;  %v6972_v2 = vld [vmem:[#allocation10 + $0xc0] ss:$8 sps:$4 sm:$0xff]   ;;  %v6998_v27 = vld [vmem:[#allocation10 + $0x144] ss:$8 sps:$4 sm:$0xff]  }
 0x311   :  { %5527 = vmatpush2.bf16.msra.mxu0 %v6963_v26  ;;  %v6996_v26 = vld [vmem:[#allocation10 + $0x140] ss:$8 sps:$4 sm:$0xff]  }
 0x312   :  { %5528 = vmatprep.subr.bf16.mxu0 %v6968_v15  ;;  %5064 = vmatpush1.bf16.msra.mxu1 %v6894_v1  ;;  %v7001_v15 = vld [vmem:[#allocation10 + $0x134] ss:$8 sps:$4 sm:$0xff]   ;;  %v6999_v1 = vld [vmem:[#allocation10 + $0x130] ss:$8 sps:$4 sm:$0xff]  }
 0x313   :  { %5065 = vmatprep.subr.bf16.mxu1 %v6899_v31  ;;  %v7002_v31 = vld [vmem:[#allocation10 + $0x120] ss:$8 sps:$4 sm:$0xff]  }
 0x315   :  { %5529 = vmatpush2.bf16.msra.mxu0 %v6966_v32  ;;  %v7007_v32 = vld [vmem:[#allocation10 + $0x114] ss:$8 sps:$4 sm:$0xff]  }
 0x316   :  { %5530 = vmatprep.subr.bf16.mxu0 %v6971_v36  ;;  %5066 = vmatpush1.bf16.msra.mxu1 %v6897_v29  ;;  %v7005_v36 = vld [vmem:[#allocation10 + $0x110] ss:$8 sps:$4 sm:$0xff]   ;;  %v7010_v29 = vld [vmem:[#allocation10 + $0x104] ss:$8 sps:$4 sm:$0xff]  }
 0x317   :  { %5067 = vmatprep.subr.bf16.mxu1 %v6902_v58 }
 0x319   :  { %5531 = vmatpush2.bf16.msra.mxu0 %v6969_v37  ;;  %v7008_v37 = vld [vmem:[#allocation10 + $0x100] ss:$8 sps:$4 sm:$0xff]  }
 0x31a   :  { %5532 = vmatprep.subr.bf16.mxu0 %v6974_v40  ;;  %5068 = vmatpush1.bf16.msra.mxu1 %v6900_v18  ;;  %v7013_v40 = vld [vmem:[#allocation10 + $0x1f4] ss:$8 sps:$4 sm:$0xff]  }
 0x31b   :  { %5069 = vmatprep.subr.bf16.mxu1 %v6905_v45 }
 0x31d   :  { %5533 = vmatpush2.bf16.msra.mxu0 %v6972_v2  ;;  %v7011_v2 = vld [vmem:[#allocation10 + $0x1f0] ss:$8 sps:$4 sm:$0xff]  }
 0x31e   :  { %5534 = vmatprep.subr.bf16.mxu0 %v6977_v43  ;;  %5070 = vmatpush1.bf16.msra.mxu1 %v6903_v46  ;;  %v7016_v43 = vld [vmem:[#allocation10 + $0x1e4] ss:$8 sps:$4 sm:$0xff]  }
 0x31f   :  { %5071 = vmatprep.subr.bf16.mxu1 %v6908_v47  ;;  %v7014_v47 = vld [vmem:[#allocation10 + $0x1e0] ss:$8 sps:$4 sm:$0xff]  }
 0x321   :  { %5535 = vmatpush2.bf16.msra.mxu0 %v6975_v48  ;;  %v7019_v48 = vld [vmem:[#allocation10 + $0x1d4] ss:$8 sps:$4 sm:$0xff]  }
 0x322   :  { %5536 = vmatprep.subr.bf16.mxu0 %v6980_v24  ;;  %5072 = vmatpush1.bf16.msra.mxu1 %v6906_v50  ;;  %v7017_v24 = vld [vmem:[#allocation10 + $0x1d0] ss:$8 sps:$4 sm:$0xff]   ;;  %v7022_v50 = vld [vmem:[#allocation10 + $0x1c4] ss:$8 sps:$4 sm:$0xff]  }
 0x323   :  { %5073 = vmatprep.subr.bf16.mxu1 %v6911_v49  ;;  %v7020_v49 = vld [vmem:[#allocation10 + $0x1c0] ss:$8 sps:$4 sm:$0xff]  }
 0x325   :  { %5537 = vmatpush2.bf16.msra.mxu0 %v6978_v51  ;;  %v7025_v51 = vld [vmem:[#allocation10 + $0x1b4] ss:$8 sps:$4 sm:$0xff]  }
 0x326   :  { %5538 = vmatprep.subr.bf16.mxu0 %v6983_v33  ;;  %5074 = vmatpush1.bf16.msra.mxu1 %v6909_v42  ;;  %v7023_v33 = vld [vmem:[#allocation10 + $0x1b0] ss:$8 sps:$4 sm:$0xff]   ;;  %v7028_v42 = vld [vmem:[#allocation10 + $0x1a4] ss:$8 sps:$4 sm:$0xff]  }
 0x327   :  { %5075 = vmatprep.subr.bf16.mxu1 %v6914_v34  ;;  %v7026_v34 = vld [vmem:[#allocation10 + $0x1a0] ss:$8 sps:$4 sm:$0xff]  }
 0x329   :  { %5539 = vmatpush2.bf16.msra.mxu0 %v6981_v59 }
 0x32a   :  { %5540 = vmatprep.subr.bf16.mxu0 %v6986_v56  ;;  %5076 = vmatpush1.bf16.msra.mxu1 %v6912_v44 }
 0x32b   :  { %5077 = vmatprep.subr.bf16.mxu1 %v6917_v23  ;;  %v7031_v23 = vld [vmem:[#allocation10 + $0x194] ss:$8 sps:$4 sm:$0xff]  }
 0x32d   :  { %5541 = vmatpush2.bf16.msra.mxu0 %v6984_v57 }
 0x32e   :  { %5078 = vmatpush2.bf16.msra.mxu1 %v6915_v62 }
 0x32f   :  { %5079 = vmatprep.subr.bf16.mxu1 %v6920_v38  ;;  %v7029_v38 = vld [vmem:[#allocation10 + $0x190] ss:$8 sps:$4 sm:$0xff]  }
 0x330   :  { %v4890_v3 = vpop.f32.mrf.mxu0 }
 0x331   :  { %v7495_v7 = vadd.f32 %v4890_v3, %v7488_v16  ;;  %v6932_v16 = vld [vmem:[#allocation7 + $0x74c] ss:$16 sps:$4 sm:$0xff]  }
 0x332   :  { %v4892_v9 = vpop.f32.mrf.mxu0  ;;  %5080 = vmatpush2.bf16.msra.mxu1 %v6918_v0 }
 0x333   :  { %v7498_v11 = vadd.f32 %v4892_v9, %v7490_v41  ;;  %5081 = vmatprep.subr.bf16.mxu1 %v6923_v8  ;;  %v6933_v41 = vld [vmem:[#allocation7 + $0x728] ss:$16 sps:$4 sm:$0xff]  }
 0x334   :  { %v4894_v12 = vpop.f32.mrf.mxu0 }
 0x336   :  { %v4895_v13 = vpop.f32.mrf.mxu0  ;;  %5082 = vmatpush2.bf16.msra.mxu1 %v6921_v30  ;;  %v7034_v30 = vld [vmem:[#allocation10 + $0x184] ss:$8 sps:$4 sm:$0xff]  }
 0x337   :  { %5083 = vmatprep.subr.bf16.mxu1 %v6926_v39  ;;  %v7032_v39 = vld [vmem:[#allocation10 + $0x180] ss:$8 sps:$4 sm:$0xff]  }
 0x33a   :  { %5084 = vmatpush2.bf16.msra.mxu1 %v6924_v14 }
 0x33b   :  { %5085 = vmatprep.subr.bf16.mxu1 %v6929_v19 }
 0x33e   :  { %5086 = vmatpush2.bf16.msra.mxu1 %v6927_v53 }
 0x33f   :  { %5087 = vmatprep.subr.bf16.mxu1 %v6932_v16  ;;  %v3485_v16 = vrot.slane %v7480_v61, %v542_v25  ;;  %v7038_v25 = vld [vmem:[#allocation13 + $0x30] sm:$0xff]  }
 0x342   :  { %5088 = vmatpush2.bf16.msra.mxu1 %v6930_v35  ;;  %v3489_v35 = vrot.slane %v7480_v61, %v546_v20  ;;  %v7040_v20 = vld [vmem:[#allocation13 + $0x28] sm:$0xff]   ;;  %v7041_v61 = vld [vmem:[#allocation13 + $0x60] sm:$0xff]  }
 0x343   :  { %5089 = vmatprep.subr.bf16.mxu1 %v6935_v21 }
 0x346   :  { %5090 = vmatpush2.bf16.msra.mxu1 %v6933_v41 }
 0x347   :  { %5091 = vmatprep.subr.bf16.mxu1 %v6938_v55 }
 0x34a   :  { %5092 = vmatpush2.bf16.msra.mxu1 %v6936_v22 }
 0x34b   :  { %5551 = vmatprep.subr.bf16.mxu1 %v6989_v5 }
 0x34d   :  { %5094 = vmatmul.mubr.bf16.vlgmr.msra.gmra.mxu1 %v7470_v6  ;;  %v7004_v6 = vld [vmem:[#allocation10 + $0x124] ss:$8 sps:$4 sm:$0xff]  }
 0x34e   :  { %5552 = vmatpush1.bf16.msra.mxu1 %v6987_v28 }
 0x34f   :  { %5553 = vmatprep.subr.bf16.mxu1 %v6992_v60 }
 0x352   :  { %5554 = vmatpush1.bf16.msra.mxu1 %v6990_v17 }
 0x353   :  { %5555 = vmatprep.subr.bf16.mxu1 %v6995_v10 }
 0x356   :  { %5556 = vmatpush1.bf16.msra.mxu1 %v6993_v54 }
 0x357   :  { %5557 = vmatprep.subr.bf16.mxu1 %v6998_v27  ;;  %v7035_v27 = vld [vmem:[#allocation13 + $0x78] sm:$0xff]  }
 0x358   :  { %6517 = vmatprep.subr.bf16.mxu0 %v7035_v27 }
 0x35a   :  { %5558 = vmatpush1.bf16.msra.mxu1 %v6996_v26  ;;  %v7036_v26 = vld [vmem:[#allocation13 + $0x38] sm:$0xff]  }
 0x35b   :  { %5559 = vmatprep.subr.bf16.mxu1 %v7001_v15  ;;  %v7037_v15 = vld [vmem:[#allocation13 + $0x70] sm:$0xff]  }
 0x35e   :  { %5560 = vmatpush1.bf16.msra.mxu1 %v6999_v1  ;;  %v7042_v1 = vld [vmem:[#allocation13 + $0x20] sm:$0xff]  }
 0x35f   :  { %5561 = vmatprep.subr.bf16.mxu1 %v7004_v6  ;;  %v7043_v6 = vld [vmem:[#allocation13 + $0x58] sm:$0xff]  }
 0x362   :  { %5562 = vmatpush1.bf16.msra.mxu1 %v7002_v31  ;;  %v7044_v31 = vld [vmem:[#allocation13 + $0x18] sm:$0xff]  }
 0x363   :  { %5563 = vmatprep.subr.bf16.mxu1 %v7007_v32 }
 0x366   :  { %5564 = vmatpush1.bf16.msra.mxu1 %v7005_v36 }
 0x367   :  { %5565 = vmatprep.subr.bf16.mxu1 %v7010_v29 }
 0x36a   :  { %5566 = vmatpush1.bf16.msra.mxu1 %v7008_v37 }
 0x36b   :  { %5567 = vmatprep.subr.bf16.mxu1 %v7013_v40 }
 0x36e   :  { %5568 = vmatpush2.bf16.msra.mxu1 %v7011_v2 }
 0x36f   :  { %5569 = vmatprep.subr.bf16.mxu1 %v7016_v43 }
 0x370   :  { %v4972_v58 = vpop.f32.mrf.mxu0 }
 0x371   :  { %v4973_v21 = vadd.f32 %v4972_v58, %v3485_v16  ;;  %v6516_v16 = vld [vmem:[#allocation2] ss:$0 sm:$0xff] }
 0x372   :  { %v4974_v18 = vpop.f32.mrf.mxu0  ;;  %5570 = vmatpush2.bf16.msra.mxu1 %v7014_v47 }
 0x373   :  { %5571 = vmatprep.subr.bf16.mxu1 %v7019_v48  ;;  %v4975_v55 = vadd.f32 %v4974_v18, %v3489_v35  ;;  %v7045_v48 = vld [vmem:[#allocation13 + $0x50] sm:$0xff]  }
 0x374   :  { %v4976_v45 = vpop.f32.mrf.mxu0 }
 0x376   :  { %v4977_v46 = vpop.f32.mrf.mxu0  ;;  %5572 = vmatpush2.bf16.msra.mxu1 %v7017_v24  ;;  %v7046_v24 = vld [vmem:[#allocation13 + $0x10] sm:$0xff]  }
 0x377   :  { %5573 = vmatprep.subr.bf16.mxu1 %v7022_v50 }
 0x37a   :  { %5574 = vmatpush2.bf16.msra.mxu1 %v7020_v49 }
 0x37b   :  { %5575 = vmatprep.subr.bf16.mxu1 %v7025_v51  ;;  %v7047_v51 = vld [vmem:[#allocation13 + $0x48] sm:$0xff]  }
 0x37e   :  { %5576 = vmatpush2.bf16.msra.mxu1 %v7023_v33  ;;  %v7048_v33 = vld [vmem:[#allocation13 + $0x8] sm:$0xff]  }
 0x37f   :  { %5577 = vmatprep.subr.bf16.mxu1 %v7028_v42 }
 0x382   :  { %5578 = vmatpush2.bf16.msra.mxu1 %v7026_v34 }
 0x383   :  { %5579 = vmatprep.subr.bf16.mxu1 %v7031_v23 }
 0x386   :  { %5580 = vmatpush2.bf16.msra.mxu1 %v7029_v38 }
 0x387   :  { %5581 = vmatprep.subr.bf16.mxu1 %v7034_v30 }
 0x38a   :  { %5582 = vmatpush2.bf16.msra.mxu1 %v7032_v39 }
 0x38d   :  { %v4931_v59 = vpop.f32.mrf.mxu1 }
 0x38e   :  { %v4932_v56 = vadd.f32 %v4931_v59, %v7495_v7  ;;  %v7049_v59 = vld [vmem:[#allocation13 + $0x40] sm:$0xff]  }
 0x38f   :  { %v4933_v44 = vpop.f32.mrf.mxu1 }
 0x390   :  { %v5102_v57 = vmul.f32 0.2, %v4932_v56  ;;  %v4934_v62 = vadd.f32 %v4933_v44, %v7498_v11  ;;  %v5178_v44 = vld [vmem:[#allocation11] sm:$0x3] }
 0x391   :  { %v4935_v0 = vpop.f32.mrf.mxu1  ;;  %v5183_v23 = vrot.slane %v5178_v44, %v7348_v63 }
 0x392   :  { %v5103_v3 = vmul.f32 0.2, %v4934_v62  ;;  %v5106_v8 = vmax.f32 %v4932_v56, %v5102_v57  ;;  %v7050_v56 = vld [vmem:[#allocation13] sm:$0xff]   ;;  %v5187_v57 = vrot.slane %v5178_v44, %v7353_v4 }
 0x393   :  { %v4936_v9 = vpop.f32.mrf.mxu1 }
 0x394   :  { %v5107_v12 = vmax.f32 %v4934_v62, %v5103_v3  ;;  %v5110_v7 = vpack.c.bf16 %v5106_v8, %v5106_v8 }
 0x396   :  { %v5111_v13 = vpack.c.bf16 %v5107_v12, %v5107_v12 }
 0x398   :  { %5542 = vmatprep.mubr.bf16.mxu0 %v5111_v13 }
 0x399   :  { %5543 = vmatmul.mubr.bf16.vlgmr.msra.gmra.mxu0 %v5110_v7 }
 0x39a   :  { %6518 = vmatpush3.bf16.msra.mxu0 %v7036_v26 }
 0x39b   :  { %6519 = vmatprep.subr.bf16.mxu0 %v7037_v15 }
 0x39e   :  { %6520 = vmatpush3.bf16.msra.mxu0 %v7038_v25 }
 0x39f   :  { %6521 = vmatprep.subr.bf16.mxu0 %v7039_v52 }
 0x3a2   :  { %6522 = vmatpush3.bf16.msra.mxu0 %v7040_v20 }
 0x3a3   :  { %6523 = vmatprep.subr.bf16.mxu0 %v7041_v61 }
 0x3a6   :  { %6524 = vmatpush3.bf16.msra.mxu0 %v7042_v1 }
 0x3a7   :  { %6525 = vmatprep.subr.bf16.mxu0 %v7043_v6 }
 0x3aa   :  { %6526 = vmatpush3.bf16.msra.mxu0 %v7044_v31 }
 0x3ab   :  { %6527 = vmatprep.subr.bf16.mxu0 %v7045_v48 }
 0x3ae   :  { %6528 = vmatpush3.bf16.msra.mxu0 %v7046_v24 }
 0x3af   :  { %6529 = vmatprep.subr.bf16.mxu0 %v7047_v51 }
 0x3b0   :  { %v5054_v14 = vpop.f32.mrf.mxu0 }
 0x3b2   :  { %v5056_v19 = vpop.f32.mrf.mxu0  ;;  %6530 = vmatpush3.bf16.msra.mxu0 %v7048_v33 }
 0x3b3   :  { %6531 = vmatprep.subr.bf16.mxu0 %v7049_v59 }
 0x3b4   :  { %v5058_v53 = vpop.f32.mrf.mxu0 }
 0x3b6   :  { %v5059_v11 = vpop.f32.mrf.mxu0  ;;  %6532 = vmatpush3.bf16.msra.mxu0 %v7050_v56 }
 0x3cd   :  { %v5013_v41 = vpop.f32.mrf.mxu1 }
 0x3ce   :  { %v5014_v22 = vadd.f32 %v5013_v41, %v4973_v21 }
 0x3cf   :  { %v5015_v28 = vpop.f32.mrf.mxu1 }
 0x3d0   :  { %v5016_v5 = vadd.f32 %v5015_v28, %v4975_v55  ;;  %v5055_v60 = vadd.f32 %v5054_v14, %v5014_v22 }
 0x3d1   :  { %v5017_v17 = vpop.f32.mrf.mxu1 }
 0x3d2   :  { %v5057_v10 = vadd.f32 %v5056_v19, %v5016_v5 }
 0x3d3   :  { %v5018_v54 = vpop.f32.mrf.mxu1 }
 0x40d   :  { %v5095_v32 = vpop.f32.mrf.mxu1 }
 0x40e   :  { %v5096_v36 = vadd.f32 %v5095_v32, %v5055_v60 }
 0x40f   :  { %v5097_v29 = vpop.f32.mrf.mxu1 }
 0x410   :  { %v5104_v58 = vmul.f32 0.2, %v5096_v36  ;;  %v5098_v37 = vadd.f32 %v5097_v29, %v5057_v10 }
 0x411   :  { %v5099_v40 = vpop.f32.mrf.mxu1 }
 0x412   :  { %v5105_v18 = vmul.f32 0.2, %v5098_v37  ;;  %v5108_v45 = vmax.f32 %v5096_v36, %v5104_v58 }
 0x413   :  { %v5100_v2 = vpop.f32.mrf.mxu1 }
 0x414   :  { %v5109_v43 = vmax.f32 %v5098_v37, %v5105_v18  ;;  %v5112_v47 = vpack.c.bf16 %v5108_v45, %v5108_v45 }
 0x416   :  { %v5113_v46 = vpack.c.bf16 %v5109_v43, %v5109_v43 }
 0x418   :  { %5583 = vmatprep.mubr.bf16.mxu1 %v5113_v46 }
 0x419   :  { %5584 = vmatmul.mubr.bf16.vlgmr.msra.gmra.mxu1 %v5112_v47 }
 0x459   :  { %v5544_v50 = vpop.f32.mrf.mxu0 }
 0x45a   :  { %v5545_v62 = vadd.f32 %v5544_v50, %v5183_v23 }
 0x45b   :  { %v5546_v49 = vpop.f32.mrf.mxu0 }
 0x45c   :  { %v5547_v0 = vadd.f32 %v5546_v49, %v5187_v57 }
 0x45d   :  { %v5548_v42 = vpop.f32.mrf.mxu0 }
 0x45f   :  { %v5549_v34 = vpop.f32.mrf.mxu0 }
 0x4d9   :  { %v5585_v38 = vpop.f32.mrf.mxu1 }
 0x4da   :  { %v5586_v3 = vadd.f32 %v5585_v38, %v5545_v62 }
 0x4db   :  { %v5587_v8 = vpop.f32.mrf.mxu1 }
 0x4dc   :  { %v5592_v9 = vmul.f32 0.2, %v5586_v3  ;;  %v5588_v30 = vadd.f32 %v5587_v8, %v5547_v0 }
 0x4dd   :  { %v5589_v12 = vpop.f32.mrf.mxu1 }
 0x4de   :  { %v5593_v39 = vmul.f32 0.2, %v5588_v30  ;;  %v5594_v13 = vmax.f32 %v5586_v3, %v5592_v9 }
 0x4df   :  { %v5590_v7 = vpop.f32.mrf.mxu1 }
 0x4e0   :  { %v5595_v14 = vmax.f32 %v5588_v30, %v5593_v39  ;;  %v5596_v53 = vpack.c.bf16 %v5594_v13, %v5594_v13 }
 0x4e2   :  { %v5597_v19 = vpack.c.bf16 %v5595_v14, %v5595_v14 }
 0x4e4   :  { %5758 = vmatprep.mubr.bf16.mxu0 %v5597_v19 }
 0x4e5   :  { %5759 = vmatmul.mubr.bf16.vlgmr.msra.gmra.mxu0 %v5596_v53 }
 0x5a5   :  { %v6533_v11 = vpop.f32.mrf.mxu0 }
 0x5a7   :  { %v6534_v63 = vpop.f32.mrf.mxu0 }
 0x5a8   :  { %v6535_v4 = vadd.f32 %v6534_v63, %v6533_v11 }
 0x5a9   :  { %v6536_v35 = vpop.f32.mrf.mxu0 }
 0x5aa   :  { %v5773_v21 = vadd.f32 %v6535_v4, %v6516_v16 }
 0x5ab   :  { %v6537_v41 = vpop.f32.mrf.mxu0 }
 0x5ac   :  { %5775 = vst.msk [vmem:[%s7523_s9] sm:$0xff] %vm5774_vm1, %v5773_v21 }
 0x5ad   :  { %5780 = vsyncpa [#allocation4], 1 }
 0x5ae   :  { %5781 = vsyncpa [#allocation6], 1 }
 0x5af   :  { %5782 = vsyncpa [#allocation9], 1 }
 0x5b0   :  { %5783 = vsyncpa [#allocation12], 1 }

</bundles_post_ra>
